<compile_context>
chip_gen: v7x
topology: tpu7x:2x2x1
jax: 0.10.0
libtpu: 0.0.40
codegen_flags: <defaults>
</compile_context>

<pallas_src>
import functools

import jax
import jax.numpy as jnp
from jax.experimental import pallas as pl
from jax.experimental.pallas import tpu as pltpu  # noqa: F401  (TPU backend)

# ---- config (mirrors the `c` config object in the PyTorch source) ----------
N_EMBD = 32          # c.n_embd
N_HIDDEN = 32        # c.n_hidden  (block FFN hidden = 4 * N_HIDDEN = 128)
BLOCK_SIZE = 8       # c.block_size (sequence length T)
N_INPUT = N_EMBD     # c.n_input  (classifier input = pooled embedding)
N_OUTPUT = 4         # c.n_output
VOCAB_SIZE = 16      # vocab_size
N_LAYER = 4
N_HEAD = 4
HEAD_SIZE = N_EMBD // N_HEAD
FFN_HIDDEN = 4 * N_HIDDEN
LN_EPS = 1e-5


# ---------------------------------------------------------------------------
# in-kernel helpers
# ---------------------------------------------------------------------------
def _layernorm(x, w, b):
    mu = jnp.mean(x, axis=-1, keepdims=True)
    xc = x - mu
    var = jnp.mean(xc * xc, axis=-1, keepdims=True)
    return xc * jax.lax.rsqrt(var + LN_EPS) * w + b


def _softmax_lastdim(s):
    s = s - jnp.max(s, axis=-1, keepdims=True)
    e = jnp.exp(s)
    denom = jnp.sum(e, axis=-1, keepdims=True)
    return e * pl.reciprocal(denom, approx=True)   # EUP reciprocal, VALU stays free


# ---------------------------------------------------------------------------
# Single fused kernel: embeddings in -> logits + all attention maps out.
# No grid: one invocation, everything resident in VMEM.
# ---------------------------------------------------------------------------
def encoder_kernel(x_ref,
                   ln1_w_ref, ln1_b_ref, wqkv_ref, wproj_ref, bproj_ref,
                   ln2_w_ref, ln2_b_ref, w1_ref, b1_ref, w2_ref, b2_ref,
                   lnf_w_ref, lnf_b_ref,
                   cls_w1_ref, cls_b1_ref, cls_w2_ref, cls_b2_ref,
                   logits_ref, attn_ref):
    BT, C = x_ref.shape
    T = BLOCK_SIZE
    B = BT // T
    scale = HEAD_SIZE ** -0.5

    x = x_ref[...]                                      # (B*T, C)
    attn_pieces = []                                    # appended in (layer, head) order

    for l in range(N_LAYER):                            # static, unrolled
        # --- multi-head self-attention on ln1(x) ---
        xn = _layernorm(x, ln1_w_ref[l], ln1_b_ref[l])  # (B*T, C)
        qkv = jnp.dot(xn, wqkv_ref[l],
                      preferred_element_type=jnp.float32)          # (B*T, 3C)
        qkv = qkv.reshape(B, T, 3 * C)

        head_outs = []
        for h in range(N_HEAD):                         # static, unrolled
            lo = h * HEAD_SIZE
            q = qkv[:, :, lo:lo + HEAD_SIZE]                        # (B, T, hs)
            k = qkv[:, :, C + lo:C + lo + HEAD_SIZE]                # (B, T, hs)
            v = qkv[:, :, 2 * C + lo:2 * C + lo + HEAD_SIZE]        # (B, T, hs)
            s = jnp.einsum("bqd,bkd->bqk", q, k,
                           preferred_element_type=jnp.float32) * scale
            p = _softmax_lastdim(s)                                 # (B, T, T) no mask
            attn_pieces.append(p)
            head_outs.append(jnp.einsum("bqk,bkd->bqd", p, v,
                                        preferred_element_type=jnp.float32))
        concat = jnp.concatenate(head_outs, axis=-1).reshape(BT, C)  # (B*T, C)
        sa = jnp.dot(concat, wproj_ref[l],
                     preferred_element_type=jnp.float32) + bproj_ref[l]
        x = x + sa                                       # residual 1

        # --- feed-forward on ln2(x) ---
        xn2 = _layernorm(x, ln2_w_ref[l], ln2_b_ref[l])
        h1 = jnp.maximum(
            jnp.dot(xn2, w1_ref[l], preferred_element_type=jnp.float32) + b1_ref[l],
            0.0)
        ff = jnp.dot(h1, w2_ref[l], preferred_element_type=jnp.float32) + b2_ref[l]
        x = x + ff                                       # residual 2

    # lane-dense attention slab: (B, T, L*H*T) with last dim = 128
    # element [b, tq, (l*H + h)*T + tk] = attention prob of layer l, head h
    attn_ref[...] = jnp.concatenate(attn_pieces, axis=-1)

    # --- final LayerNorm, mean-pool over T, classifier FeedForward ---
    xn = _layernorm(x, lnf_w_ref[0], lnf_b_ref[0])       # (B*T, C)
    pooled = jnp.mean(xn.reshape(B, T, C), axis=1)       # (B, C)   x.mean(dim=-2)
    hc = jnp.maximum(
        jnp.dot(pooled, cls_w1_ref[...],
                preferred_element_type=jnp.float32) + cls_b1_ref[0],
        0.0)
    logits_ref[...] = jnp.dot(hc, cls_w2_ref[...],
                              preferred_element_type=jnp.float32) + cls_b2_ref[0]


# ---------------------------------------------------------------------------
# Full Encoder forward
# ---------------------------------------------------------------------------
def encoder_forward(params, idx):
    B, T = idx.shape
    # TODO(synk): embedding gather (data-dependent) kept in plain JAX glue.
    tok_emb = jnp.take(params["tok_emb"], idx, axis=0)   # (B, T, C)
    pos_emb = params["pos_emb"][:T]                      # (T, C)
    x = (tok_emb + pos_emb[None, :, :]).reshape(B * T, N_EMBD).astype(jnp.float32)

    # NOTE: on v7x one could shard B across the two TensorCores via a grid
    # with CORE_PARALLEL; at this size a single fused invocation is fastest.
    logits, attn_slab = pl.pallas_call(
        encoder_kernel,
        out_shape=(
            jax.ShapeDtypeStruct((B, N_OUTPUT), jnp.float32),
            jax.ShapeDtypeStruct((B, T, N_LAYER * N_HEAD * T), jnp.float32),
        ),
    )(x,
      params["ln1_w"], params["ln1_b"], params["wqkv"],
      params["wproj"], params["bproj"],
      params["ln2_w"], params["ln2_b"],
      params["w1"], params["b1"], params["w2"], params["b2"],
      params["lnf_w"], params["lnf_b"],
      params["cls_w1"], params["cls_b1"], params["cls_w2"], params["cls_b2"])

    # (B, T, L*H*T) -> (L*H, B, T, T), layer-major / head-minor, matching
    # torch.stack(all_attn_maps).
    attn_maps = attn_slab.reshape(B, T, N_LAYER * N_HEAD, T).transpose(2, 0, 1, 3)
    return logits, attn_maps


# ---------------------------------------------------------------------------
# Deterministic parameter initialization (synthetic weights, stacked per-layer)
# ---------------------------------------------------------------------------
def init_params(key):
    keys = iter(jax.random.split(key, 16))
    nrm = lambda shape: 0.02 * jax.random.normal(next(keys), shape, jnp.float32)
    L, C = N_LAYER, N_EMBD

    return {
        "tok_emb": nrm((VOCAB_SIZE, C)),
        "pos_emb": nrm((BLOCK_SIZE, C)),
        # per-layer (stacked) block parameters
        "ln1_w": jnp.ones((L, C), jnp.float32),
        "ln1_b": jnp.zeros((L, C), jnp.float32),
        # fused QKV: columns [0:C]=Q heads, [C:2C]=K heads, [2C:3C]=V heads,
        # each head occupying HEAD_SIZE contiguous columns.
        "wqkv": nrm((L, C, 3 * C)),
        "wproj": nrm((L, C, C)),
        "bproj": jnp.zeros((L, C), jnp.float32),
        "ln2_w": jnp.ones((L, C), jnp.float32),
        "ln2_b": jnp.zeros((L, C), jnp.float32),
        "w1": nrm((L, C, FFN_HIDDEN)),
        "b1": jnp.zeros((L, FFN_HIDDEN), jnp.float32),
        "w2": nrm((L, FFN_HIDDEN, C)),
        "b2": jnp.zeros((L, C), jnp.float32),
        # final LN + classifier (hidden = N_HIDDEN, per FeedForward(c.n_input,
        # c.n_output, c.n_hidden) in the PyTorch source)
        "lnf_w": jnp.ones((1, C), jnp.float32),
        "lnf_b": jnp.zeros((1, C), jnp.float32),
        "cls_w1": nrm((N_INPUT, N_HIDDEN)),
        "cls_b1": jnp.zeros((1, N_HIDDEN), jnp.float32),
        "cls_w2": nrm((N_HIDDEN, N_OUTPUT)),
        "cls_b2": jnp.zeros((1, N_OUTPUT), jnp.float32),
    }


if __name__ == "__main__":
    key = jax.random.PRNGKey(0)
    k_idx, k_params = jax.random.split(key)

    B, T = 2, BLOCK_SIZE
    idx = jax.random.randint(k_idx, (B, T), 0, VOCAB_SIZE, dtype=jnp.int32)
    params = init_params(k_params)

    fwd = jax.jit(functools.partial(encoder_forward, params))
    logits, attn_maps = fwd(idx)
    jax.block_until_ready((logits, attn_maps))

    assert logits.shape == (B, N_OUTPUT), logits.shape
    assert attn_maps.shape == (N_LAYER * N_HEAD, B, T, T), attn_maps.shape
    assert bool(jnp.all(jnp.isfinite(logits)))
    assert bool(jnp.all(jnp.isfinite(attn_maps)))
    # each attention row is a softmax distribution (approx-reciprocal softmax,
    # so allow a slightly looser tolerance than exact division)
    assert bool(jnp.allclose(jnp.sum(attn_maps, axis=-1), 1.0, atol=2e-3))

    print("KERNEL_OK")
</pallas_src>

<mosaic_0001>
module attributes {stable_mosaic.version = 11 : i64} {
  func.func @encoder_kernel(%arg0: memref<16x32xf32, #tpu.memory_space<vmem>>, %arg1: memref<4x32xf32, #tpu.memory_space<vmem>>, %arg2: memref<4x32xf32, #tpu.memory_space<vmem>>, %arg3: memref<4x32x96xf32, #tpu.memory_space<vmem>>, %arg4: memref<4x32x32xf32, #tpu.memory_space<vmem>>, %arg5: memref<4x32xf32, #tpu.memory_space<vmem>>, %arg6: memref<4x32xf32, #tpu.memory_space<vmem>>, %arg7: memref<4x32xf32, #tpu.memory_space<vmem>>, %arg8: memref<4x32x128xf32, #tpu.memory_space<vmem>>, %arg9: memref<4x128xf32, #tpu.memory_space<vmem>>, %arg10: memref<4x128x32xf32, #tpu.memory_space<vmem>>, %arg11: memref<4x32xf32, #tpu.memory_space<vmem>>, %arg12: memref<1x32xf32, #tpu.memory_space<vmem>>, %arg13: memref<1x32xf32, #tpu.memory_space<vmem>>, %arg14: memref<32x32xf32, #tpu.memory_space<vmem>>, %arg15: memref<1x32xf32, #tpu.memory_space<vmem>>, %arg16: memref<32x4xf32, #tpu.memory_space<vmem>>, %arg17: memref<1x4xf32, #tpu.memory_space<vmem>>, %arg18: memref<2x4xf32, #tpu.memory_space<vmem>>, %arg19: memref<2x8x128xf32, #tpu.memory_space<vmem>>) attributes {dimension_semantics = [], scalar_prefetch = 0 : i64, scratch_operands = 0 : i64, tpu.core_type = #tpu.core_type<tc>} {
    %c0 = arith.constant 0 : index
    %c0_0 = arith.constant 0 : index
    %0 = vector.load %arg0[%c0, %c0_0] : memref<16x32xf32, #tpu.memory_space<vmem>>, vector<16x32xf32>
    %c0_1 = arith.constant 0 : index
    %c0_2 = arith.constant 0 : index
    %1 = vector.load %arg1[%c0_1, %c0_2] : memref<4x32xf32, #tpu.memory_space<vmem>>, vector<1x32xf32>
    %2 = vector.shape_cast %1 : vector<1x32xf32> to vector<32xf32>
    %c0_3 = arith.constant 0 : index
    %c0_4 = arith.constant 0 : index
    %3 = vector.load %arg2[%c0_3, %c0_4] : memref<4x32xf32, #tpu.memory_space<vmem>>, vector<1x32xf32>
    %4 = vector.shape_cast %3 : vector<1x32xf32> to vector<32xf32>
    %cst = arith.constant dense<0.000000e+00> : vector<16xf32>
    %5 = vector.multi_reduction <add>, %0, %cst [1] : vector<16x32xf32> to vector<16xf32>
    %6 = vector.shape_cast %5 : vector<16xf32> to vector<16x1xf32>
    %cst_5 = arith.constant 3.200000e+01 : f32
    %7 = vector.broadcast %cst_5 : f32 to vector<16x1xf32>
    %8 = arith.divf %6, %7 : vector<16x1xf32>
    %9 = vector.broadcast %8 : vector<16x1xf32> to vector<16x32xf32>
    %10 = arith.subf %0, %9 : vector<16x32xf32>
    %11 = arith.mulf %10, %10 : vector<16x32xf32>
    %cst_6 = arith.constant dense<0.000000e+00> : vector<16xf32>
    %12 = vector.multi_reduction <add>, %11, %cst_6 [1] : vector<16x32xf32> to vector<16xf32>
    %13 = vector.shape_cast %12 : vector<16xf32> to vector<16x1xf32>
    %cst_7 = arith.constant 3.200000e+01 : f32
    %14 = vector.broadcast %cst_7 : f32 to vector<16x1xf32>
    %15 = arith.divf %13, %14 : vector<16x1xf32>
    %cst_8 = arith.constant 9.99999974E-6 : f32
    %16 = vector.broadcast %cst_8 : f32 to vector<16x1xf32>
    %17 = arith.addf %15, %16 : vector<16x1xf32>
    %18 = math.rsqrt %17 : vector<16x1xf32>
    %19 = vector.broadcast %18 : vector<16x1xf32> to vector<16x32xf32>
    %20 = arith.mulf %10, %19 : vector<16x32xf32>
    %21 = vector.shape_cast %2 : vector<32xf32> to vector<1x32xf32>
    %22 = vector.broadcast %21 : vector<1x32xf32> to vector<16x32xf32>
    %23 = arith.mulf %20, %22 : vector<16x32xf32>
    %24 = vector.shape_cast %4 : vector<32xf32> to vector<1x32xf32>
    %25 = vector.broadcast %24 : vector<1x32xf32> to vector<16x32xf32>
    %26 = arith.addf %23, %25 : vector<16x32xf32>
    %c0_9 = arith.constant 0 : index
    %c0_10 = arith.constant 0 : index
    %c0_11 = arith.constant 0 : index
    %27 = vector.load %arg3[%c0_9, %c0_10, %c0_11] : memref<4x32x96xf32, #tpu.memory_space<vmem>>, vector<1x32x96xf32>
    %28 = vector.shape_cast %27 : vector<1x32x96xf32> to vector<32x96xf32>
    %cst_12 = arith.constant dense<0.000000e+00> : vector<16x96xf32>
    %29 = tpu.matmul %26, %28, %cst_12 {dimension_numbers = #tpu.dot_dimension_numbers<[1], [0], [0], [1], [0, 0, 1, 1], [], []>} : vector<16x32xf32>, vector<32x96xf32>, vector<16x96xf32> -> vector<16x96xf32>
    %30 = vector.shape_cast %29 : vector<16x96xf32> to vector<2x8x96xf32>
    %31 = vector.extract_strided_slice %30 {offsets = [0, 0, 0], sizes = [2, 8, 8], strides = [1, 1, 1]} : vector<2x8x96xf32> to vector<2x8x8xf32>
    %32 = vector.extract_strided_slice %30 {offsets = [0, 0, 32], sizes = [2, 8, 8], strides = [1, 1, 1]} : vector<2x8x96xf32> to vector<2x8x8xf32>
    %33 = vector.extract_strided_slice %30 {offsets = [0, 0, 64], sizes = [2, 8, 8], strides = [1, 1, 1]} : vector<2x8x96xf32> to vector<2x8x8xf32>
    "tpu.trace_start"() <{level = 10 : i32, message = "bqd,bkd->bqk"}> : () -> ()
    %cst_13 = arith.constant dense<0.000000e+00> : vector<2x8x8xf32>
    %34 = tpu.matmul %31, %32, %cst_13 {dimension_numbers = #tpu.dot_dimension_numbers<[2], [2], [1], [1], [0, 0, 0, 1, 1, 1], [0], [0]>} : vector<2x8x8xf32>, vector<2x8x8xf32>, vector<2x8x8xf32> -> vector<2x8x8xf32>
    "tpu.trace_stop"() : () -> ()
    %cst_14 = arith.constant 0.353553385 : f32
    %35 = vector.broadcast %cst_14 : f32 to vector<2x8x8xf32>
    %36 = arith.mulf %34, %35 : vector<2x8x8xf32>
    %cst_15 = arith.constant dense<0xFF800000> : vector<2x8xf32>
    %37 = vector.multi_reduction <maximumf>, %36, %cst_15 [2] : vector<2x8x8xf32> to vector<2x8xf32>
    %38 = vector.shape_cast %37 : vector<2x8xf32> to vector<2x8x1xf32>
    %39 = vector.broadcast %38 : vector<2x8x1xf32> to vector<2x8x8xf32>
    %40 = arith.subf %36, %39 : vector<2x8x8xf32>
    %41 = math.exp %40 : vector<2x8x8xf32>
    %cst_16 = arith.constant dense<0.000000e+00> : vector<2x8xf32>
    %42 = vector.multi_reduction <add>, %41, %cst_16 [2] : vector<2x8x8xf32> to vector<2x8xf32>
    %43 = vector.shape_cast %42 : vector<2x8xf32> to vector<2x8x1xf32>
    %44 = tpu.reciprocal %43 {approx = true} : vector<2x8x1xf32> -> vector<2x8x1xf32>
    %45 = vector.broadcast %44 : vector<2x8x1xf32> to vector<2x8x8xf32>
    %46 = arith.mulf %41, %45 : vector<2x8x8xf32>
    "tpu.trace_start"() <{level = 10 : i32, message = "bqk,bkd->bqd"}> : () -> ()
    %cst_17 = arith.constant dense<0.000000e+00> : vector<2x8x8xf32>
    %47 = tpu.matmul %46, %33, %cst_17 {dimension_numbers = #tpu.dot_dimension_numbers<[2], [1], [1], [2], [0, 0, 0, 1, 1, 2], [0], [0]>} : vector<2x8x8xf32>, vector<2x8x8xf32>, vector<2x8x8xf32> -> vector<2x8x8xf32>
    "tpu.trace_stop"() : () -> ()
    %48 = vector.extract_strided_slice %30 {offsets = [0, 0, 8], sizes = [2, 8, 8], strides = [1, 1, 1]} : vector<2x8x96xf32> to vector<2x8x8xf32>
    %49 = vector.extract_strided_slice %30 {offsets = [0, 0, 40], sizes = [2, 8, 8], strides = [1, 1, 1]} : vector<2x8x96xf32> to vector<2x8x8xf32>
    %50 = vector.extract_strided_slice %30 {offsets = [0, 0, 72], sizes = [2, 8, 8], strides = [1, 1, 1]} : vector<2x8x96xf32> to vector<2x8x8xf32>
    "tpu.trace_start"() <{level = 10 : i32, message = "bqd,bkd->bqk"}> : () -> ()
    %cst_18 = arith.constant dense<0.000000e+00> : vector<2x8x8xf32>
    %51 = tpu.matmul %48, %49, %cst_18 {dimension_numbers = #tpu.dot_dimension_numbers<[2], [2], [1], [1], [0, 0, 0, 1, 1, 1], [0], [0]>} : vector<2x8x8xf32>, vector<2x8x8xf32>, vector<2x8x8xf32> -> vector<2x8x8xf32>
    "tpu.trace_stop"() : () -> ()
    %cst_19 = arith.constant 0.353553385 : f32
    %52 = vector.broadcast %cst_19 : f32 to vector<2x8x8xf32>
    %53 = arith.mulf %51, %52 : vector<2x8x8xf32>
    %cst_20 = arith.constant dense<0xFF800000> : vector<2x8xf32>
    %54 = vector.multi_reduction <maximumf>, %53, %cst_20 [2] : vector<2x8x8xf32> to vector<2x8xf32>
    %55 = vector.shape_cast %54 : vector<2x8xf32> to vector<2x8x1xf32>
    %56 = vector.broadcast %55 : vector<2x8x1xf32> to vector<2x8x8xf32>
    %57 = arith.subf %53, %56 : vector<2x8x8xf32>
    %58 = math.exp %57 : vector<2x8x8xf32>
    %cst_21 = arith.constant dense<0.000000e+00> : vector<2x8xf32>
    %59 = vector.multi_reduction <add>, %58, %cst_21 [2] : vector<2x8x8xf32> to vector<2x8xf32>
    %60 = vector.shape_cast %59 : vector<2x8xf32> to vector<2x8x1xf32>
    %61 = tpu.reciprocal %60 {approx = true} : vector<2x8x1xf32> -> vector<2x8x1xf32>
    %62 = vector.broadcast %61 : vector<2x8x1xf32> to vector<2x8x8xf32>
    %63 = arith.mulf %58, %62 : vector<2x8x8xf32>
    "tpu.trace_start"() <{level = 10 : i32, message = "bqk,bkd->bqd"}> : () -> ()
    %cst_22 = arith.constant dense<0.000000e+00> : vector<2x8x8xf32>
    %64 = tpu.matmul %63, %50, %cst_22 {dimension_numbers = #tpu.dot_dimension_numbers<[2], [1], [1], [2], [0, 0, 0, 1, 1, 2], [0], [0]>} : vector<2x8x8xf32>, vector<2x8x8xf32>, vector<2x8x8xf32> -> vector<2x8x8xf32>
    "tpu.trace_stop"() : () -> ()
    %65 = vector.extract_strided_slice %30 {offsets = [0, 0, 16], sizes = [2, 8, 8], strides = [1, 1, 1]} : vector<2x8x96xf32> to vector<2x8x8xf32>
    %66 = vector.extract_strided_slice %30 {offsets = [0, 0, 48], sizes = [2, 8, 8], strides = [1, 1, 1]} : vector<2x8x96xf32> to vector<2x8x8xf32>
    %67 = vector.extract_strided_slice %30 {offsets = [0, 0, 80], sizes = [2, 8, 8], strides = [1, 1, 1]} : vector<2x8x96xf32> to vector<2x8x8xf32>
    "tpu.trace_start"() <{level = 10 : i32, message = "bqd,bkd->bqk"}> : () -> ()
    %cst_23 = arith.constant dense<0.000000e+00> : vector<2x8x8xf32>
    %68 = tpu.matmul %65, %66, %cst_23 {dimension_numbers = #tpu.dot_dimension_numbers<[2], [2], [1], [1], [0, 0, 0, 1, 1, 1], [0], [0]>} : vector<2x8x8xf32>, vector<2x8x8xf32>, vector<2x8x8xf32> -> vector<2x8x8xf32>
    "tpu.trace_stop"() : () -> ()
    %cst_24 = arith.constant 0.353553385 : f32
    %69 = vector.broadcast %cst_24 : f32 to vector<2x8x8xf32>
    %70 = arith.mulf %68, %69 : vector<2x8x8xf32>
    %cst_25 = arith.constant dense<0xFF800000> : vector<2x8xf32>
    %71 = vector.multi_reduction <maximumf>, %70, %cst_25 [2] : vector<2x8x8xf32> to vector<2x8xf32>
    %72 = vector.shape_cast %71 : vector<2x8xf32> to vector<2x8x1xf32>
    %73 = vector.broadcast %72 : vector<2x8x1xf32> to vector<2x8x8xf32>
    %74 = arith.subf %70, %73 : vector<2x8x8xf32>
    %75 = math.exp %74 : vector<2x8x8xf32>
    %cst_26 = arith.constant dense<0.000000e+00> : vector<2x8xf32>
    %76 = vector.multi_reduction <add>, %75, %cst_26 [2] : vector<2x8x8xf32> to vector<2x8xf32>
    %77 = vector.shape_cast %76 : vector<2x8xf32> to vector<2x8x1xf32>
    %78 = tpu.reciprocal %77 {approx = true} : vector<2x8x1xf32> -> vector<2x8x1xf32>
    %79 = vector.broadcast %78 : vector<2x8x1xf32> to vector<2x8x8xf32>
    %80 = arith.mulf %75, %79 : vector<2x8x8xf32>
    "tpu.trace_start"() <{level = 10 : i32, message = "bqk,bkd->bqd"}> : () -> ()
    %cst_27 = arith.constant dense<0.000000e+00> : vector<2x8x8xf32>
    %81 = tpu.matmul %80, %67, %cst_27 {dimension_numbers = #tpu.dot_dimension_numbers<[2], [1], [1], [2], [0, 0, 0, 1, 1, 2], [0], [0]>} : vector<2x8x8xf32>, vector<2x8x8xf32>, vector<2x8x8xf32> -> vector<2x8x8xf32>
    "tpu.trace_stop"() : () -> ()
    %82 = vector.extract_strided_slice %30 {offsets = [0, 0, 24], sizes = [2, 8, 8], strides = [1, 1, 1]} : vector<2x8x96xf32> to vector<2x8x8xf32>
    %83 = vector.extract_strided_slice %30 {offsets = [0, 0, 56], sizes = [2, 8, 8], strides = [1, 1, 1]} : vector<2x8x96xf32> to vector<2x8x8xf32>
    %84 = vector.extract_strided_slice %30 {offsets = [0, 0, 88], sizes = [2, 8, 8], strides = [1, 1, 1]} : vector<2x8x96xf32> to vector<2x8x8xf32>
    "tpu.trace_start"() <{level = 10 : i32, message = "bqd,bkd->bqk"}> : () -> ()
    %cst_28 = arith.constant dense<0.000000e+00> : vector<2x8x8xf32>
    %85 = tpu.matmul %82, %83, %cst_28 {dimension_numbers = #tpu.dot_dimension_numbers<[2], [2], [1], [1], [0, 0, 0, 1, 1, 1], [0], [0]>} : vector<2x8x8xf32>, vector<2x8x8xf32>, vector<2x8x8xf32> -> vector<2x8x8xf32>
    "tpu.trace_stop"() : () -> ()
    %cst_29 = arith.constant 0.353553385 : f32
    %86 = vector.broadcast %cst_29 : f32 to vector<2x8x8xf32>
    %87 = arith.mulf %85, %86 : vector<2x8x8xf32>
    %cst_30 = arith.constant dense<0xFF800000> : vector<2x8xf32>
    %88 = vector.multi_reduction <maximumf>, %87, %cst_30 [2] : vector<2x8x8xf32> to vector<2x8xf32>
    %89 = vector.shape_cast %88 : vector<2x8xf32> to vector<2x8x1xf32>
    %90 = vector.broadcast %89 : vector<2x8x1xf32> to vector<2x8x8xf32>
    %91 = arith.subf %87, %90 : vector<2x8x8xf32>
    %92 = math.exp %91 : vector<2x8x8xf32>
    %cst_31 = arith.constant dense<0.000000e+00> : vector<2x8xf32>
    %93 = vector.multi_reduction <add>, %92, %cst_31 [2] : vector<2x8x8xf32> to vector<2x8xf32>
    %94 = vector.shape_cast %93 : vector<2x8xf32> to vector<2x8x1xf32>
    %95 = tpu.reciprocal %94 {approx = true} : vector<2x8x1xf32> -> vector<2x8x1xf32>
    %96 = vector.broadcast %95 : vector<2x8x1xf32> to vector<2x8x8xf32>
    %97 = arith.mulf %92, %96 : vector<2x8x8xf32>
    "tpu.trace_start"() <{level = 10 : i32, message = "bqk,bkd->bqd"}> : () -> ()
    %cst_32 = arith.constant dense<0.000000e+00> : vector<2x8x8xf32>
    %98 = tpu.matmul %97, %84, %cst_32 {dimension_numbers = #tpu.dot_dimension_numbers<[2], [1], [1], [2], [0, 0, 0, 1, 1, 2], [0], [0]>} : vector<2x8x8xf32>, vector<2x8x8xf32>, vector<2x8x8xf32> -> vector<2x8x8xf32>
    "tpu.trace_stop"() : () -> ()
    %99 = tpu.concatenate %47, %64, %81, %98 in 2 : vector<2x8x8xf32>, vector<2x8x8xf32>, vector<2x8x8xf32>, vector<2x8x8xf32> -> vector<2x8x32xf32>
    %100 = vector.shape_cast %99 : vector<2x8x32xf32> to vector<16x32xf32>
    %c0_33 = arith.constant 0 : index
    %c0_34 = arith.constant 0 : index
    %c0_35 = arith.constant 0 : index
    %101 = vector.load %arg4[%c0_33, %c0_34, %c0_35] : memref<4x32x32xf32, #tpu.memory_space<vmem>>, vector<1x32x32xf32>
    %102 = vector.shape_cast %101 : vector<1x32x32xf32> to vector<32x32xf32>
    %cst_36 = arith.constant dense<0.000000e+00> : vector<16x32xf32>
    %103 = tpu.matmul %100, %102, %cst_36 {dimension_numbers = #tpu.dot_dimension_numbers<[1], [0], [0], [1], [0, 0, 1, 1], [], []>} : vector<16x32xf32>, vector<32x32xf32>, vector<16x32xf32> -> vector<16x32xf32>
    %c0_37 = arith.constant 0 : index
    %c0_38 = arith.constant 0 : index
    %104 = vector.load %arg5[%c0_37, %c0_38] : memref<4x32xf32, #tpu.memory_space<vmem>>, vector<1x32xf32>
    %105 = vector.shape_cast %104 : vector<1x32xf32> to vector<32xf32>
    %106 = vector.shape_cast %105 : vector<32xf32> to vector<1x32xf32>
    %107 = vector.broadcast %106 : vector<1x32xf32> to vector<16x32xf32>
    %108 = arith.addf %103, %107 : vector<16x32xf32>
    %109 = arith.addf %0, %108 : vector<16x32xf32>
    %c0_39 = arith.constant 0 : index
    %c0_40 = arith.constant 0 : index
    %110 = vector.load %arg6[%c0_39, %c0_40] : memref<4x32xf32, #tpu.memory_space<vmem>>, vector<1x32xf32>
    %111 = vector.shape_cast %110 : vector<1x32xf32> to vector<32xf32>
    %c0_41 = arith.constant 0 : index
    %c0_42 = arith.constant 0 : index
    %112 = vector.load %arg7[%c0_41, %c0_42] : memref<4x32xf32, #tpu.memory_space<vmem>>, vector<1x32xf32>
    %113 = vector.shape_cast %112 : vector<1x32xf32> to vector<32xf32>
    %cst_43 = arith.constant dense<0.000000e+00> : vector<16xf32>
    %114 = vector.multi_reduction <add>, %109, %cst_43 [1] : vector<16x32xf32> to vector<16xf32>
    %115 = vector.shape_cast %114 : vector<16xf32> to vector<16x1xf32>
    %cst_44 = arith.constant 3.200000e+01 : f32
    %116 = vector.broadcast %cst_44 : f32 to vector<16x1xf32>
    %117 = arith.divf %115, %116 : vector<16x1xf32>
    %118 = vector.broadcast %117 : vector<16x1xf32> to vector<16x32xf32>
    %119 = arith.subf %109, %118 : vector<16x32xf32>
    %120 = arith.mulf %119, %119 : vector<16x32xf32>
    %cst_45 = arith.constant dense<0.000000e+00> : vector<16xf32>
    %121 = vector.multi_reduction <add>, %120, %cst_45 [1] : vector<16x32xf32> to vector<16xf32>
    %122 = vector.shape_cast %121 : vector<16xf32> to vector<16x1xf32>
    %cst_46 = arith.constant 3.200000e+01 : f32
    %123 = vector.broadcast %cst_46 : f32 to vector<16x1xf32>
    %124 = arith.divf %122, %123 : vector<16x1xf32>
    %cst_47 = arith.constant 9.99999974E-6 : f32
    %125 = vector.broadcast %cst_47 : f32 to vector<16x1xf32>
    %126 = arith.addf %124, %125 : vector<16x1xf32>
    %127 = math.rsqrt %126 : vector<16x1xf32>
    %128 = vector.broadcast %127 : vector<16x1xf32> to vector<16x32xf32>
    %129 = arith.mulf %119, %128 : vector<16x32xf32>
    %130 = vector.shape_cast %111 : vector<32xf32> to vector<1x32xf32>
    %131 = vector.broadcast %130 : vector<1x32xf32> to vector<16x32xf32>
    %132 = arith.mulf %129, %131 : vector<16x32xf32>
    %133 = vector.shape_cast %113 : vector<32xf32> to vector<1x32xf32>
    %134 = vector.broadcast %133 : vector<1x32xf32> to vector<16x32xf32>
    %135 = arith.addf %132, %134 : vector<16x32xf32>
    %c0_48 = arith.constant 0 : index
    %c0_49 = arith.constant 0 : index
    %c0_50 = arith.constant 0 : index
    %136 = vector.load %arg8[%c0_48, %c0_49, %c0_50] : memref<4x32x128xf32, #tpu.memory_space<vmem>>, vector<1x32x128xf32>
    %137 = vector.shape_cast %136 : vector<1x32x128xf32> to vector<32x128xf32>
    %cst_51 = arith.constant dense<0.000000e+00> : vector<16x128xf32>
    %138 = tpu.matmul %135, %137, %cst_51 {dimension_numbers = #tpu.dot_dimension_numbers<[1], [0], [0], [1], [0, 0, 1, 1], [], []>} : vector<16x32xf32>, vector<32x128xf32>, vector<16x128xf32> -> vector<16x128xf32>
    %c0_52 = arith.constant 0 : index
    %c0_53 = arith.constant 0 : index
    %139 = vector.load %arg9[%c0_52, %c0_53] : memref<4x128xf32, #tpu.memory_space<vmem>>, vector<1x128xf32>
    %140 = vector.shape_cast %139 : vector<1x128xf32> to vector<128xf32>
    %141 = vector.shape_cast %140 : vector<128xf32> to vector<1x128xf32>
    %142 = vector.broadcast %141 : vector<1x128xf32> to vector<16x128xf32>
    %143 = arith.addf %138, %142 : vector<16x128xf32>
    %cst_54 = arith.constant 0.000000e+00 : f32
    %144 = vector.broadcast %cst_54 : f32 to vector<16x128xf32>
    %145 = arith.maximumf %143, %144 : vector<16x128xf32>
    %c0_55 = arith.constant 0 : index
    %c0_56 = arith.constant 0 : index
    %c0_57 = arith.constant 0 : index
    %146 = vector.load %arg10[%c0_55, %c0_56, %c0_57] : memref<4x128x32xf32, #tpu.memory_space<vmem>>, vector<1x128x32xf32>
    %147 = vector.shape_cast %146 : vector<1x128x32xf32> to vector<128x32xf32>
    %cst_58 = arith.constant dense<0.000000e+00> : vector<16x32xf32>
    %148 = tpu.matmul %145, %147, %cst_58 {dimension_numbers = #tpu.dot_dimension_numbers<[1], [0], [0], [1], [0, 0, 1, 1], [], []>} : vector<16x128xf32>, vector<128x32xf32>, vector<16x32xf32> -> vector<16x32xf32>
    %c0_59 = arith.constant 0 : index
    %c0_60 = arith.constant 0 : index
    %149 = vector.load %arg11[%c0_59, %c0_60] : memref<4x32xf32, #tpu.memory_space<vmem>>, vector<1x32xf32>
    %150 = vector.shape_cast %149 : vector<1x32xf32> to vector<32xf32>
    %151 = vector.shape_cast %150 : vector<32xf32> to vector<1x32xf32>
    %152 = vector.broadcast %151 : vector<1x32xf32> to vector<16x32xf32>
    %153 = arith.addf %148, %152 : vector<16x32xf32>
    %154 = arith.addf %109, %153 : vector<16x32xf32>
    %c1 = arith.constant 1 : index
    %c0_61 = arith.constant 0 : index
    %155 = vector.load %arg1[%c1, %c0_61] : memref<4x32xf32, #tpu.memory_space<vmem>>, vector<1x32xf32>
    %156 = vector.shape_cast %155 : vector<1x32xf32> to vector<32xf32>
    %c1_62 = arith.constant 1 : index
    %c0_63 = arith.constant 0 : index
    %157 = vector.load %arg2[%c1_62, %c0_63] : memref<4x32xf32, #tpu.memory_space<vmem>>, vector<1x32xf32>
    %158 = vector.shape_cast %157 : vector<1x32xf32> to vector<32xf32>
    %cst_64 = arith.constant dense<0.000000e+00> : vector<16xf32>
    %159 = vector.multi_reduction <add>, %154, %cst_64 [1] : vector<16x32xf32> to vector<16xf32>
    %160 = vector.shape_cast %159 : vector<16xf32> to vector<16x1xf32>
    %cst_65 = arith.constant 3.200000e+01 : f32
    %161 = vector.broadcast %cst_65 : f32 to vector<16x1xf32>
    %162 = arith.divf %160, %161 : vector<16x1xf32>
    %163 = vector.broadcast %162 : vector<16x1xf32> to vector<16x32xf32>
    %164 = arith.subf %154, %163 : vector<16x32xf32>
    %165 = arith.mulf %164, %164 : vector<16x32xf32>
    %cst_66 = arith.constant dense<0.000000e+00> : vector<16xf32>
    %166 = vector.multi_reduction <add>, %165, %cst_66 [1] : vector<16x32xf32> to vector<16xf32>
    %167 = vector.shape_cast %166 : vector<16xf32> to vector<16x1xf32>
    %cst_67 = arith.constant 3.200000e+01 : f32
    %168 = vector.broadcast %cst_67 : f32 to vector<16x1xf32>
    %169 = arith.divf %167, %168 : vector<16x1xf32>
    %cst_68 = arith.constant 9.99999974E-6 : f32
    %170 = vector.broadcast %cst_68 : f32 to vector<16x1xf32>
    %171 = arith.addf %169, %170 : vector<16x1xf32>
    %172 = math.rsqrt %171 : vector<16x1xf32>
    %173 = vector.broadcast %172 : vector<16x1xf32> to vector<16x32xf32>
    %174 = arith.mulf %164, %173 : vector<16x32xf32>
    %175 = vector.shape_cast %156 : vector<32xf32> to vector<1x32xf32>
    %176 = vector.broadcast %175 : vector<1x32xf32> to vector<16x32xf32>
    %177 = arith.mulf %174, %176 : vector<16x32xf32>
    %178 = vector.shape_cast %158 : vector<32xf32> to vector<1x32xf32>
    %179 = vector.broadcast %178 : vector<1x32xf32> to vector<16x32xf32>
    %180 = arith.addf %177, %179 : vector<16x32xf32>
    %c1_69 = arith.constant 1 : index
    %c0_70 = arith.constant 0 : index
    %c0_71 = arith.constant 0 : index
    %181 = vector.load %arg3[%c1_69, %c0_70, %c0_71] : memref<4x32x96xf32, #tpu.memory_space<vmem>>, vector<1x32x96xf32>
    %182 = vector.shape_cast %181 : vector<1x32x96xf32> to vector<32x96xf32>
    %cst_72 = arith.constant dense<0.000000e+00> : vector<16x96xf32>
    %183 = tpu.matmul %180, %182, %cst_72 {dimension_numbers = #tpu.dot_dimension_numbers<[1], [0], [0], [1], [0, 0, 1, 1], [], []>} : vector<16x32xf32>, vector<32x96xf32>, vector<16x96xf32> -> vector<16x96xf32>
    %184 = vector.shape_cast %183 : vector<16x96xf32> to vector<2x8x96xf32>
    %185 = vector.extract_strided_slice %184 {offsets = [0, 0, 0], sizes = [2, 8, 8], strides = [1, 1, 1]} : vector<2x8x96xf32> to vector<2x8x8xf32>
    %186 = vector.extract_strided_slice %184 {offsets = [0, 0, 32], sizes = [2, 8, 8], strides = [1, 1, 1]} : vector<2x8x96xf32> to vector<2x8x8xf32>
    %187 = vector.extract_strided_slice %184 {offsets = [0, 0, 64], sizes = [2, 8, 8], strides = [1, 1, 1]} : vector<2x8x96xf32> to vector<2x8x8xf32>
    "tpu.trace_start"() <{level = 10 : i32, message = "bqd,bkd->bqk"}> : () -> ()
    %cst_73 = arith.constant dense<0.000000e+00> : vector<2x8x8xf32>
    %188 = tpu.matmul %185, %186, %cst_73 {dimension_numbers = #tpu.dot_dimension_numbers<[2], [2], [1], [1], [0, 0, 0, 1, 1, 1], [0], [0]>} : vector<2x8x8xf32>, vector<2x8x8xf32>, vector<2x8x8xf32> -> vector<2x8x8xf32>
    "tpu.trace_stop"() : () -> ()
    %cst_74 = arith.constant 0.353553385 : f32
    %189 = vector.broadcast %cst_74 : f32 to vector<2x8x8xf32>
    %190 = arith.mulf %188, %189 : vector<2x8x8xf32>
    %cst_75 = arith.constant dense<0xFF800000> : vector<2x8xf32>
    %191 = vector.multi_reduction <maximumf>, %190, %cst_75 [2] : vector<2x8x8xf32> to vector<2x8xf32>
    %192 = vector.shape_cast %191 : vector<2x8xf32> to vector<2x8x1xf32>
    %193 = vector.broadcast %192 : vector<2x8x1xf32> to vector<2x8x8xf32>
    %194 = arith.subf %190, %193 : vector<2x8x8xf32>
    %195 = math.exp %194 : vector<2x8x8xf32>
    %cst_76 = arith.constant dense<0.000000e+00> : vector<2x8xf32>
    %196 = vector.multi_reduction <add>, %195, %cst_76 [2] : vector<2x8x8xf32> to vector<2x8xf32>
    %197 = vector.shape_cast %196 : vector<2x8xf32> to vector<2x8x1xf32>
    %198 = tpu.reciprocal %197 {approx = true} : vector<2x8x1xf32> -> vector<2x8x1xf32>
    %199 = vector.broadcast %198 : vector<2x8x1xf32> to vector<2x8x8xf32>
    %200 = arith.mulf %195, %199 : vector<2x8x8xf32>
    "tpu.trace_start"() <{level = 10 : i32, message = "bqk,bkd->bqd"}> : () -> ()
    %cst_77 = arith.constant dense<0.000000e+00> : vector<2x8x8xf32>
    %201 = tpu.matmul %200, %187, %cst_77 {dimension_numbers = #tpu.dot_dimension_numbers<[2], [1], [1], [2], [0, 0, 0, 1, 1, 2], [0], [0]>} : vector<2x8x8xf32>, vector<2x8x8xf32>, vector<2x8x8xf32> -> vector<2x8x8xf32>
    "tpu.trace_stop"() : () -> ()
    %202 = vector.extract_strided_slice %184 {offsets = [0, 0, 8], sizes = [2, 8, 8], strides = [1, 1, 1]} : vector<2x8x96xf32> to vector<2x8x8xf32>
    %203 = vector.extract_strided_slice %184 {offsets = [0, 0, 40], sizes = [2, 8, 8], strides = [1, 1, 1]} : vector<2x8x96xf32> to vector<2x8x8xf32>
    %204 = vector.extract_strided_slice %184 {offsets = [0, 0, 72], sizes = [2, 8, 8], strides = [1, 1, 1]} : vector<2x8x96xf32> to vector<2x8x8xf32>
    "tpu.trace_start"() <{level = 10 : i32, message = "bqd,bkd->bqk"}> : () -> ()
    %cst_78 = arith.constant dense<0.000000e+00> : vector<2x8x8xf32>
    %205 = tpu.matmul %202, %203, %cst_78 {dimension_numbers = #tpu.dot_dimension_numbers<[2], [2], [1], [1], [0, 0, 0, 1, 1, 1], [0], [0]>} : vector<2x8x8xf32>, vector<2x8x8xf32>, vector<2x8x8xf32> -> vector<2x8x8xf32>
    "tpu.trace_stop"() : () -> ()
    %cst_79 = arith.constant 0.353553385 : f32
    %206 = vector.broadcast %cst_79 : f32 to vector<2x8x8xf32>
    %207 = arith.mulf %205, %206 : vector<2x8x8xf32>
    %cst_80 = arith.constant dense<0xFF800000> : vector<2x8xf32>
    %208 = vector.multi_reduction <maximumf>, %207, %cst_80 [2] : vector<2x8x8xf32> to vector<2x8xf32>
    %209 = vector.shape_cast %208 : vector<2x8xf32> to vector<2x8x1xf32>
    %210 = vector.broadcast %209 : vector<2x8x1xf32> to vector<2x8x8xf32>
    %211 = arith.subf %207, %210 : vector<2x8x8xf32>
    %212 = math.exp %211 : vector<2x8x8xf32>
    %cst_81 = arith.constant dense<0.000000e+00> : vector<2x8xf32>
    %213 = vector.multi_reduction <add>, %212, %cst_81 [2] : vector<2x8x8xf32> to vector<2x8xf32>
    %214 = vector.shape_cast %213 : vector<2x8xf32> to vector<2x8x1xf32>
    %215 = tpu.reciprocal %214 {approx = true} : vector<2x8x1xf32> -> vector<2x8x1xf32>
    %216 = vector.broadcast %215 : vector<2x8x1xf32> to vector<2x8x8xf32>
    %217 = arith.mulf %212, %216 : vector<2x8x8xf32>
    "tpu.trace_start"() <{level = 10 : i32, message = "bqk,bkd->bqd"}> : () -> ()
    %cst_82 = arith.constant dense<0.000000e+00> : vector<2x8x8xf32>
    %218 = tpu.matmul %217, %204, %cst_82 {dimension_numbers = #tpu.dot_dimension_numbers<[2], [1], [1], [2], [0, 0, 0, 1, 1, 2], [0], [0]>} : vector<2x8x8xf32>, vector<2x8x8xf32>, vector<2x8x8xf32> -> vector<2x8x8xf32>
    "tpu.trace_stop"() : () -> ()
    %219 = vector.extract_strided_slice %184 {offsets = [0, 0, 16], sizes = [2, 8, 8], strides = [1, 1, 1]} : vector<2x8x96xf32> to vector<2x8x8xf32>
    %220 = vector.extract_strided_slice %184 {offsets = [0, 0, 48], sizes = [2, 8, 8], strides = [1, 1, 1]} : vector<2x8x96xf32> to vector<2x8x8xf32>
    %221 = vector.extract_strided_slice %184 {offsets = [0, 0, 80], sizes = [2, 8, 8], strides = [1, 1, 1]} : vector<2x8x96xf32> to vector<2x8x8xf32>
    "tpu.trace_start"() <{level = 10 : i32, message = "bqd,bkd->bqk"}> : () -> ()
    %cst_83 = arith.constant dense<0.000000e+00> : vector<2x8x8xf32>
    %222 = tpu.matmul %219, %220, %cst_83 {dimension_numbers = #tpu.dot_dimension_numbers<[2], [2], [1], [1], [0, 0, 0, 1, 1, 1], [0], [0]>} : vector<2x8x8xf32>, vector<2x8x8xf32>, vector<2x8x8xf32> -> vector<2x8x8xf32>
    "tpu.trace_stop"() : () -> ()
    %cst_84 = arith.constant 0.353553385 : f32
    %223 = vector.broadcast %cst_84 : f32 to vector<2x8x8xf32>
    %224 = arith.mulf %222, %223 : vector<2x8x8xf32>
    %cst_85 = arith.constant dense<0xFF800000> : vector<2x8xf32>
    %225 = vector.multi_reduction <maximumf>, %224, %cst_85 [2] : vector<2x8x8xf32> to vector<2x8xf32>
    %226 = vector.shape_cast %225 : vector<2x8xf32> to vector<2x8x1xf32>
    %227 = vector.broadcast %226 : vector<2x8x1xf32> to vector<2x8x8xf32>
    %228 = arith.subf %224, %227 : vector<2x8x8xf32>
    %229 = math.exp %228 : vector<2x8x8xf32>
    %cst_86 = arith.constant dense<0.000000e+00> : vector<2x8xf32>
    %230 = vector.multi_reduction <add>, %229, %cst_86 [2] : vector<2x8x8xf32> to vector<2x8xf32>
    %231 = vector.shape_cast %230 : vector<2x8xf32> to vector<2x8x1xf32>
    %232 = tpu.reciprocal %231 {approx = true} : vector<2x8x1xf32> -> vector<2x8x1xf32>
    %233 = vector.broadcast %232 : vector<2x8x1xf32> to vector<2x8x8xf32>
    %234 = arith.mulf %229, %233 : vector<2x8x8xf32>
    "tpu.trace_start"() <{level = 10 : i32, message = "bqk,bkd->bqd"}> : () -> ()
    %cst_87 = arith.constant dense<0.000000e+00> : vector<2x8x8xf32>
    %235 = tpu.matmul %234, %221, %cst_87 {dimension_numbers = #tpu.dot_dimension_numbers<[2], [1], [1], [2], [0, 0, 0, 1, 1, 2], [0], [0]>} : vector<2x8x8xf32>, vector<2x8x8xf32>, vector<2x8x8xf32> -> vector<2x8x8xf32>
    "tpu.trace_stop"() : () -> ()
    %236 = vector.extract_strided_slice %184 {offsets = [0, 0, 24], sizes = [2, 8, 8], strides = [1, 1, 1]} : vector<2x8x96xf32> to vector<2x8x8xf32>
    %237 = vector.extract_strided_slice %184 {offsets = [0, 0, 56], sizes = [2, 8, 8], strides = [1, 1, 1]} : vector<2x8x96xf32> to vector<2x8x8xf32>
    %238 = vector.extract_strided_slice %184 {offsets = [0, 0, 88], sizes = [2, 8, 8], strides = [1, 1, 1]} : vector<2x8x96xf32> to vector<2x8x8xf32>
    "tpu.trace_start"() <{level = 10 : i32, message = "bqd,bkd->bqk"}> : () -> ()
    %cst_88 = arith.constant dense<0.000000e+00> : vector<2x8x8xf32>
    %239 = tpu.matmul %236, %237, %cst_88 {dimension_numbers = #tpu.dot_dimension_numbers<[2], [2], [1], [1], [0, 0, 0, 1, 1, 1], [0], [0]>} : vector<2x8x8xf32>, vector<2x8x8xf32>, vector<2x8x8xf32> -> vector<2x8x8xf32>
    "tpu.trace_stop"() : () -> ()
    %cst_89 = arith.constant 0.353553385 : f32
    %240 = vector.broadcast %cst_89 : f32 to vector<2x8x8xf32>
    %241 = arith.mulf %239, %240 : vector<2x8x8xf32>
    %cst_90 = arith.constant dense<0xFF800000> : vector<2x8xf32>
    %242 = vector.multi_reduction <maximumf>, %241, %cst_90 [2] : vector<2x8x8xf32> to vector<2x8xf32>
    %243 = vector.shape_cast %242 : vector<2x8xf32> to vector<2x8x1xf32>
    %244 = vector.broadcast %243 : vector<2x8x1xf32> to vector<2x8x8xf32>
    %245 = arith.subf %241, %244 : vector<2x8x8xf32>
    %246 = math.exp %245 : vector<2x8x8xf32>
    %cst_91 = arith.constant dense<0.000000e+00> : vector<2x8xf32>
    %247 = vector.multi_reduction <add>, %246, %cst_91 [2] : vector<2x8x8xf32> to vector<2x8xf32>
    %248 = vector.shape_cast %247 : vector<2x8xf32> to vector<2x8x1xf32>
    %249 = tpu.reciprocal %248 {approx = true} : vector<2x8x1xf32> -> vector<2x8x1xf32>
    %250 = vector.broadcast %249 : vector<2x8x1xf32> to vector<2x8x8xf32>
    %251 = arith.mulf %246, %250 : vector<2x8x8xf32>
    "tpu.trace_start"() <{level = 10 : i32, message = "bqk,bkd->bqd"}> : () -> ()
    %cst_92 = arith.constant dense<0.000000e+00> : vector<2x8x8xf32>
    %252 = tpu.matmul %251, %238, %cst_92 {dimension_numbers = #tpu.dot_dimension_numbers<[2], [1], [1], [2], [0, 0, 0, 1, 1, 2], [0], [0]>} : vector<2x8x8xf32>, vector<2x8x8xf32>, vector<2x8x8xf32> -> vector<2x8x8xf32>
    "tpu.trace_stop"() : () -> ()
    %253 = tpu.concatenate %201, %218, %235, %252 in 2 : vector<2x8x8xf32>, vector<2x8x8xf32>, vector<2x8x8xf32>, vector<2x8x8xf32> -> vector<2x8x32xf32>
    %254 = vector.shape_cast %253 : vector<2x8x32xf32> to vector<16x32xf32>
    %c1_93 = arith.constant 1 : index
    %c0_94 = arith.constant 0 : index
    %c0_95 = arith.constant 0 : index
    %255 = vector.load %arg4[%c1_93, %c0_94, %c0_95] : memref<4x32x32xf32, #tpu.memory_space<vmem>>, vector<1x32x32xf32>
    %256 = vector.shape_cast %255 : vector<1x32x32xf32> to vector<32x32xf32>
    %cst_96 = arith.constant dense<0.000000e+00> : vector<16x32xf32>
    %257 = tpu.matmul %254, %256, %cst_96 {dimension_numbers = #tpu.dot_dimension_numbers<[1], [0], [0], [1], [0, 0, 1, 1], [], []>} : vector<16x32xf32>, vector<32x32xf32>, vector<16x32xf32> -> vector<16x32xf32>
    %c1_97 = arith.constant 1 : index
    %c0_98 = arith.constant 0 : index
    %258 = vector.load %arg5[%c1_97, %c0_98] : memref<4x32xf32, #tpu.memory_space<vmem>>, vector<1x32xf32>
    %259 = vector.shape_cast %258 : vector<1x32xf32> to vector<32xf32>
    %260 = vector.shape_cast %259 : vector<32xf32> to vector<1x32xf32>
    %261 = vector.broadcast %260 : vector<1x32xf32> to vector<16x32xf32>
    %262 = arith.addf %257, %261 : vector<16x32xf32>
    %263 = arith.addf %154, %262 : vector<16x32xf32>
    %c1_99 = arith.constant 1 : index
    %c0_100 = arith.constant 0 : index
    %264 = vector.load %arg6[%c1_99, %c0_100] : memref<4x32xf32, #tpu.memory_space<vmem>>, vector<1x32xf32>
    %265 = vector.shape_cast %264 : vector<1x32xf32> to vector<32xf32>
    %c1_101 = arith.constant 1 : index
    %c0_102 = arith.constant 0 : index
    %266 = vector.load %arg7[%c1_101, %c0_102] : memref<4x32xf32, #tpu.memory_space<vmem>>, vector<1x32xf32>
    %267 = vector.shape_cast %266 : vector<1x32xf32> to vector<32xf32>
    %cst_103 = arith.constant dense<0.000000e+00> : vector<16xf32>
    %268 = vector.multi_reduction <add>, %263, %cst_103 [1] : vector<16x32xf32> to vector<16xf32>
    %269 = vector.shape_cast %268 : vector<16xf32> to vector<16x1xf32>
    %cst_104 = arith.constant 3.200000e+01 : f32
    %270 = vector.broadcast %cst_104 : f32 to vector<16x1xf32>
    %271 = arith.divf %269, %270 : vector<16x1xf32>
    %272 = vector.broadcast %271 : vector<16x1xf32> to vector<16x32xf32>
    %273 = arith.subf %263, %272 : vector<16x32xf32>
    %274 = arith.mulf %273, %273 : vector<16x32xf32>
    %cst_105 = arith.constant dense<0.000000e+00> : vector<16xf32>
    %275 = vector.multi_reduction <add>, %274, %cst_105 [1] : vector<16x32xf32> to vector<16xf32>
    %276 = vector.shape_cast %275 : vector<16xf32> to vector<16x1xf32>
    %cst_106 = arith.constant 3.200000e+01 : f32
    %277 = vector.broadcast %cst_106 : f32 to vector<16x1xf32>
    %278 = arith.divf %276, %277 : vector<16x1xf32>
    %cst_107 = arith.constant 9.99999974E-6 : f32
    %279 = vector.broadcast %cst_107 : f32 to vector<16x1xf32>
    %280 = arith.addf %278, %279 : vector<16x1xf32>
    %281 = math.rsqrt %280 : vector<16x1xf32>
    %282 = vector.broadcast %281 : vector<16x1xf32> to vector<16x32xf32>
    %283 = arith.mulf %273, %282 : vector<16x32xf32>
    %284 = vector.shape_cast %265 : vector<32xf32> to vector<1x32xf32>
    %285 = vector.broadcast %284 : vector<1x32xf32> to vector<16x32xf32>
    %286 = arith.mulf %283, %285 : vector<16x32xf32>
    %287 = vector.shape_cast %267 : vector<32xf32> to vector<1x32xf32>
    %288 = vector.broadcast %287 : vector<1x32xf32> to vector<16x32xf32>
    %289 = arith.addf %286, %288 : vector<16x32xf32>
    %c1_108 = arith.constant 1 : index
    %c0_109 = arith.constant 0 : index
    %c0_110 = arith.constant 0 : index
    %290 = vector.load %arg8[%c1_108, %c0_109, %c0_110] : memref<4x32x128xf32, #tpu.memory_space<vmem>>, vector<1x32x128xf32>
    %291 = vector.shape_cast %290 : vector<1x32x128xf32> to vector<32x128xf32>
    %cst_111 = arith.constant dense<0.000000e+00> : vector<16x128xf32>
    %292 = tpu.matmul %289, %291, %cst_111 {dimension_numbers = #tpu.dot_dimension_numbers<[1], [0], [0], [1], [0, 0, 1, 1], [], []>} : vector<16x32xf32>, vector<32x128xf32>, vector<16x128xf32> -> vector<16x128xf32>
    %c1_112 = arith.constant 1 : index
    %c0_113 = arith.constant 0 : index
    %293 = vector.load %arg9[%c1_112, %c0_113] : memref<4x128xf32, #tpu.memory_space<vmem>>, vector<1x128xf32>
    %294 = vector.shape_cast %293 : vector<1x128xf32> to vector<128xf32>
    %295 = vector.shape_cast %294 : vector<128xf32> to vector<1x128xf32>
    %296 = vector.broadcast %295 : vector<1x128xf32> to vector<16x128xf32>
    %297 = arith.addf %292, %296 : vector<16x128xf32>
    %cst_114 = arith.constant 0.000000e+00 : f32
    %298 = vector.broadcast %cst_114 : f32 to vector<16x128xf32>
    %299 = arith.maximumf %297, %298 : vector<16x128xf32>
    %c1_115 = arith.constant 1 : index
    %c0_116 = arith.constant 0 : index
    %c0_117 = arith.constant 0 : index
    %300 = vector.load %arg10[%c1_115, %c0_116, %c0_117] : memref<4x128x32xf32, #tpu.memory_space<vmem>>, vector<1x128x32xf32>
    %301 = vector.shape_cast %300 : vector<1x128x32xf32> to vector<128x32xf32>
    %cst_118 = arith.constant dense<0.000000e+00> : vector<16x32xf32>
    %302 = tpu.matmul %299, %301, %cst_118 {dimension_numbers = #tpu.dot_dimension_numbers<[1], [0], [0], [1], [0, 0, 1, 1], [], []>} : vector<16x128xf32>, vector<128x32xf32>, vector<16x32xf32> -> vector<16x32xf32>
    %c1_119 = arith.constant 1 : index
    %c0_120 = arith.constant 0 : index
    %303 = vector.load %arg11[%c1_119, %c0_120] : memref<4x32xf32, #tpu.memory_space<vmem>>, vector<1x32xf32>
    %304 = vector.shape_cast %303 : vector<1x32xf32> to vector<32xf32>
    %305 = vector.shape_cast %304 : vector<32xf32> to vector<1x32xf32>
    %306 = vector.broadcast %305 : vector<1x32xf32> to vector<16x32xf32>
    %307 = arith.addf %302, %306 : vector<16x32xf32>
    %308 = arith.addf %263, %307 : vector<16x32xf32>
    %c2 = arith.constant 2 : index
    %c0_121 = arith.constant 0 : index
    %309 = vector.load %arg1[%c2, %c0_121] : memref<4x32xf32, #tpu.memory_space<vmem>>, vector<1x32xf32>
    %310 = vector.shape_cast %309 : vector<1x32xf32> to vector<32xf32>
    %c2_122 = arith.constant 2 : index
    %c0_123 = arith.constant 0 : index
    %311 = vector.load %arg2[%c2_122, %c0_123] : memref<4x32xf32, #tpu.memory_space<vmem>>, vector<1x32xf32>
    %312 = vector.shape_cast %311 : vector<1x32xf32> to vector<32xf32>
    %cst_124 = arith.constant dense<0.000000e+00> : vector<16xf32>
    %313 = vector.multi_reduction <add>, %308, %cst_124 [1] : vector<16x32xf32> to vector<16xf32>
    %314 = vector.shape_cast %313 : vector<16xf32> to vector<16x1xf32>
    %cst_125 = arith.constant 3.200000e+01 : f32
    %315 = vector.broadcast %cst_125 : f32 to vector<16x1xf32>
    %316 = arith.divf %314, %315 : vector<16x1xf32>
    %317 = vector.broadcast %316 : vector<16x1xf32> to vector<16x32xf32>
    %318 = arith.subf %308, %317 : vector<16x32xf32>
    %319 = arith.mulf %318, %318 : vector<16x32xf32>
    %cst_126 = arith.constant dense<0.000000e+00> : vector<16xf32>
    %320 = vector.multi_reduction <add>, %319, %cst_126 [1] : vector<16x32xf32> to vector<16xf32>
    %321 = vector.shape_cast %320 : vector<16xf32> to vector<16x1xf32>
    %cst_127 = arith.constant 3.200000e+01 : f32
    %322 = vector.broadcast %cst_127 : f32 to vector<16x1xf32>
    %323 = arith.divf %321, %322 : vector<16x1xf32>
    %cst_128 = arith.constant 9.99999974E-6 : f32
    %324 = vector.broadcast %cst_128 : f32 to vector<16x1xf32>
    %325 = arith.addf %323, %324 : vector<16x1xf32>
    %326 = math.rsqrt %325 : vector<16x1xf32>
    %327 = vector.broadcast %326 : vector<16x1xf32> to vector<16x32xf32>
    %328 = arith.mulf %318, %327 : vector<16x32xf32>
    %329 = vector.shape_cast %310 : vector<32xf32> to vector<1x32xf32>
    %330 = vector.broadcast %329 : vector<1x32xf32> to vector<16x32xf32>
    %331 = arith.mulf %328, %330 : vector<16x32xf32>
    %332 = vector.shape_cast %312 : vector<32xf32> to vector<1x32xf32>
    %333 = vector.broadcast %332 : vector<1x32xf32> to vector<16x32xf32>
    %334 = arith.addf %331, %333 : vector<16x32xf32>
    %c2_129 = arith.constant 2 : index
    %c0_130 = arith.constant 0 : index
    %c0_131 = arith.constant 0 : index
    %335 = vector.load %arg3[%c2_129, %c0_130, %c0_131] : memref<4x32x96xf32, #tpu.memory_space<vmem>>, vector<1x32x96xf32>
    %336 = vector.shape_cast %335 : vector<1x32x96xf32> to vector<32x96xf32>
    %cst_132 = arith.constant dense<0.000000e+00> : vector<16x96xf32>
    %337 = tpu.matmul %334, %336, %cst_132 {dimension_numbers = #tpu.dot_dimension_numbers<[1], [0], [0], [1], [0, 0, 1, 1], [], []>} : vector<16x32xf32>, vector<32x96xf32>, vector<16x96xf32> -> vector<16x96xf32>
    %338 = vector.shape_cast %337 : vector<16x96xf32> to vector<2x8x96xf32>
    %339 = vector.extract_strided_slice %338 {offsets = [0, 0, 0], sizes = [2, 8, 8], strides = [1, 1, 1]} : vector<2x8x96xf32> to vector<2x8x8xf32>
    %340 = vector.extract_strided_slice %338 {offsets = [0, 0, 32], sizes = [2, 8, 8], strides = [1, 1, 1]} : vector<2x8x96xf32> to vector<2x8x8xf32>
    %341 = vector.extract_strided_slice %338 {offsets = [0, 0, 64], sizes = [2, 8, 8], strides = [1, 1, 1]} : vector<2x8x96xf32> to vector<2x8x8xf32>
    "tpu.trace_start"() <{level = 10 : i32, message = "bqd,bkd->bqk"}> : () -> ()
    %cst_133 = arith.constant dense<0.000000e+00> : vector<2x8x8xf32>
    %342 = tpu.matmul %339, %340, %cst_133 {dimension_numbers = #tpu.dot_dimension_numbers<[2], [2], [1], [1], [0, 0, 0, 1, 1, 1], [0], [0]>} : vector<2x8x8xf32>, vector<2x8x8xf32>, vector<2x8x8xf32> -> vector<2x8x8xf32>
    "tpu.trace_stop"() : () -> ()
    %cst_134 = arith.constant 0.353553385 : f32
    %343 = vector.broadcast %cst_134 : f32 to vector<2x8x8xf32>
    %344 = arith.mulf %342, %343 : vector<2x8x8xf32>
    %cst_135 = arith.constant dense<0xFF800000> : vector<2x8xf32>
    %345 = vector.multi_reduction <maximumf>, %344, %cst_135 [2] : vector<2x8x8xf32> to vector<2x8xf32>
    %346 = vector.shape_cast %345 : vector<2x8xf32> to vector<2x8x1xf32>
    %347 = vector.broadcast %346 : vector<2x8x1xf32> to vector<2x8x8xf32>
    %348 = arith.subf %344, %347 : vector<2x8x8xf32>
    %349 = math.exp %348 : vector<2x8x8xf32>
    %cst_136 = arith.constant dense<0.000000e+00> : vector<2x8xf32>
    %350 = vector.multi_reduction <add>, %349, %cst_136 [2] : vector<2x8x8xf32> to vector<2x8xf32>
    %351 = vector.shape_cast %350 : vector<2x8xf32> to vector<2x8x1xf32>
    %352 = tpu.reciprocal %351 {approx = true} : vector<2x8x1xf32> -> vector<2x8x1xf32>
    %353 = vector.broadcast %352 : vector<2x8x1xf32> to vector<2x8x8xf32>
    %354 = arith.mulf %349, %353 : vector<2x8x8xf32>
    "tpu.trace_start"() <{level = 10 : i32, message = "bqk,bkd->bqd"}> : () -> ()
    %cst_137 = arith.constant dense<0.000000e+00> : vector<2x8x8xf32>
    %355 = tpu.matmul %354, %341, %cst_137 {dimension_numbers = #tpu.dot_dimension_numbers<[2], [1], [1], [2], [0, 0, 0, 1, 1, 2], [0], [0]>} : vector<2x8x8xf32>, vector<2x8x8xf32>, vector<2x8x8xf32> -> vector<2x8x8xf32>
    "tpu.trace_stop"() : () -> ()
    %356 = vector.extract_strided_slice %338 {offsets = [0, 0, 8], sizes = [2, 8, 8], strides = [1, 1, 1]} : vector<2x8x96xf32> to vector<2x8x8xf32>
    %357 = vector.extract_strided_slice %338 {offsets = [0, 0, 40], sizes = [2, 8, 8], strides = [1, 1, 1]} : vector<2x8x96xf32> to vector<2x8x8xf32>
    %358 = vector.extract_strided_slice %338 {offsets = [0, 0, 72], sizes = [2, 8, 8], strides = [1, 1, 1]} : vector<2x8x96xf32> to vector<2x8x8xf32>
    "tpu.trace_start"() <{level = 10 : i32, message = "bqd,bkd->bqk"}> : () -> ()
    %cst_138 = arith.constant dense<0.000000e+00> : vector<2x8x8xf32>
    %359 = tpu.matmul %356, %357, %cst_138 {dimension_numbers = #tpu.dot_dimension_numbers<[2], [2], [1], [1], [0, 0, 0, 1, 1, 1], [0], [0]>} : vector<2x8x8xf32>, vector<2x8x8xf32>, vector<2x8x8xf32> -> vector<2x8x8xf32>
    "tpu.trace_stop"() : () -> ()
    %cst_139 = arith.constant 0.353553385 : f32
    %360 = vector.broadcast %cst_139 : f32 to vector<2x8x8xf32>
    %361 = arith.mulf %359, %360 : vector<2x8x8xf32>
    %cst_140 = arith.constant dense<0xFF800000> : vector<2x8xf32>
    %362 = vector.multi_reduction <maximumf>, %361, %cst_140 [2] : vector<2x8x8xf32> to vector<2x8xf32>
    %363 = vector.shape_cast %362 : vector<2x8xf32> to vector<2x8x1xf32>
    %364 = vector.broadcast %363 : vector<2x8x1xf32> to vector<2x8x8xf32>
    %365 = arith.subf %361, %364 : vector<2x8x8xf32>
    %366 = math.exp %365 : vector<2x8x8xf32>
    %cst_141 = arith.constant dense<0.000000e+00> : vector<2x8xf32>
    %367 = vector.multi_reduction <add>, %366, %cst_141 [2] : vector<2x8x8xf32> to vector<2x8xf32>
    %368 = vector.shape_cast %367 : vector<2x8xf32> to vector<2x8x1xf32>
    %369 = tpu.reciprocal %368 {approx = true} : vector<2x8x1xf32> -> vector<2x8x1xf32>
    %370 = vector.broadcast %369 : vector<2x8x1xf32> to vector<2x8x8xf32>
    %371 = arith.mulf %366, %370 : vector<2x8x8xf32>
    "tpu.trace_start"() <{level = 10 : i32, message = "bqk,bkd->bqd"}> : () -> ()
    %cst_142 = arith.constant dense<0.000000e+00> : vector<2x8x8xf32>
    %372 = tpu.matmul %371, %358, %cst_142 {dimension_numbers = #tpu.dot_dimension_numbers<[2], [1], [1], [2], [0, 0, 0, 1, 1, 2], [0], [0]>} : vector<2x8x8xf32>, vector<2x8x8xf32>, vector<2x8x8xf32> -> vector<2x8x8xf32>
    "tpu.trace_stop"() : () -> ()
    %373 = vector.extract_strided_slice %338 {offsets = [0, 0, 16], sizes = [2, 8, 8], strides = [1, 1, 1]} : vector<2x8x96xf32> to vector<2x8x8xf32>
    %374 = vector.extract_strided_slice %338 {offsets = [0, 0, 48], sizes = [2, 8, 8], strides = [1, 1, 1]} : vector<2x8x96xf32> to vector<2x8x8xf32>
    %375 = vector.extract_strided_slice %338 {offsets = [0, 0, 80], sizes = [2, 8, 8], strides = [1, 1, 1]} : vector<2x8x96xf32> to vector<2x8x8xf32>
    "tpu.trace_start"() <{level = 10 : i32, message = "bqd,bkd->bqk"}> : () -> ()
    %cst_143 = arith.constant dense<0.000000e+00> : vector<2x8x8xf32>
    %376 = tpu.matmul %373, %374, %cst_143 {dimension_numbers = #tpu.dot_dimension_numbers<[2], [2], [1], [1], [0, 0, 0, 1, 1, 1], [0], [0]>} : vector<2x8x8xf32>, vector<2x8x8xf32>, vector<2x8x8xf32> -> vector<2x8x8xf32>
    "tpu.trace_stop"() : () -> ()
    %cst_144 = arith.constant 0.353553385 : f32
    %377 = vector.broadcast %cst_144 : f32 to vector<2x8x8xf32>
    %378 = arith.mulf %376, %377 : vector<2x8x8xf32>
    %cst_145 = arith.constant dense<0xFF800000> : vector<2x8xf32>
    %379 = vector.multi_reduction <maximumf>, %378, %cst_145 [2] : vector<2x8x8xf32> to vector<2x8xf32>
    %380 = vector.shape_cast %379 : vector<2x8xf32> to vector<2x8x1xf32>
    %381 = vector.broadcast %380 : vector<2x8x1xf32> to vector<2x8x8xf32>
    %382 = arith.subf %378, %381 : vector<2x8x8xf32>
    %383 = math.exp %382 : vector<2x8x8xf32>
    %cst_146 = arith.constant dense<0.000000e+00> : vector<2x8xf32>
    %384 = vector.multi_reduction <add>, %383, %cst_146 [2] : vector<2x8x8xf32> to vector<2x8xf32>
    %385 = vector.shape_cast %384 : vector<2x8xf32> to vector<2x8x1xf32>
    %386 = tpu.reciprocal %385 {approx = true} : vector<2x8x1xf32> -> vector<2x8x1xf32>
    %387 = vector.broadcast %386 : vector<2x8x1xf32> to vector<2x8x8xf32>
    %388 = arith.mulf %383, %387 : vector<2x8x8xf32>
    "tpu.trace_start"() <{level = 10 : i32, message = "bqk,bkd->bqd"}> : () -> ()
    %cst_147 = arith.constant dense<0.000000e+00> : vector<2x8x8xf32>
    %389 = tpu.matmul %388, %375, %cst_147 {dimension_numbers = #tpu.dot_dimension_numbers<[2], [1], [1], [2], [0, 0, 0, 1, 1, 2], [0], [0]>} : vector<2x8x8xf32>, vector<2x8x8xf32>, vector<2x8x8xf32> -> vector<2x8x8xf32>
    "tpu.trace_stop"() : () -> ()
    %390 = vector.extract_strided_slice %338 {offsets = [0, 0, 24], sizes = [2, 8, 8], strides = [1, 1, 1]} : vector<2x8x96xf32> to vector<2x8x8xf32>
    %391 = vector.extract_strided_slice %338 {offsets = [0, 0, 56], sizes = [2, 8, 8], strides = [1, 1, 1]} : vector<2x8x96xf32> to vector<2x8x8xf32>
    %392 = vector.extract_strided_slice %338 {offsets = [0, 0, 88], sizes = [2, 8, 8], strides = [1, 1, 1]} : vector<2x8x96xf32> to vector<2x8x8xf32>
    "tpu.trace_start"() <{level = 10 : i32, message = "bqd,bkd->bqk"}> : () -> ()
    %cst_148 = arith.constant dense<0.000000e+00> : vector<2x8x8xf32>
    %393 = tpu.matmul %390, %391, %cst_148 {dimension_numbers = #tpu.dot_dimension_numbers<[2], [2], [1], [1], [0, 0, 0, 1, 1, 1], [0], [0]>} : vector<2x8x8xf32>, vector<2x8x8xf32>, vector<2x8x8xf32> -> vector<2x8x8xf32>
    "tpu.trace_stop"() : () -> ()
    %cst_149 = arith.constant 0.353553385 : f32
    %394 = vector.broadcast %cst_149 : f32 to vector<2x8x8xf32>
    %395 = arith.mulf %393, %394 : vector<2x8x8xf32>
    %cst_150 = arith.constant dense<0xFF800000> : vector<2x8xf32>
    %396 = vector.multi_reduction <maximumf>, %395, %cst_150 [2] : vector<2x8x8xf32> to vector<2x8xf32>
    %397 = vector.shape_cast %396 : vector<2x8xf32> to vector<2x8x1xf32>
    %398 = vector.broadcast %397 : vector<2x8x1xf32> to vector<2x8x8xf32>
    %399 = arith.subf %395, %398 : vector<2x8x8xf32>
    %400 = math.exp %399 : vector<2x8x8xf32>
    %cst_151 = arith.constant dense<0.000000e+00> : vector<2x8xf32>
    %401 = vector.multi_reduction <add>, %400, %cst_151 [2] : vector<2x8x8xf32> to vector<2x8xf32>
    %402 = vector.shape_cast %401 : vector<2x8xf32> to vector<2x8x1xf32>
    %403 = tpu.reciprocal %402 {approx = true} : vector<2x8x1xf32> -> vector<2x8x1xf32>
    %404 = vector.broadcast %403 : vector<2x8x1xf32> to vector<2x8x8xf32>
    %405 = arith.mulf %400, %404 : vector<2x8x8xf32>
    "tpu.trace_start"() <{level = 10 : i32, message = "bqk,bkd->bqd"}> : () -> ()
    %cst_152 = arith.constant dense<0.000000e+00> : vector<2x8x8xf32>
    %406 = tpu.matmul %405, %392, %cst_152 {dimension_numbers = #tpu.dot_dimension_numbers<[2], [1], [1], [2], [0, 0, 0, 1, 1, 2], [0], [0]>} : vector<2x8x8xf32>, vector<2x8x8xf32>, vector<2x8x8xf32> -> vector<2x8x8xf32>
    "tpu.trace_stop"() : () -> ()
    %407 = tpu.concatenate %355, %372, %389, %406 in 2 : vector<2x8x8xf32>, vector<2x8x8xf32>, vector<2x8x8xf32>, vector<2x8x8xf32> -> vector<2x8x32xf32>
    %408 = vector.shape_cast %407 : vector<2x8x32xf32> to vector<16x32xf32>
    %c2_153 = arith.constant 2 : index
    %c0_154 = arith.constant 0 : index
    %c0_155 = arith.constant 0 : index
    %409 = vector.load %arg4[%c2_153, %c0_154, %c0_155] : memref<4x32x32xf32, #tpu.memory_space<vmem>>, vector<1x32x32xf32>
    %410 = vector.shape_cast %409 : vector<1x32x32xf32> to vector<32x32xf32>
    %cst_156 = arith.constant dense<0.000000e+00> : vector<16x32xf32>
    %411 = tpu.matmul %408, %410, %cst_156 {dimension_numbers = #tpu.dot_dimension_numbers<[1], [0], [0], [1], [0, 0, 1, 1], [], []>} : vector<16x32xf32>, vector<32x32xf32>, vector<16x32xf32> -> vector<16x32xf32>
    %c2_157 = arith.constant 2 : index
    %c0_158 = arith.constant 0 : index
    %412 = vector.load %arg5[%c2_157, %c0_158] : memref<4x32xf32, #tpu.memory_space<vmem>>, vector<1x32xf32>
    %413 = vector.shape_cast %412 : vector<1x32xf32> to vector<32xf32>
    %414 = vector.shape_cast %413 : vector<32xf32> to vector<1x32xf32>
    %415 = vector.broadcast %414 : vector<1x32xf32> to vector<16x32xf32>
    %416 = arith.addf %411, %415 : vector<16x32xf32>
    %417 = arith.addf %308, %416 : vector<16x32xf32>
    %c2_159 = arith.constant 2 : index
    %c0_160 = arith.constant 0 : index
    %418 = vector.load %arg6[%c2_159, %c0_160] : memref<4x32xf32, #tpu.memory_space<vmem>>, vector<1x32xf32>
    %419 = vector.shape_cast %418 : vector<1x32xf32> to vector<32xf32>
    %c2_161 = arith.constant 2 : index
    %c0_162 = arith.constant 0 : index
    %420 = vector.load %arg7[%c2_161, %c0_162] : memref<4x32xf32, #tpu.memory_space<vmem>>, vector<1x32xf32>
    %421 = vector.shape_cast %420 : vector<1x32xf32> to vector<32xf32>
    %cst_163 = arith.constant dense<0.000000e+00> : vector<16xf32>
    %422 = vector.multi_reduction <add>, %417, %cst_163 [1] : vector<16x32xf32> to vector<16xf32>
    %423 = vector.shape_cast %422 : vector<16xf32> to vector<16x1xf32>
    %cst_164 = arith.constant 3.200000e+01 : f32
    %424 = vector.broadcast %cst_164 : f32 to vector<16x1xf32>
    %425 = arith.divf %423, %424 : vector<16x1xf32>
    %426 = vector.broadcast %425 : vector<16x1xf32> to vector<16x32xf32>
    %427 = arith.subf %417, %426 : vector<16x32xf32>
    %428 = arith.mulf %427, %427 : vector<16x32xf32>
    %cst_165 = arith.constant dense<0.000000e+00> : vector<16xf32>
    %429 = vector.multi_reduction <add>, %428, %cst_165 [1] : vector<16x32xf32> to vector<16xf32>
    %430 = vector.shape_cast %429 : vector<16xf32> to vector<16x1xf32>
    %cst_166 = arith.constant 3.200000e+01 : f32
    %431 = vector.broadcast %cst_166 : f32 to vector<16x1xf32>
    %432 = arith.divf %430, %431 : vector<16x1xf32>
    %cst_167 = arith.constant 9.99999974E-6 : f32
    %433 = vector.broadcast %cst_167 : f32 to vector<16x1xf32>
    %434 = arith.addf %432, %433 : vector<16x1xf32>
    %435 = math.rsqrt %434 : vector<16x1xf32>
    %436 = vector.broadcast %435 : vector<16x1xf32> to vector<16x32xf32>
    %437 = arith.mulf %427, %436 : vector<16x32xf32>
    %438 = vector.shape_cast %419 : vector<32xf32> to vector<1x32xf32>
    %439 = vector.broadcast %438 : vector<1x32xf32> to vector<16x32xf32>
    %440 = arith.mulf %437, %439 : vector<16x32xf32>
    %441 = vector.shape_cast %421 : vector<32xf32> to vector<1x32xf32>
    %442 = vector.broadcast %441 : vector<1x32xf32> to vector<16x32xf32>
    %443 = arith.addf %440, %442 : vector<16x32xf32>
    %c2_168 = arith.constant 2 : index
    %c0_169 = arith.constant 0 : index
    %c0_170 = arith.constant 0 : index
    %444 = vector.load %arg8[%c2_168, %c0_169, %c0_170] : memref<4x32x128xf32, #tpu.memory_space<vmem>>, vector<1x32x128xf32>
    %445 = vector.shape_cast %444 : vector<1x32x128xf32> to vector<32x128xf32>
    %cst_171 = arith.constant dense<0.000000e+00> : vector<16x128xf32>
    %446 = tpu.matmul %443, %445, %cst_171 {dimension_numbers = #tpu.dot_dimension_numbers<[1], [0], [0], [1], [0, 0, 1, 1], [], []>} : vector<16x32xf32>, vector<32x128xf32>, vector<16x128xf32> -> vector<16x128xf32>
    %c2_172 = arith.constant 2 : index
    %c0_173 = arith.constant 0 : index
    %447 = vector.load %arg9[%c2_172, %c0_173] : memref<4x128xf32, #tpu.memory_space<vmem>>, vector<1x128xf32>
    %448 = vector.shape_cast %447 : vector<1x128xf32> to vector<128xf32>
    %449 = vector.shape_cast %448 : vector<128xf32> to vector<1x128xf32>
    %450 = vector.broadcast %449 : vector<1x128xf32> to vector<16x128xf32>
    %451 = arith.addf %446, %450 : vector<16x128xf32>
    %cst_174 = arith.constant 0.000000e+00 : f32
    %452 = vector.broadcast %cst_174 : f32 to vector<16x128xf32>
    %453 = arith.maximumf %451, %452 : vector<16x128xf32>
    %c2_175 = arith.constant 2 : index
    %c0_176 = arith.constant 0 : index
    %c0_177 = arith.constant 0 : index
    %454 = vector.load %arg10[%c2_175, %c0_176, %c0_177] : memref<4x128x32xf32, #tpu.memory_space<vmem>>, vector<1x128x32xf32>
    %455 = vector.shape_cast %454 : vector<1x128x32xf32> to vector<128x32xf32>
    %cst_178 = arith.constant dense<0.000000e+00> : vector<16x32xf32>
    %456 = tpu.matmul %453, %455, %cst_178 {dimension_numbers = #tpu.dot_dimension_numbers<[1], [0], [0], [1], [0, 0, 1, 1], [], []>} : vector<16x128xf32>, vector<128x32xf32>, vector<16x32xf32> -> vector<16x32xf32>
    %c2_179 = arith.constant 2 : index
    %c0_180 = arith.constant 0 : index
    %457 = vector.load %arg11[%c2_179, %c0_180] : memref<4x32xf32, #tpu.memory_space<vmem>>, vector<1x32xf32>
    %458 = vector.shape_cast %457 : vector<1x32xf32> to vector<32xf32>
    %459 = vector.shape_cast %458 : vector<32xf32> to vector<1x32xf32>
    %460 = vector.broadcast %459 : vector<1x32xf32> to vector<16x32xf32>
    %461 = arith.addf %456, %460 : vector<16x32xf32>
    %462 = arith.addf %417, %461 : vector<16x32xf32>
    %c3 = arith.constant 3 : index
    %c0_181 = arith.constant 0 : index
    %463 = vector.load %arg1[%c3, %c0_181] : memref<4x32xf32, #tpu.memory_space<vmem>>, vector<1x32xf32>
    %464 = vector.shape_cast %463 : vector<1x32xf32> to vector<32xf32>
    %c3_182 = arith.constant 3 : index
    %c0_183 = arith.constant 0 : index
    %465 = vector.load %arg2[%c3_182, %c0_183] : memref<4x32xf32, #tpu.memory_space<vmem>>, vector<1x32xf32>
    %466 = vector.shape_cast %465 : vector<1x32xf32> to vector<32xf32>
    %cst_184 = arith.constant dense<0.000000e+00> : vector<16xf32>
    %467 = vector.multi_reduction <add>, %462, %cst_184 [1] : vector<16x32xf32> to vector<16xf32>
    %468 = vector.shape_cast %467 : vector<16xf32> to vector<16x1xf32>
    %cst_185 = arith.constant 3.200000e+01 : f32
    %469 = vector.broadcast %cst_185 : f32 to vector<16x1xf32>
    %470 = arith.divf %468, %469 : vector<16x1xf32>
    %471 = vector.broadcast %470 : vector<16x1xf32> to vector<16x32xf32>
    %472 = arith.subf %462, %471 : vector<16x32xf32>
    %473 = arith.mulf %472, %472 : vector<16x32xf32>
    %cst_186 = arith.constant dense<0.000000e+00> : vector<16xf32>
    %474 = vector.multi_reduction <add>, %473, %cst_186 [1] : vector<16x32xf32> to vector<16xf32>
    %475 = vector.shape_cast %474 : vector<16xf32> to vector<16x1xf32>
    %cst_187 = arith.constant 3.200000e+01 : f32
    %476 = vector.broadcast %cst_187 : f32 to vector<16x1xf32>
    %477 = arith.divf %475, %476 : vector<16x1xf32>
    %cst_188 = arith.constant 9.99999974E-6 : f32
    %478 = vector.broadcast %cst_188 : f32 to vector<16x1xf32>
    %479 = arith.addf %477, %478 : vector<16x1xf32>
    %480 = math.rsqrt %479 : vector<16x1xf32>
    %481 = vector.broadcast %480 : vector<16x1xf32> to vector<16x32xf32>
    %482 = arith.mulf %472, %481 : vector<16x32xf32>
    %483 = vector.shape_cast %464 : vector<32xf32> to vector<1x32xf32>
    %484 = vector.broadcast %483 : vector<1x32xf32> to vector<16x32xf32>
    %485 = arith.mulf %482, %484 : vector<16x32xf32>
    %486 = vector.shape_cast %466 : vector<32xf32> to vector<1x32xf32>
    %487 = vector.broadcast %486 : vector<1x32xf32> to vector<16x32xf32>
    %488 = arith.addf %485, %487 : vector<16x32xf32>
    %c3_189 = arith.constant 3 : index
    %c0_190 = arith.constant 0 : index
    %c0_191 = arith.constant 0 : index
    %489 = vector.load %arg3[%c3_189, %c0_190, %c0_191] : memref<4x32x96xf32, #tpu.memory_space<vmem>>, vector<1x32x96xf32>
    %490 = vector.shape_cast %489 : vector<1x32x96xf32> to vector<32x96xf32>
    %cst_192 = arith.constant dense<0.000000e+00> : vector<16x96xf32>
    %491 = tpu.matmul %488, %490, %cst_192 {dimension_numbers = #tpu.dot_dimension_numbers<[1], [0], [0], [1], [0, 0, 1, 1], [], []>} : vector<16x32xf32>, vector<32x96xf32>, vector<16x96xf32> -> vector<16x96xf32>
    %492 = vector.shape_cast %491 : vector<16x96xf32> to vector<2x8x96xf32>
    %493 = vector.extract_strided_slice %492 {offsets = [0, 0, 0], sizes = [2, 8, 8], strides = [1, 1, 1]} : vector<2x8x96xf32> to vector<2x8x8xf32>
    %494 = vector.extract_strided_slice %492 {offsets = [0, 0, 32], sizes = [2, 8, 8], strides = [1, 1, 1]} : vector<2x8x96xf32> to vector<2x8x8xf32>
    %495 = vector.extract_strided_slice %492 {offsets = [0, 0, 64], sizes = [2, 8, 8], strides = [1, 1, 1]} : vector<2x8x96xf32> to vector<2x8x8xf32>
    "tpu.trace_start"() <{level = 10 : i32, message = "bqd,bkd->bqk"}> : () -> ()
    %cst_193 = arith.constant dense<0.000000e+00> : vector<2x8x8xf32>
    %496 = tpu.matmul %493, %494, %cst_193 {dimension_numbers = #tpu.dot_dimension_numbers<[2], [2], [1], [1], [0, 0, 0, 1, 1, 1], [0], [0]>} : vector<2x8x8xf32>, vector<2x8x8xf32>, vector<2x8x8xf32> -> vector<2x8x8xf32>
    "tpu.trace_stop"() : () -> ()
    %cst_194 = arith.constant 0.353553385 : f32
    %497 = vector.broadcast %cst_194 : f32 to vector<2x8x8xf32>
    %498 = arith.mulf %496, %497 : vector<2x8x8xf32>
    %cst_195 = arith.constant dense<0xFF800000> : vector<2x8xf32>
    %499 = vector.multi_reduction <maximumf>, %498, %cst_195 [2] : vector<2x8x8xf32> to vector<2x8xf32>
    %500 = vector.shape_cast %499 : vector<2x8xf32> to vector<2x8x1xf32>
    %501 = vector.broadcast %500 : vector<2x8x1xf32> to vector<2x8x8xf32>
    %502 = arith.subf %498, %501 : vector<2x8x8xf32>
    %503 = math.exp %502 : vector<2x8x8xf32>
    %cst_196 = arith.constant dense<0.000000e+00> : vector<2x8xf32>
    %504 = vector.multi_reduction <add>, %503, %cst_196 [2] : vector<2x8x8xf32> to vector<2x8xf32>
    %505 = vector.shape_cast %504 : vector<2x8xf32> to vector<2x8x1xf32>
    %506 = tpu.reciprocal %505 {approx = true} : vector<2x8x1xf32> -> vector<2x8x1xf32>
    %507 = vector.broadcast %506 : vector<2x8x1xf32> to vector<2x8x8xf32>
    %508 = arith.mulf %503, %507 : vector<2x8x8xf32>
    "tpu.trace_start"() <{level = 10 : i32, message = "bqk,bkd->bqd"}> : () -> ()
    %cst_197 = arith.constant dense<0.000000e+00> : vector<2x8x8xf32>
    %509 = tpu.matmul %508, %495, %cst_197 {dimension_numbers = #tpu.dot_dimension_numbers<[2], [1], [1], [2], [0, 0, 0, 1, 1, 2], [0], [0]>} : vector<2x8x8xf32>, vector<2x8x8xf32>, vector<2x8x8xf32> -> vector<2x8x8xf32>
    "tpu.trace_stop"() : () -> ()
    %510 = vector.extract_strided_slice %492 {offsets = [0, 0, 8], sizes = [2, 8, 8], strides = [1, 1, 1]} : vector<2x8x96xf32> to vector<2x8x8xf32>
    %511 = vector.extract_strided_slice %492 {offsets = [0, 0, 40], sizes = [2, 8, 8], strides = [1, 1, 1]} : vector<2x8x96xf32> to vector<2x8x8xf32>
    %512 = vector.extract_strided_slice %492 {offsets = [0, 0, 72], sizes = [2, 8, 8], strides = [1, 1, 1]} : vector<2x8x96xf32> to vector<2x8x8xf32>
    "tpu.trace_start"() <{level = 10 : i32, message = "bqd,bkd->bqk"}> : () -> ()
    %cst_198 = arith.constant dense<0.000000e+00> : vector<2x8x8xf32>
    %513 = tpu.matmul %510, %511, %cst_198 {dimension_numbers = #tpu.dot_dimension_numbers<[2], [2], [1], [1], [0, 0, 0, 1, 1, 1], [0], [0]>} : vector<2x8x8xf32>, vector<2x8x8xf32>, vector<2x8x8xf32> -> vector<2x8x8xf32>
    "tpu.trace_stop"() : () -> ()
    %cst_199 = arith.constant 0.353553385 : f32
    %514 = vector.broadcast %cst_199 : f32 to vector<2x8x8xf32>
    %515 = arith.mulf %513, %514 : vector<2x8x8xf32>
    %cst_200 = arith.constant dense<0xFF800000> : vector<2x8xf32>
    %516 = vector.multi_reduction <maximumf>, %515, %cst_200 [2] : vector<2x8x8xf32> to vector<2x8xf32>
    %517 = vector.shape_cast %516 : vector<2x8xf32> to vector<2x8x1xf32>
    %518 = vector.broadcast %517 : vector<2x8x1xf32> to vector<2x8x8xf32>
    %519 = arith.subf %515, %518 : vector<2x8x8xf32>
    %520 = math.exp %519 : vector<2x8x8xf32>
    %cst_201 = arith.constant dense<0.000000e+00> : vector<2x8xf32>
    %521 = vector.multi_reduction <add>, %520, %cst_201 [2] : vector<2x8x8xf32> to vector<2x8xf32>
    %522 = vector.shape_cast %521 : vector<2x8xf32> to vector<2x8x1xf32>
    %523 = tpu.reciprocal %522 {approx = true} : vector<2x8x1xf32> -> vector<2x8x1xf32>
    %524 = vector.broadcast %523 : vector<2x8x1xf32> to vector<2x8x8xf32>
    %525 = arith.mulf %520, %524 : vector<2x8x8xf32>
    "tpu.trace_start"() <{level = 10 : i32, message = "bqk,bkd->bqd"}> : () -> ()
    %cst_202 = arith.constant dense<0.000000e+00> : vector<2x8x8xf32>
    %526 = tpu.matmul %525, %512, %cst_202 {dimension_numbers = #tpu.dot_dimension_numbers<[2], [1], [1], [2], [0, 0, 0, 1, 1, 2], [0], [0]>} : vector<2x8x8xf32>, vector<2x8x8xf32>, vector<2x8x8xf32> -> vector<2x8x8xf32>
    "tpu.trace_stop"() : () -> ()
    %527 = vector.extract_strided_slice %492 {offsets = [0, 0, 16], sizes = [2, 8, 8], strides = [1, 1, 1]} : vector<2x8x96xf32> to vector<2x8x8xf32>
    %528 = vector.extract_strided_slice %492 {offsets = [0, 0, 48], sizes = [2, 8, 8], strides = [1, 1, 1]} : vector<2x8x96xf32> to vector<2x8x8xf32>
    %529 = vector.extract_strided_slice %492 {offsets = [0, 0, 80], sizes = [2, 8, 8], strides = [1, 1, 1]} : vector<2x8x96xf32> to vector<2x8x8xf32>
    "tpu.trace_start"() <{level = 10 : i32, message = "bqd,bkd->bqk"}> : () -> ()
    %cst_203 = arith.constant dense<0.000000e+00> : vector<2x8x8xf32>
    %530 = tpu.matmul %527, %528, %cst_203 {dimension_numbers = #tpu.dot_dimension_numbers<[2], [2], [1], [1], [0, 0, 0, 1, 1, 1], [0], [0]>} : vector<2x8x8xf32>, vector<2x8x8xf32>, vector<2x8x8xf32> -> vector<2x8x8xf32>
    "tpu.trace_stop"() : () -> ()
    %cst_204 = arith.constant 0.353553385 : f32
    %531 = vector.broadcast %cst_204 : f32 to vector<2x8x8xf32>
    %532 = arith.mulf %530, %531 : vector<2x8x8xf32>
    %cst_205 = arith.constant dense<0xFF800000> : vector<2x8xf32>
    %533 = vector.multi_reduction <maximumf>, %532, %cst_205 [2] : vector<2x8x8xf32> to vector<2x8xf32>
    %534 = vector.shape_cast %533 : vector<2x8xf32> to vector<2x8x1xf32>
    %535 = vector.broadcast %534 : vector<2x8x1xf32> to vector<2x8x8xf32>
    %536 = arith.subf %532, %535 : vector<2x8x8xf32>
    %537 = math.exp %536 : vector<2x8x8xf32>
    %cst_206 = arith.constant dense<0.000000e+00> : vector<2x8xf32>
    %538 = vector.multi_reduction <add>, %537, %cst_206 [2] : vector<2x8x8xf32> to vector<2x8xf32>
    %539 = vector.shape_cast %538 : vector<2x8xf32> to vector<2x8x1xf32>
    %540 = tpu.reciprocal %539 {approx = true} : vector<2x8x1xf32> -> vector<2x8x1xf32>
    %541 = vector.broadcast %540 : vector<2x8x1xf32> to vector<2x8x8xf32>
    %542 = arith.mulf %537, %541 : vector<2x8x8xf32>
    "tpu.trace_start"() <{level = 10 : i32, message = "bqk,bkd->bqd"}> : () -> ()
    %cst_207 = arith.constant dense<0.000000e+00> : vector<2x8x8xf32>
    %543 = tpu.matmul %542, %529, %cst_207 {dimension_numbers = #tpu.dot_dimension_numbers<[2], [1], [1], [2], [0, 0, 0, 1, 1, 2], [0], [0]>} : vector<2x8x8xf32>, vector<2x8x8xf32>, vector<2x8x8xf32> -> vector<2x8x8xf32>
    "tpu.trace_stop"() : () -> ()
    %544 = vector.extract_strided_slice %492 {offsets = [0, 0, 24], sizes = [2, 8, 8], strides = [1, 1, 1]} : vector<2x8x96xf32> to vector<2x8x8xf32>
    %545 = vector.extract_strided_slice %492 {offsets = [0, 0, 56], sizes = [2, 8, 8], strides = [1, 1, 1]} : vector<2x8x96xf32> to vector<2x8x8xf32>
    %546 = vector.extract_strided_slice %492 {offsets = [0, 0, 88], sizes = [2, 8, 8], strides = [1, 1, 1]} : vector<2x8x96xf32> to vector<2x8x8xf32>
    "tpu.trace_start"() <{level = 10 : i32, message = "bqd,bkd->bqk"}> : () -> ()
    %cst_208 = arith.constant dense<0.000000e+00> : vector<2x8x8xf32>
    %547 = tpu.matmul %544, %545, %cst_208 {dimension_numbers = #tpu.dot_dimension_numbers<[2], [2], [1], [1], [0, 0, 0, 1, 1, 1], [0], [0]>} : vector<2x8x8xf32>, vector<2x8x8xf32>, vector<2x8x8xf32> -> vector<2x8x8xf32>
    "tpu.trace_stop"() : () -> ()
    %cst_209 = arith.constant 0.353553385 : f32
    %548 = vector.broadcast %cst_209 : f32 to vector<2x8x8xf32>
    %549 = arith.mulf %547, %548 : vector<2x8x8xf32>
    %cst_210 = arith.constant dense<0xFF800000> : vector<2x8xf32>
    %550 = vector.multi_reduction <maximumf>, %549, %cst_210 [2] : vector<2x8x8xf32> to vector<2x8xf32>
    %551 = vector.shape_cast %550 : vector<2x8xf32> to vector<2x8x1xf32>
    %552 = vector.broadcast %551 : vector<2x8x1xf32> to vector<2x8x8xf32>
    %553 = arith.subf %549, %552 : vector<2x8x8xf32>
    %554 = math.exp %553 : vector<2x8x8xf32>
    %cst_211 = arith.constant dense<0.000000e+00> : vector<2x8xf32>
    %555 = vector.multi_reduction <add>, %554, %cst_211 [2] : vector<2x8x8xf32> to vector<2x8xf32>
    %556 = vector.shape_cast %555 : vector<2x8xf32> to vector<2x8x1xf32>
    %557 = tpu.reciprocal %556 {approx = true} : vector<2x8x1xf32> -> vector<2x8x1xf32>
    %558 = vector.broadcast %557 : vector<2x8x1xf32> to vector<2x8x8xf32>
    %559 = arith.mulf %554, %558 : vector<2x8x8xf32>
    "tpu.trace_start"() <{level = 10 : i32, message = "bqk,bkd->bqd"}> : () -> ()
    %cst_212 = arith.constant dense<0.000000e+00> : vector<2x8x8xf32>
    %560 = tpu.matmul %559, %546, %cst_212 {dimension_numbers = #tpu.dot_dimension_numbers<[2], [1], [1], [2], [0, 0, 0, 1, 1, 2], [0], [0]>} : vector<2x8x8xf32>, vector<2x8x8xf32>, vector<2x8x8xf32> -> vector<2x8x8xf32>
    "tpu.trace_stop"() : () -> ()
    %561 = tpu.concatenate %509, %526, %543, %560 in 2 : vector<2x8x8xf32>, vector<2x8x8xf32>, vector<2x8x8xf32>, vector<2x8x8xf32> -> vector<2x8x32xf32>
    %562 = vector.shape_cast %561 : vector<2x8x32xf32> to vector<16x32xf32>
    %c3_213 = arith.constant 3 : index
    %c0_214 = arith.constant 0 : index
    %c0_215 = arith.constant 0 : index
    %563 = vector.load %arg4[%c3_213, %c0_214, %c0_215] : memref<4x32x32xf32, #tpu.memory_space<vmem>>, vector<1x32x32xf32>
    %564 = vector.shape_cast %563 : vector<1x32x32xf32> to vector<32x32xf32>
    %cst_216 = arith.constant dense<0.000000e+00> : vector<16x32xf32>
    %565 = tpu.matmul %562, %564, %cst_216 {dimension_numbers = #tpu.dot_dimension_numbers<[1], [0], [0], [1], [0, 0, 1, 1], [], []>} : vector<16x32xf32>, vector<32x32xf32>, vector<16x32xf32> -> vector<16x32xf32>
    %c3_217 = arith.constant 3 : index
    %c0_218 = arith.constant 0 : index
    %566 = vector.load %arg5[%c3_217, %c0_218] : memref<4x32xf32, #tpu.memory_space<vmem>>, vector<1x32xf32>
    %567 = vector.shape_cast %566 : vector<1x32xf32> to vector<32xf32>
    %568 = vector.shape_cast %567 : vector<32xf32> to vector<1x32xf32>
    %569 = vector.broadcast %568 : vector<1x32xf32> to vector<16x32xf32>
    %570 = arith.addf %565, %569 : vector<16x32xf32>
    %571 = arith.addf %462, %570 : vector<16x32xf32>
    %c3_219 = arith.constant 3 : index
    %c0_220 = arith.constant 0 : index
    %572 = vector.load %arg6[%c3_219, %c0_220] : memref<4x32xf32, #tpu.memory_space<vmem>>, vector<1x32xf32>
    %573 = vector.shape_cast %572 : vector<1x32xf32> to vector<32xf32>
    %c3_221 = arith.constant 3 : index
    %c0_222 = arith.constant 0 : index
    %574 = vector.load %arg7[%c3_221, %c0_222] : memref<4x32xf32, #tpu.memory_space<vmem>>, vector<1x32xf32>
    %575 = vector.shape_cast %574 : vector<1x32xf32> to vector<32xf32>
    %cst_223 = arith.constant dense<0.000000e+00> : vector<16xf32>
    %576 = vector.multi_reduction <add>, %571, %cst_223 [1] : vector<16x32xf32> to vector<16xf32>
    %577 = vector.shape_cast %576 : vector<16xf32> to vector<16x1xf32>
    %cst_224 = arith.constant 3.200000e+01 : f32
    %578 = vector.broadcast %cst_224 : f32 to vector<16x1xf32>
    %579 = arith.divf %577, %578 : vector<16x1xf32>
    %580 = vector.broadcast %579 : vector<16x1xf32> to vector<16x32xf32>
    %581 = arith.subf %571, %580 : vector<16x32xf32>
    %582 = arith.mulf %581, %581 : vector<16x32xf32>
    %cst_225 = arith.constant dense<0.000000e+00> : vector<16xf32>
    %583 = vector.multi_reduction <add>, %582, %cst_225 [1] : vector<16x32xf32> to vector<16xf32>
    %584 = vector.shape_cast %583 : vector<16xf32> to vector<16x1xf32>
    %cst_226 = arith.constant 3.200000e+01 : f32
    %585 = vector.broadcast %cst_226 : f32 to vector<16x1xf32>
    %586 = arith.divf %584, %585 : vector<16x1xf32>
    %cst_227 = arith.constant 9.99999974E-6 : f32
    %587 = vector.broadcast %cst_227 : f32 to vector<16x1xf32>
    %588 = arith.addf %586, %587 : vector<16x1xf32>
    %589 = math.rsqrt %588 : vector<16x1xf32>
    %590 = vector.broadcast %589 : vector<16x1xf32> to vector<16x32xf32>
    %591 = arith.mulf %581, %590 : vector<16x32xf32>
    %592 = vector.shape_cast %573 : vector<32xf32> to vector<1x32xf32>
    %593 = vector.broadcast %592 : vector<1x32xf32> to vector<16x32xf32>
    %594 = arith.mulf %591, %593 : vector<16x32xf32>
    %595 = vector.shape_cast %575 : vector<32xf32> to vector<1x32xf32>
    %596 = vector.broadcast %595 : vector<1x32xf32> to vector<16x32xf32>
    %597 = arith.addf %594, %596 : vector<16x32xf32>
    %c3_228 = arith.constant 3 : index
    %c0_229 = arith.constant 0 : index
    %c0_230 = arith.constant 0 : index
    %598 = vector.load %arg8[%c3_228, %c0_229, %c0_230] : memref<4x32x128xf32, #tpu.memory_space<vmem>>, vector<1x32x128xf32>
    %599 = vector.shape_cast %598 : vector<1x32x128xf32> to vector<32x128xf32>
    %cst_231 = arith.constant dense<0.000000e+00> : vector<16x128xf32>
    %600 = tpu.matmul %597, %599, %cst_231 {dimension_numbers = #tpu.dot_dimension_numbers<[1], [0], [0], [1], [0, 0, 1, 1], [], []>} : vector<16x32xf32>, vector<32x128xf32>, vector<16x128xf32> -> vector<16x128xf32>
    %c3_232 = arith.constant 3 : index
    %c0_233 = arith.constant 0 : index
    %601 = vector.load %arg9[%c3_232, %c0_233] : memref<4x128xf32, #tpu.memory_space<vmem>>, vector<1x128xf32>
    %602 = vector.shape_cast %601 : vector<1x128xf32> to vector<128xf32>
    %603 = vector.shape_cast %602 : vector<128xf32> to vector<1x128xf32>
    %604 = vector.broadcast %603 : vector<1x128xf32> to vector<16x128xf32>
    %605 = arith.addf %600, %604 : vector<16x128xf32>
    %cst_234 = arith.constant 0.000000e+00 : f32
    %606 = vector.broadcast %cst_234 : f32 to vector<16x128xf32>
    %607 = arith.maximumf %605, %606 : vector<16x128xf32>
    %c3_235 = arith.constant 3 : index
    %c0_236 = arith.constant 0 : index
    %c0_237 = arith.constant 0 : index
    %608 = vector.load %arg10[%c3_235, %c0_236, %c0_237] : memref<4x128x32xf32, #tpu.memory_space<vmem>>, vector<1x128x32xf32>
    %609 = vector.shape_cast %608 : vector<1x128x32xf32> to vector<128x32xf32>
    %cst_238 = arith.constant dense<0.000000e+00> : vector<16x32xf32>
    %610 = tpu.matmul %607, %609, %cst_238 {dimension_numbers = #tpu.dot_dimension_numbers<[1], [0], [0], [1], [0, 0, 1, 1], [], []>} : vector<16x128xf32>, vector<128x32xf32>, vector<16x32xf32> -> vector<16x32xf32>
    %c3_239 = arith.constant 3 : index
    %c0_240 = arith.constant 0 : index
    %611 = vector.load %arg11[%c3_239, %c0_240] : memref<4x32xf32, #tpu.memory_space<vmem>>, vector<1x32xf32>
    %612 = vector.shape_cast %611 : vector<1x32xf32> to vector<32xf32>
    %613 = vector.shape_cast %612 : vector<32xf32> to vector<1x32xf32>
    %614 = vector.broadcast %613 : vector<1x32xf32> to vector<16x32xf32>
    %615 = arith.addf %610, %614 : vector<16x32xf32>
    %616 = arith.addf %571, %615 : vector<16x32xf32>
    %617 = tpu.concatenate %46, %63, %80, %97, %200, %217, %234, %251, %354, %371, %388, %405, %508, %525, %542, %559 in 2 : vector<2x8x8xf32>, vector<2x8x8xf32>, vector<2x8x8xf32>, vector<2x8x8xf32>, vector<2x8x8xf32>, vector<2x8x8xf32>, vector<2x8x8xf32>, vector<2x8x8xf32>, vector<2x8x8xf32>, vector<2x8x8xf32>, vector<2x8x8xf32>, vector<2x8x8xf32>, vector<2x8x8xf32>, vector<2x8x8xf32>, vector<2x8x8xf32>, vector<2x8x8xf32> -> vector<2x8x128xf32>
    %c0_241 = arith.constant 0 : index
    %c0_242 = arith.constant 0 : index
    %c0_243 = arith.constant 0 : index
    %618 = vector.load %arg19[%c0_241, %c0_242, %c0_243] : memref<2x8x128xf32, #tpu.memory_space<vmem>>, vector<2x8x128xf32>
    tpu.vector_store %arg19[%c0_241, %c0_242, %c0_243], %617 {strides = array<i32>} : memref<2x8x128xf32, #tpu.memory_space<vmem>>, vector<2x8x128xf32>,
    %c0_244 = arith.constant 0 : index
    %c0_245 = arith.constant 0 : index
    %619 = vector.load %arg12[%c0_244, %c0_245] : memref<1x32xf32, #tpu.memory_space<vmem>>, vector<1x32xf32>
    %620 = vector.shape_cast %619 : vector<1x32xf32> to vector<32xf32>
    %c0_246 = arith.constant 0 : index
    %c0_247 = arith.constant 0 : index
    %621 = vector.load %arg13[%c0_246, %c0_247] : memref<1x32xf32, #tpu.memory_space<vmem>>, vector<1x32xf32>
    %622 = vector.shape_cast %621 : vector<1x32xf32> to vector<32xf32>
    %cst_248 = arith.constant dense<0.000000e+00> : vector<16xf32>
    %623 = vector.multi_reduction <add>, %616, %cst_248 [1] : vector<16x32xf32> to vector<16xf32>
    %624 = vector.shape_cast %623 : vector<16xf32> to vector<16x1xf32>
    %cst_249 = arith.constant 3.200000e+01 : f32
    %625 = vector.broadcast %cst_249 : f32 to vector<16x1xf32>
    %626 = arith.divf %624, %625 : vector<16x1xf32>
    %627 = vector.broadcast %626 : vector<16x1xf32> to vector<16x32xf32>
    %628 = arith.subf %616, %627 : vector<16x32xf32>
    %629 = arith.mulf %628, %628 : vector<16x32xf32>
    %cst_250 = arith.constant dense<0.000000e+00> : vector<16xf32>
    %630 = vector.multi_reduction <add>, %629, %cst_250 [1] : vector<16x32xf32> to vector<16xf32>
    %631 = vector.shape_cast %630 : vector<16xf32> to vector<16x1xf32>
    %cst_251 = arith.constant 3.200000e+01 : f32
    %632 = vector.broadcast %cst_251 : f32 to vector<16x1xf32>
    %633 = arith.divf %631, %632 : vector<16x1xf32>
    %cst_252 = arith.constant 9.99999974E-6 : f32
    %634 = vector.broadcast %cst_252 : f32 to vector<16x1xf32>
    %635 = arith.addf %633, %634 : vector<16x1xf32>
    %636 = math.rsqrt %635 : vector<16x1xf32>
    %637 = vector.broadcast %636 : vector<16x1xf32> to vector<16x32xf32>
    %638 = arith.mulf %628, %637 : vector<16x32xf32>
    %639 = vector.shape_cast %620 : vector<32xf32> to vector<1x32xf32>
    %640 = vector.broadcast %639 : vector<1x32xf32> to vector<16x32xf32>
    %641 = arith.mulf %638, %640 : vector<16x32xf32>
    %642 = vector.shape_cast %622 : vector<32xf32> to vector<1x32xf32>
    %643 = vector.broadcast %642 : vector<1x32xf32> to vector<16x32xf32>
    %644 = arith.addf %641, %643 : vector<16x32xf32>
    %645 = vector.shape_cast %644 : vector<16x32xf32> to vector<2x8x32xf32>
    %cst_253 = arith.constant dense<0.000000e+00> : vector<2x32xf32>
    %646 = vector.multi_reduction <add>, %645, %cst_253 [1] : vector<2x8x32xf32> to vector<2x32xf32>
    %cst_254 = arith.constant 8.000000e+00 : f32
    %647 = vector.broadcast %cst_254 : f32 to vector<2x32xf32>
    %648 = arith.divf %646, %647 : vector<2x32xf32>
    %c0_255 = arith.constant 0 : index
    %c0_256 = arith.constant 0 : index
    %649 = vector.load %arg14[%c0_255, %c0_256] : memref<32x32xf32, #tpu.memory_space<vmem>>, vector<32x32xf32>
    %cst_257 = arith.constant dense<0.000000e+00> : vector<2x32xf32>
    %650 = tpu.matmul %648, %649, %cst_257 {dimension_numbers = #tpu.dot_dimension_numbers<[1], [0], [0], [1], [0, 0, 1, 1], [], []>} : vector<2x32xf32>, vector<32x32xf32>, vector<2x32xf32> -> vector<2x32xf32>
    %c0_258 = arith.constant 0 : index
    %c0_259 = arith.constant 0 : index
    %651 = vector.load %arg15[%c0_258, %c0_259] : memref<1x32xf32, #tpu.memory_space<vmem>>, vector<1x32xf32>
    %652 = vector.shape_cast %651 : vector<1x32xf32> to vector<32xf32>
    %653 = vector.shape_cast %652 : vector<32xf32> to vector<1x32xf32>
    %654 = vector.broadcast %653 : vector<1x32xf32> to vector<2x32xf32>
    %655 = arith.addf %650, %654 : vector<2x32xf32>
    %cst_260 = arith.constant 0.000000e+00 : f32
    %656 = vector.broadcast %cst_260 : f32 to vector<2x32xf32>
    %657 = arith.maximumf %655, %656 : vector<2x32xf32>
    %c0_261 = arith.constant 0 : index
    %c0_262 = arith.constant 0 : index
    %658 = vector.load %arg16[%c0_261, %c0_262] : memref<32x4xf32, #tpu.memory_space<vmem>>, vector<32x4xf32>
    %cst_263 = arith.constant dense<0.000000e+00> : vector<2x4xf32>
    %659 = tpu.matmul %657, %658, %cst_263 {dimension_numbers = #tpu.dot_dimension_numbers<[1], [0], [0], [1], [0, 0, 1, 1], [], []>} : vector<2x32xf32>, vector<32x4xf32>, vector<2x4xf32> -> vector<2x4xf32>
    %c0_264 = arith.constant 0 : index
    %c0_265 = arith.constant 0 : index
    %660 = vector.load %arg17[%c0_264, %c0_265] : memref<1x4xf32, #tpu.memory_space<vmem>>, vector<1x4xf32>
    %661 = vector.shape_cast %660 : vector<1x4xf32> to vector<4xf32>
    %662 = vector.shape_cast %661 : vector<4xf32> to vector<1x4xf32>
    %663 = vector.broadcast %662 : vector<1x4xf32> to vector<2x4xf32>
    %664 = arith.addf %659, %663 : vector<2x4xf32>
    %c0_266 = arith.constant 0 : index
    %c0_267 = arith.constant 0 : index
    %665 = vector.load %arg18[%c0_266, %c0_267] : memref<2x4xf32, #tpu.memory_space<vmem>>, vector<2x4xf32>
    tpu.vector_store %arg18[%c0_266, %c0_267], %664 {strides = array<i32>} : memref<2x4xf32, #tpu.memory_space<vmem>>, vector<2x4xf32>,
    return
  }
}

</mosaic_0001>

<bundles_post_ra>
// kernel: encoder_forward.1
= control target key start
LH: loop header
LB: loop body
LE: loop exit
PB: predicated region body
PF: predicated region fallthrough
CT: control target
= control target key end

     0   :  { %s10699_s0 = inlined_call_operand.vmem [shape: f32[16,32], index: 0, kind: input, shape index: {}]   ;;  %s10700_s1 = inlined_call_operand.vmem [shape: f32[4,32], index: 1, kind: input, shape index: {}, may-alias: {1,6}]   ;;  %s10701_s2 = inlined_call_operand.vmem [shape: f32[4,32], index: 2, kind: input, shape index: {}, may-alias: {2,5,7,11}]   ;;  %s10702_s3 = inlined_call_operand.hbm [shape: f32[4,32,96], index: 3, kind: input, shape index: {}]   ;;  %s10703_s4 = inlined_call_operand.hbm [shape: f32[4,32,32], index: 4, kind: input, shape index: {}]   ;;  %s10704_s5 = inlined_call_operand.vmem [shape: f32[4,32], index: 5, kind: input, shape index: {}, may-alias: {2,5,7,11}]   ;;  %s10705_s6 = inlined_call_operand.vmem [shape: f32[4,32], index: 6, kind: input, shape index: {}, may-alias: {1,6}]   ;;  %s10706_s7 = inlined_call_operand.vmem [shape: f32[4,32], index: 7, kind: input, shape index: {}, may-alias: {2,5,7,11}]   ;;  %s10707_s8 = inlined_call_operand.vmem [shape: f32[4,32,128], index: 8, kind: input, shape index: {}]   ;;  %s10708_s9 = inlined_call_operand.vmem [shape: f32[4,128], index: 9, kind: input, shape index: {}]   ;;  %s10709_s10 = inlined_call_operand.hbm [shape: f32[4,128,32], index: 10, kind: input, shape index: {}]   ;;  %s10710_s11 = inlined_call_operand.vmem [shape: f32[4,32], index: 11, kind: input, shape index: {}, may-alias: {2,5,7,11}]   ;;  %s10711_s12 = inlined_call_operand.vmem [shape: f32[1,32], index: 12, kind: input, shape index: {}]   ;;  %s10712_s13 = inlined_call_operand.vmem [shape: f32[1,32], index: 13, kind: input, shape index: {}, may-alias: {13,15}]   ;;  %s10713_s14 = inlined_call_operand.vmem [shape: f32[32,32], index: 14, kind: input, shape index: {}]   ;;  %s10714_s15 = inlined_call_operand.vmem [shape: f32[1,32], index: 15, kind: input, shape index: {}, may-alias: {13,15}]   ;;  %s10715_s16 = inlined_call_operand.vmem [shape: f32[32,4], index: 16, kind: input, shape index: {}]   ;;  %s10716_s17 = inlined_call_operand.vmem [shape: f32[1,4], index: 17, kind: input, shape index: {}]   ;;  %s10717_s18 = inlined_call_operand.hbm [shape: f32[2,4], index: 18, kind: output, shape index: {0}]   ;;  %s10718_s19 = inlined_call_operand.vmem [shape: f32[2,8,128], index: 19, kind: output, shape index: {1}]  }
   0x1   :  { %10754 = sst [smem:[#allocation12_spill]] %s10699_s0 }
   0x2   :  { %10755 = sst [smem:[#allocation13_spill]] %s10700_s1 }
   0x3   :  { %10756 = sst [smem:[#allocation14_spill]] %s10701_s2 }
   0x4   :  { %10757 = sst [smem:[#allocation15_spill]] %s10702_s3 }
   0x5   :  { %10758 = sst [smem:[#allocation16_spill]] %s10711_s12 }
   0x6   :  { %10759 = sst [smem:[#allocation17_spill]] %s10712_s13 }
   0x7   :  { %10760 = sst [smem:[#allocation18_spill]] %s10714_s15 }
   0x8   :  { %10761 = sst [smem:[#allocation19_spill]] %s10715_s16 }
   0x9   :  { %10762 = sst [smem:[#allocation20_spill]] %s10716_s17 }
   0xa   :  { %10763 = sst [smem:[#allocation21_spill]] %s10717_s18 }
   0xb   :  { %10764 = sst [smem:[#allocation22_spill]] %s10718_s19 }
   0xc   :  { %25 = vsyncpa [#allocation3], 0 }
   0xd   :  { %26 = vsyncpa [#allocation6], 0 }
   0xe   :  { %27 = vsyncpa [#allocation4], 0  ;;  %s9301_s0 = smov [#allocation5]   ;;  %s9302_s20 = smov [#allocation2]  }
   0xf   :  { %s51_s30 = sshll.u32 %s9301_s0, 4  ;;  %s39_s21 = sshll.u32 %s9302_s20, 4  ;;  %s52_s30 = int_to_ptr.vmem [resolvable:$true] %s51_s30  ;;  %s9424_s21 = int_to_ptr.vmem [resolvable:$true] %s39_s21 }
  0x10   :  { %s9207_s2 = scalar_lea.hbm %s10703_s4, 2048 }
  0x11   :  { %p9208_p0 = scmp.ne.s32.totalorder %s10703_s4, %s9207_s2  ;;  %p9211_p1 = scmp.lt.u32.totalorder %s9207_s2, %s10703_s4 }
  0x13   :  { %p9213_p2 = pnand %p9211_p1, %p9208_p0 }
  0x15   :  { %9216 = shalt.err (!%p9213_p2)
}
  0x16   :  { %s9217_s26 = scalar_lea.vmem %s52_s30, 2048  ;;  %p9222_p4 = scmp.lt.s32.totalorder %s52_s30, %s52_s30 }
  0x17   :  { %p9218_p3 = scmp.ne.s32.totalorder %s52_s30, %s9217_s26  ;;  %p9223_p5 = scmp.lt.s32.totalorder %s9217_s26, %s9217_s26 }
  0x19   :  { %p9224_p6 = por %p9223_p5, %p9222_p4 }
  0x1b   :  { %p9225_p7 = pnand %p9224_p6, %p9218_p3 }
  0x1d   :  { %9228 = shalt.err (!%p9225_p7)
}
  0x1e   :  { %s9303_s27 = smov 128   ;;  %s10727_s28 = smov 8  }
  0x1f   :  { %57 = dma.hbm_to_vmem [thread:$0]  %s10703_s4, 2048, %s52_s30, [#allocation6], %s9303_s27, %s9303_s27, %s10727_s28  }
  0x20   :  { %s10765_s22 = sld [smem:[#allocation15_spill]] }
  0x26   :  { %s9229_s2 = scalar_lea.hbm %s10765_s22, 2048 }
  0x27   :  { %p9230_p8 = scmp.ne.s32.totalorder %s10765_s22, %s9229_s2  ;;  %p9233_p9 = scmp.lt.u32.totalorder %s9229_s2, %s10765_s22 }
  0x29   :  { %p9235_p10 = pnand %p9233_p9, %p9230_p8 }
  0x2b   :  { %9238 = shalt.err (!%p9235_p10)
}
  0x2c   :  { %s9239_s26 = scalar_lea.vmem %s9424_s21, 2048  ;;  %p9244_p12 = scmp.lt.s32.totalorder %s9424_s21, %s9424_s21 }
  0x2d   :  { %p9240_p11 = scmp.ne.s32.totalorder %s9424_s21, %s9239_s26  ;;  %p9245_p13 = scmp.lt.s32.totalorder %s9239_s26, %s9239_s26 }
  0x2f   :  { %p9246_p0 = por %p9245_p13, %p9244_p12 }
  0x31   :  { %p9247_p1 = pnand %p9246_p0, %p9240_p11 }
  0x33   :  { %9250 = shalt.err (!%p9247_p1)
}
  0x34   :  { %45 = dma.hbm_to_vmem [thread:$0]  %s10765_s22, 2048, %s9424_s21, [#allocation3], %s9303_s27, %s9303_s27, %s10727_s28  }
  0x35   :  { %s9305_s29 = smov [#allocation7]   ;;  %s9251_s2 = scalar_lea.hbm %s10709_s10, 8192 }
  0x36   :  { %s73_s0 = sshll.u32 %s9305_s29, 4  ;;  %p9252_p2 = scmp.ne.s32.totalorder %s10709_s10, %s9251_s2  ;;  %s74_s0 = int_to_ptr.vmem [resolvable:$true] %s73_s0 }
  0x37   :  { %p9255_p3 = scmp.lt.u32.totalorder %s9251_s2, %s10709_s10 }
  0x39   :  { %p9257_p4 = pnand %p9255_p3, %p9252_p2 }
  0x3b   :  { %9260 = shalt.err (!%p9257_p4)
}
  0x3c   :  { %s9261_s26 = scalar_lea.vmem %s74_s0, 8192  ;;  %p9266_p6 = scmp.lt.s32.totalorder %s74_s0, %s74_s0 }
  0x3d   :  { %p9262_p5 = scmp.ne.s32.totalorder %s74_s0, %s9261_s26  ;;  %p9267_p7 = scmp.lt.s32.totalorder %s9261_s26, %s9261_s26 }
  0x3f   :  { %p9268_p8 = por %p9267_p7, %p9266_p6 }
  0x41   :  { %p9269_p9 = pnand %p9268_p8, %p9262_p5 }
  0x43   :  { %9272 = shalt.err (!%p9269_p9)
}
  0x44   :  { %79 = dma.hbm_to_vmem [thread:$0]  %s10709_s10, 8192, %s74_s0, [#allocation6], %s9303_s27, %s9303_s27, %s10727_s28  }
  0x45   :  { %9295 = dma.done.wait [#allocation3], 2048  }
  0x46   :  { %9296 = vsyncadd [#allocation3], 4294965248 }
  0x47   :  { %9297 = dma.done.wait [#allocation6], 10240  }
  0x48   :  { %9298 = vsyncadd [#allocation6], 4294957056  ;;  %vm107_vm0 = vcmask 261120   ;;  %s10766_s29 = sld [smem:[#allocation12_spill]]  ;;  %v147_v14 = vld [vmem:[#allocation2] sm:$0xff]  ;;  %v148_v15 = vld [vmem:[#allocation2 + $0x8] sm:$0xff] }
  0x49   :  { %v149_v16 = vld [vmem:[#allocation2 + $0x10] sm:$0xff]  ;;  %v8784_v17 = vpack.c.bf16 %v148_v15, %v147_v14  ;;  %v150_v18 = vld [vmem:[#allocation2 + $0x18] sm:$0xff]  ;;  %s10767_s0 = sld [smem:[#allocation13_spill]]  ;;  %s10768_s24 = sld [smem:[#allocation14_spill]]  ;;  %v9306_v36 = vmov 0.0   ;;  %vm9307_vm1 = vmmov 0  }
  0x4a   :  { %v8788_v19 = vpack.c.bf16 %v150_v18, %v149_v16  ;;  %8191 = vmatprep.subr.mxu0 %v9306_v36  ;;  %8193 = vmatprep.mubr.msk.f32.mxu0 %vm9307_vm1, %v9306_v36  ;;  %s10749_s25 = smov 96   ;;  %vm235_vm2 = vcmask 64512   ;;  %s10747_s3 = smov 64   ;;  %vm1588_vm3 = vcmask 195584   ;;  %vm1585_vm4 = vcmask 130048  }
  0x4b   :  { %8785 = vmatprep.subr.bf16.mxu1 %v8784_v17  ;;  %s10745_s26 = smov 88   ;;  %s10743_s21 = smov 120   ;;  %vm7541_vm5 = vcmask 1041409   ;;  %vm7432_vm6 = vcmask 326656   ;;  %vm7435_vm7 = vcmask 392192   ;;  %vm7438_vm8 = vcmask 457728  }
  0x4c   :  { %8787 = vmatpush3.bf16.msra.mxu1 %v8784_v17  ;;  %s10741_s22 = smov 56   ;;  %s10739_s4 = smov 80   ;;  %vm7441_vm9 = vcmask 523264   ;;  %vm7444_vm10 = vcmask 588800   ;;  %vm7447_vm11 = vcmask 654336   ;;  %vm7450_vm12 = vcmask 719872  }
  0x4d   :  { %8789 = vmatprep.subr.bf16.mxu1 %v8788_v19  ;;  %s10737_s30 = smov 112   ;;  %s10733_s20 = smov 72   ;;  %vm7453_vm13 = vcmask 785408   ;;  %vm7456_vm14 = vcmask 850944   ;;  %vm7459_vm15 = vcmask 916480  }
  0x4e   :  { %v9479_v0 = vld [vmem:[%s10766_s29] sm:$0xff]  ;;  %v9484_v1 = vld [vmem:[%s10766_s29 + $0x8] sm:$0xff]  ;;  %s10735_s29 = smov 48   ;;  %s10731_s1 = smov 104  }
  0x4f   :  { %v108_v2 = vsel %vm107_vm0, %v9479_v0, 0.0  ;;  %v111_v3 = vsel %vm107_vm0, %v9484_v1, 0.0  ;;  %v7722_v27 = vld [vmem:[%s10767_s0] ss:$0 sm:$0xff]  ;;  %s10729_s10 = smov 40   ;;  %s10725_s27 = smov 16  }
  0x50   :  { %109 = vadd.xlane.f32.xlu0 %v108_v2  ;;  %8791 = vmatpush3.bf16.msra.mxu1 %v8788_v19  ;;  %v7723_v29 = vld [vmem:[%s10768_s24] ss:$0 sm:$0xff]  ;;  %s10723_s2 = smov 24   ;;  %s10772_s23 = smov 40  }
  0x51   :  { %8181 = vmatprep.subr.mxu1 %v9306_v36  ;;  %s10786_s15 = sld [smem:[#allocation22_spill]] }
  0x54   :  { %112 = vadd.xlane.f32.xlu0 %v111_v3 }
  0xdd   :  { %v110_v4 = vpop.xlane.xlu0 %109 }
  0xde   :  { %v115_v5 = vmul.f32 0.03125, %v110_v4 }
  0xe0   :  { %v117_v6 = vsub.f32 %v9479_v0, %v115_v5 }
  0xe1   :  { %v113_v7 = vpop.xlane.xlu0 %112 }
  0xe2   :  { %v116_v8 = vmul.f32 0.03125, %v113_v7  ;;  %v119_v9 = vmul.f32 %v117_v6, %v117_v6 }
  0xe4   :  { %v118_v10 = vsub.f32 %v9484_v1, %v116_v8  ;;  %v121_v11 = vsel %vm107_vm0, %v119_v9, 0.0 }
  0xe5   :  { %122 = vadd.xlane.f32.xlu1 %v121_v11 }
  0xe6   :  { %v120_v12 = vmul.f32 %v118_v10, %v118_v10 }
  0xe8   :  { %v124_v13 = vsel %vm107_vm0, %v120_v12, 0.0 }
  0xe9   :  { %125 = vadd.xlane.f32.xlu1 %v124_v13 }
 0x172   :  { %v123_v20 = vpop.xlane.xlu1 %122 }
 0x173   :  { %v127_v21 = vmul.f32 0.03125, %v123_v20 }
 0x175   :  { %v129_v22 = vadd.f32 1e-05, %v127_v21 }
 0x176   :  { %v126_v23 = vpop.xlane.xlu1 %125 }
 0x177   :  { %9043 = vrsqrt.f32 %v129_v22  ;;  %v128_v24 = vmul.f32 0.03125, %v126_v23 }
 0x179   :  { %v130_v25 = vadd.f32 1e-05, %v128_v24 }
 0x17b   :  { %9045 = vrsqrt.f32 %v130_v25 }
 0x181   :  { %v9044_v26 = vpop.eup %9043 }
 0x182   :  { %v133_v28 = vmul.f32 %v9044_v26, %v117_v6 }
 0x184   :  { %v139_v30 = vmul.f32 %v7722_v27, %v133_v28 }
 0x185   :  { %v9046_v31 = vpop.eup %9045 }
 0x186   :  { %v134_v32 = vmul.f32 %v9046_v31, %v118_v10  ;;  %v145_v33 = vadd.f32 %v7723_v29, %v139_v30 }
 0x188   :  { %v140_v34 = vmul.f32 %v7722_v27, %v134_v32  ;;  %8178 = vmatprep.mubr.msk.f32.mxu1 %vm107_vm0, %v145_v33 }
 0x18a   :  { %v146_v35 = vadd.f32 %v7723_v29, %v140_v34 }
 0x18c   :  { %8179 = vmatmul.mubr.msk.f32.vlgmr.msra.gmra.mrb[0].mxu1 %vm107_vm0, %v146_v35 }
 0x18d   :  { %8183 = vmatprep.mubr.msk.f32.mxu1 %vm9307_vm1, %v9306_v36 }
 0x25f   :  { %v9508_v37 = vpop.f32.mrb[0].mxu1 }
 0x260   :  { %311 = vrot.lane.b32.xlu1 %v9508_v37, %s10749_s25  ;;  %v9512_v38 = vpop.f32.mrb[1].mxu1 }
 0x261   :  { %233 = vrot.lane.b32.xlu0 %v9512_v38, %s10749_s25 }
 0x2d2   :  { %v312_v40 = vpop.permute.xlu1 %311 }
 0x2d3   :  { %v234_v39 = vpop.permute.xlu0 %233 }
 0x2d4   :  { %8182 = vmatpush3.xpose.msk.msra.mxu1 %vm235_vm2, %v234_v39 }
 0x2d5   :  { %8186 = vmatprep.subr.mxu1 %v9306_v36 }
 0x2d7   :  { %8184 = vmatmul.mubr.msk.f32.vlgmr.msra.gmra.mrb[2].mxu1 %vm235_vm2, %v9512_v38 }
 0x2d8   :  { %8187 = vmatpush3.xpose.msk.msra.mxu1 %vm235_vm2, %v312_v40  ;;  %8188 = vmatprep.mubr.msk.f32.mxu1 %vm9307_vm1, %v9306_v36 }
 0x2d9   :  { %8196 = vmatprep.subr.mxu1 %v9306_v36 }
 0x2db   :  { %8189 = vmatmul.mubr.msk.f32.vlgmr.msra.gmra.mrb[4].mxu1 %vm235_vm2, %v9508_v37 }
 0x2dc   :  { %8198 = vmatprep.mubr.msk.f32.mxu1 %vm9307_vm1, %v9306_v36 }
 0x3aa   :  { %v306_v41 = vpop.f32.mrb[2].mxu1 }
 0x3ab   :  { %v387_v42 = vmul.f32 0.35355338, %v306_v41  ;;  %v8185_v43 = vpop.f32.mrb[3].mxu1 }
 0x3ad   :  { %v389_v44 = vsel %vm235_vm2, %v387_v42, -inf }
 0x3ae   :  { %390 = vmax.xlane.f32.xlu1 %v389_v44  ;;  %v383_v45 = vpop.f32.mrb[4].mxu1 }
 0x3af   :  { %v388_v46 = vmul.f32 0.35355338, %v383_v45  ;;  %v8190_v47 = vpop.f32.mrb[5].mxu1 }
 0x3b1   :  { %v392_v48 = vsel %vm235_vm2, %v388_v46, -inf }
 0x3b2   :  { %393 = vmax.xlane.f32.xlu0 %v392_v48 }
 0x3bf   :  { %487 = vrot.lane.b32.xlu1 %v9508_v37, %s10747_s3 }
 0x3c3   :  { %565 = vrot.lane.b32.xlu1 %v9512_v38, %s10745_s26 }
 0x3c7   :  { %643 = vrot.lane.b32.xlu1 %v9508_v37, %s10745_s26 }
 0x3c8   :  { %411 = vrot.lane.b32.xlu0 %v9512_v38, %s10747_s3 }
 0x43b   :  { %v391_v49 = vpop.xlane.xlu1 %390 }
 0x43c   :  { %v395_v50 = vsub.f32 %v387_v42, %v391_v49 }
 0x43e   :  { %v397_v51 = vmul.f32 1.442695, %v395_v50 }
 0x43f   :  { %v488_v52 = vpop.permute.xlu1 %487  ;;  %v394_v53 = vpop.xlane.xlu0 %393 }
 0x440   :  { %9047 = vpow2.f32 %v397_v51  ;;  %v396_v54 = vsub.f32 %v388_v46, %v394_v53  ;;  %8197 = vmatpush3.msra.mxu1 %v488_v52 }
 0x441   :  { %8206 = vmatprep.subr.mxu1 %v9306_v36 }
 0x442   :  { %v399_v55 = vmul.f32 1.442695, %v396_v54 }
 0x443   :  { %v412_v56 = vpop.permute.xlu0 %411  ;;  %v566_v61 = vpop.permute.xlu1 %565 }
 0x444   :  { %9049 = vpow2.f32 %v399_v55  ;;  %8192 = vmatpush3.msra.mxu0 %v412_v56 }
 0x445   :  { %8201 = vmatprep.subr.mxu0 %v9306_v36 }
 0x447   :  { %v644_v62 = vpop.permute.xlu1 %643 }
 0x44a   :  { %v9048_v57 = vpop.eup %9047 }
 0x44b   :  { %v401_v58 = vsel %vm235_vm2, %v9048_v57, 0.0 }
 0x44c   :  { %402 = vadd.xlane.f32.xlu0 %v401_v58 }
 0x44e   :  { %v9050_v59 = vpop.eup %9049 }
 0x44f   :  { %v404_v60 = vsel %vm235_vm2, %v9050_v59, 0.0 }
 0x450   :  { %405 = vadd.xlane.f32.xlu1 %v404_v60 }
 0x461   :  { %641 = vrot.lane.b32.xlu1 %v9508_v37, %s10743_s21 }
 0x462   :  { %563 = vrot.lane.b32.xlu0 %v9512_v38, %s10743_s21 }
 0x4d9   :  { %v403_v63 = vpop.xlane.xlu0 %402 }
 0x4da   :  { %9051 = vrcp.f32 %v403_v63 }
 0x4dd   :  { %v406_v2 = vpop.xlane.xlu1 %405  ;;  %v564_v7 = vpop.permute.xlu0 %563 }
 0x4de   :  { %9053 = vrcp.f32 %v406_v2 }
 0x4e1   :  { %v642_v8 = vpop.permute.xlu1 %641 }
 0x4e4   :  { %v9052_v3 = vpop.eup %9051 }
 0x4e5   :  { %v9546_v4 = vmul.f32 %v9052_v3, %v9048_v57 }
 0x4e7   :  { %8194 = vmatmul.mubr.msk.f32.vlgmr.msra.gmra.mrb[0].mxu0 %vm235_vm2, %v9546_v4 }
 0x4e8   :  { %v9054_v5 = vpop.eup %9053  ;;  %8202 = vmatpush3.xpose.msk.msra.mxu0 %vm235_vm2, %v566_v61  ;;  %8203 = vmatprep.mubr.msk.f32.mxu0 %vm9307_vm1, %v9306_v36 }
 0x4e9   :  { %v9553_v6 = vmul.f32 %v9054_v5, %v9050_v59  ;;  %8211 = vmatprep.subr.mxu0 %v9306_v36 }
 0x4eb   :  { %8199 = vmatmul.mubr.msk.f32.vlgmr.msra.gmra.mrb[6].mxu1 %vm235_vm2, %v9553_v6  ;;  %8204 = vmatmul.mubr.msk.f32.vlgmr.msra.gmra.mrb[2].mxu0 %vm235_vm2, %v564_v7 }
 0x4ec   :  { %8207 = vmatpush3.xpose.msk.msra.mxu1 %vm235_vm2, %v644_v62  ;;  %8208 = vmatprep.mubr.msk.f32.mxu1 %vm9307_vm1, %v9306_v36 }
 0x4ed   :  { %8216 = vmatprep.subr.mxu1 %v9306_v36  ;;  %8213 = vmatprep.mubr.msk.f32.mxu0 %vm9307_vm1, %v9306_v36 }
 0x4ef   :  { %8209 = vmatmul.mubr.msk.f32.vlgmr.msra.gmra.mrb[8].mxu1 %vm235_vm2, %v642_v8 }
 0x4f0   :  { %8218 = vmatprep.mubr.msk.f32.mxu1 %vm9307_vm1, %v9306_v36 }
 0x5ba   :  { %v9568_v9 = vpop.f32.mrb[0].mxu0 }
 0x5bb   :  { %v8195_v10 = vpop.f32.mrb[1].mxu0 }
 0x5be   :  { %v9570_v11 = vpop.f32.mrb[6].mxu1  ;;  %v637_v12 = vpop.f32.mrb[2].mxu0 }
 0x5bf   :  { %v719_v13 = vmul.f32 0.35355338, %v637_v12  ;;  %v8200_v14 = vpop.f32.mrb[7].mxu1  ;;  %v8205_v15 = vpop.f32.mrb[3].mxu0 }
 0x5c1   :  { %v721_v16 = vsel %vm235_vm2, %v719_v13, -inf }
 0x5c2   :  { %722 = vmax.xlane.f32.xlu0 %v721_v16  ;;  %v715_v17 = vpop.f32.mrb[8].mxu1 }
 0x5c3   :  { %v720_v18 = vmul.f32 0.35355338, %v715_v17  ;;  %v8210_v19 = vpop.f32.mrb[9].mxu1 }
 0x5c5   :  { %v724_v20 = vsel %vm235_vm2, %v720_v18, -inf }
 0x5c6   :  { %725 = vmax.xlane.f32.xlu1 %v724_v20 }
 0x5d7   :  { %819 = vrot.lane.b32.xlu1 %v9508_v37, %s10741_s22 }
 0x5d8   :  { %743 = vrot.lane.b32.xlu0 %v9512_v38, %s10741_s22 }
 0x5db   :  { %897 = vrot.lane.b32.xlu1 %v9512_v38, %s10739_s4 }
 0x5df   :  { %975 = vrot.lane.b32.xlu1 %v9508_v37, %s10739_s4 }
 0x5e3   :  { %973 = vrot.lane.b32.xlu1 %v9508_v37, %s10737_s30 }
 0x64f   :  { %v723_v21 = vpop.xlane.xlu0 %722 }
 0x650   :  { %v727_v22 = vsub.f32 %v719_v13, %v723_v21 }
 0x652   :  { %v729_v23 = vmul.f32 1.442695, %v727_v22 }
 0x653   :  { %v744_v24 = vpop.permute.xlu0 %743  ;;  %v726_v25 = vpop.xlane.xlu1 %725 }
 0x654   :  { %9055 = vpow2.f32 %v729_v23  ;;  %v728_v26 = vsub.f32 %v720_v18, %v726_v25  ;;  %8212 = vmatpush3.msra.mxu0 %v744_v24 }
 0x655   :  { %8221 = vmatprep.subr.mxu0 %v9306_v36 }
 0x656   :  { %v731_v27 = vmul.f32 1.442695, %v728_v26 }
 0x657   :  { %v820_v28 = vpop.permute.xlu1 %819 }
 0x658   :  { %9057 = vpow2.f32 %v731_v27  ;;  %8217 = vmatpush3.msra.mxu1 %v820_v28 }
 0x659   :  { %8226 = vmatprep.subr.mxu1 %v9306_v36 }
 0x65b   :  { %v898_v35 = vpop.permute.xlu1 %897 }
 0x65e   :  { %v9056_v29 = vpop.eup %9055 }
 0x65f   :  { %v733_v30 = vsel %vm235_vm2, %v9056_v29, 0.0  ;;  %v976_v42 = vpop.permute.xlu1 %975 }
 0x660   :  { %734 = vadd.xlane.f32.xlu0 %v733_v30 }
 0x662   :  { %v9058_v31 = vpop.eup %9057 }
 0x663   :  { %v736_v32 = vsel %vm235_vm2, %v9058_v31, 0.0  ;;  %v974_v45 = vpop.permute.xlu1 %973 }
 0x664   :  { %737 = vadd.xlane.f32.xlu0 %v736_v32 }
 0x67a   :  { %895 = vrot.lane.b32.xlu0 %v9512_v38, %s10737_s30 }
 0x6ed   :  { %v735_v33 = vpop.xlane.xlu0 %734 }
 0x6ee   :  { %9059 = vrcp.f32 %v735_v33 }
 0x6f1   :  { %v738_v34 = vpop.xlane.xlu0 %737 }
 0x6f2   :  { %9061 = vrcp.f32 %v738_v34 }
 0x6f5   :  { %v896_v44 = vpop.permute.xlu0 %895 }
 0x6f8   :  { %v9060_v39 = vpop.eup %9059 }
 0x6f9   :  { %v9590_v40 = vmul.f32 %v9060_v39, %v9056_v29 }
 0x6fb   :  { %8214 = vmatmul.mubr.msk.f32.vlgmr.msra.gmra.mrb[4].mxu0 %vm235_vm2, %v9590_v40 }
 0x6fc   :  { %v9062_v41 = vpop.eup %9061  ;;  %8222 = vmatpush3.xpose.msk.msra.mxu0 %vm235_vm2, %v898_v35  ;;  %8223 = vmatprep.mubr.msk.f32.mxu0 %vm9307_vm1, %v9306_v36 }
 0x6fd   :  { %v9597_v43 = vmul.f32 %v9062_v41, %v9058_v31  ;;  %8231 = vmatprep.subr.mxu0 %v9306_v36 }
 0x6ff   :  { %8219 = vmatmul.mubr.msk.f32.vlgmr.msra.gmra.mrb[10].mxu1 %vm235_vm2, %v9597_v43  ;;  %8224 = vmatmul.mubr.msk.f32.vlgmr.msra.gmra.mrb[6].mxu0 %vm235_vm2, %v896_v44 }
 0x700   :  { %8227 = vmatpush3.xpose.msk.msra.mxu1 %vm235_vm2, %v976_v42  ;;  %8228 = vmatprep.mubr.msk.f32.mxu1 %vm9307_vm1, %v9306_v36 }
 0x701   :  { %8236 = vmatprep.subr.mxu1 %v9306_v36  ;;  %8233 = vmatprep.mubr.msk.f32.mxu0 %vm9307_vm1, %v9306_v36 }
 0x703   :  { %8229 = vmatmul.mubr.msk.f32.vlgmr.msra.gmra.mrb[12].mxu1 %vm235_vm2, %v974_v45 }
 0x704   :  { %8238 = vmatprep.mubr.msk.f32.mxu1 %vm9307_vm1, %v9306_v36 }
 0x7ce   :  { %v9612_v46 = vpop.f32.mrb[4].mxu0 }
 0x7cf   :  { %v8215_v47 = vpop.f32.mrb[5].mxu0 }
 0x7d2   :  { %v9614_v48 = vpop.f32.mrb[10].mxu1  ;;  %v969_v49 = vpop.f32.mrb[6].mxu0 }
 0x7d3   :  { %v1051_v50 = vmul.f32 0.35355338, %v969_v49  ;;  %v8220_v51 = vpop.f32.mrb[11].mxu1  ;;  %v8225_v52 = vpop.f32.mrb[7].mxu0 }
 0x7d5   :  { %v1053_v53 = vsel %vm235_vm2, %v1051_v50, -inf }
 0x7d6   :  { %1054 = vmax.xlane.f32.xlu0 %v1053_v53  ;;  %v1047_v54 = vpop.f32.mrb[12].mxu1 }
 0x7d7   :  { %v1052_v55 = vmul.f32 0.35355338, %v1047_v54  ;;  %v8230_v56 = vpop.f32.mrb[13].mxu1 }
 0x7d8   :  { %v1592_v56 = vld [vmem:[#allocation5 + $0x8] sm:$0xff] }
 0x7d9   :  { %v1056_v57 = vsel %vm235_vm2, %v1052_v55, -inf }
 0x7da   :  { %1057 = vmax.xlane.f32.xlu1 %v1056_v57 }
 0x7eb   :  { %1151 = vrot.lane.b32.xlu1 %v9508_v37, %s10735_s29 }
 0x7ec   :  { %1075 = vrot.lane.b32.xlu0 %v9512_v38, %s10735_s29  ;;  %s10774_s29 = smov 16  }
 0x7ef   :  { %1229 = vrot.lane.b32.xlu1 %v9512_v38, %s10733_s20 }
 0x7f3   :  { %1307 = vrot.lane.b32.xlu1 %v9508_v37, %s10733_s20  ;;  %s10775_s20 = smov 24  }
 0x7f7   :  { %1305 = vrot.lane.b32.xlu1 %v9508_v37, %s10731_s1 }
 0x863   :  { %v1055_v58 = vpop.xlane.xlu0 %1054 }
 0x864   :  { %v1059_v59 = vsub.f32 %v1051_v50, %v1055_v58  ;;  %v1593_v58 = vld [vmem:[#allocation5 + $0x10] sm:$0xff] }
 0x866   :  { %v1061_v60 = vmul.f32 1.442695, %v1059_v59  ;;  %v1594_v59 = vld [vmem:[#allocation5 + $0x18] sm:$0xff] }
 0x867   :  { %v1076_v61 = vpop.permute.xlu0 %1075  ;;  %v1058_v62 = vpop.xlane.xlu1 %1057 }
 0x868   :  { %9063 = vpow2.f32 %v1061_v60  ;;  %v1060_v63 = vsub.f32 %v1052_v55, %v1058_v62  ;;  %8232 = vmatpush3.msra.mxu0 %v1076_v61  ;;  %v8796_v60 = vpack.c.bf16 %v1594_v59, %v1593_v58  ;;  %v1823_v59 = vld [vmem:[#allocation7 + $0x40] sm:$0xff] }
 0x869   :  { %8241 = vmatprep.subr.mxu0 %v9306_v36 }
 0x86a   :  { %v1063_v2 = vmul.f32 1.442695, %v1060_v63 }
 0x86b   :  { %v1152_v3 = vpop.permute.xlu1 %1151 }
 0x86c   :  { %9065 = vpow2.f32 %v1063_v2  ;;  %8237 = vmatpush3.msra.mxu1 %v1152_v3 }
 0x86d   :  { %8246 = vmatprep.subr.mxu1 %v9306_v36 }
 0x86f   :  { %v1230_v14 = vpop.permute.xlu1 %1229 }
 0x872   :  { %v9064_v5 = vpop.eup %9063 }
 0x873   :  { %v1065_v7 = vsel %vm235_vm2, %v9064_v5, 0.0  ;;  %v1308_v18 = vpop.permute.xlu1 %1307 }
 0x874   :  { %1066 = vadd.xlane.f32.xlu0 %v1065_v7 }
 0x876   :  { %v9066_v8 = vpop.eup %9065 }
 0x877   :  { %v1068_v10 = vsel %vm235_vm2, %v9066_v8, 0.0  ;;  %v1306_v21 = vpop.permute.xlu1 %1305 }
 0x878   :  { %1069 = vadd.xlane.f32.xlu0 %v1068_v10 }
 0x88e   :  { %1227 = vrot.lane.b32.xlu0 %v9512_v38, %s10731_s1  ;;  %s10779_s1 = smov 120  }
 0x901   :  { %v1067_v12 = vpop.xlane.xlu0 %1066 }
 0x902   :  { %9067 = vrcp.f32 %v1067_v12 }
 0x905   :  { %v1070_v13 = vpop.xlane.xlu0 %1069 }
 0x906   :  { %9069 = vrcp.f32 %v1070_v13 }
 0x909   :  { %v1228_v20 = vpop.permute.xlu0 %1227 }
 0x90c   :  { %v9068_v15 = vpop.eup %9067 }
 0x90d   :  { %v9634_v16 = vmul.f32 %v9068_v15, %v9064_v5 }
 0x90f   :  { %8234 = vmatmul.mubr.msk.f32.vlgmr.msra.gmra.mrb[8].mxu0 %vm235_vm2, %v9634_v16 }
 0x910   :  { %v9070_v17 = vpop.eup %9069  ;;  %8242 = vmatpush3.xpose.msk.msra.mxu0 %vm235_vm2, %v1230_v14  ;;  %8243 = vmatprep.mubr.msk.f32.mxu0 %vm9307_vm1, %v9306_v36 }
 0x911   :  { %v9641_v19 = vmul.f32 %v9070_v17, %v9066_v8  ;;  %8251 = vmatprep.subr.mxu0 %v9306_v36 }
 0x913   :  { %8239 = vmatmul.mubr.msk.f32.vlgmr.msra.gmra.mrb[14].mxu1 %vm235_vm2, %v9641_v19  ;;  %8244 = vmatmul.mubr.msk.f32.vlgmr.msra.gmra.mrb[10].mxu0 %vm235_vm2, %v1228_v20 }
 0x914   :  { %8247 = vmatpush3.xpose.msk.msra.mxu1 %vm235_vm2, %v1308_v18  ;;  %8248 = vmatprep.mubr.msk.f32.mxu1 %vm9307_vm1, %v9306_v36 }
 0x915   :  { %8256 = vmatprep.subr.mxu1 %v9306_v36  ;;  %8253 = vmatprep.mubr.msk.f32.mxu0 %vm9307_vm1, %v9306_v36 }
 0x917   :  { %8249 = vmatmul.mubr.msk.f32.vlgmr.msra.gmra.mrb[16].mxu1 %vm235_vm2, %v1306_v21 }
 0x918   :  { %8258 = vmatprep.mubr.msk.f32.mxu1 %vm9307_vm1, %v9306_v36 }
 0x9e2   :  { %v1147_v22 = vpop.f32.mrb[8].mxu0 }
 0x9e3   :  { %v8235_v23 = vpop.f32.mrb[9].mxu0 }
 0x9e6   :  { %v1223_v24 = vpop.f32.mrb[14].mxu1  ;;  %v1301_v25 = vpop.f32.mrb[10].mxu0 }
 0x9e7   :  { %v1383_v26 = vmul.f32 0.35355338, %v1301_v25  ;;  %v8240_v27 = vpop.f32.mrb[15].mxu1  ;;  %v8245_v28 = vpop.f32.mrb[11].mxu0 }
 0x9e9   :  { %v1385_v29 = vsel %vm235_vm2, %v1383_v26, -inf }
 0x9ea   :  { %1386 = vmax.xlane.f32.xlu0 %v1385_v29  ;;  %v1379_v30 = vpop.f32.mrb[16].mxu1 }
 0x9eb   :  { %v1384_v31 = vmul.f32 0.35355338, %v1379_v30  ;;  %v8250_v32 = vpop.f32.mrb[17].mxu1 }
 0x9ed   :  { %v1388_v33 = vsel %vm235_vm2, %v1384_v31, -inf }
 0x9ee   :  { %1389 = vmax.xlane.f32.xlu1 %v1388_v33 }
 0x9ff   :  { %1483 = vrot.lane.b32.xlu1 %v9508_v37, %s10729_s10 }
 0xa03   :  { %1561 = vrot.lane.b32.xlu1 %v9612_v46, %s10727_s28 }
 0xa07   :  { %1563 = vrot.lane.b32.xlu1 %v9614_v48, %s10727_s28  ;;  %s10773_s28 = smov 8  }
 0xa0b   :  { %1571 = vrot.lane.b32.xlu1 %v1223_v24, %s10725_s27 }
 0xa77   :  { %v1387_v34 = vpop.xlane.xlu0 %1386 }
 0xa78   :  { %v1391_v35 = vsub.f32 %v1383_v26, %v1387_v34 }
 0xa7a   :  { %v1393_v39 = vmul.f32 1.442695, %v1391_v35 }
 0xa7b   :  { %v1390_v41 = vpop.xlane.xlu1 %1389 }
 0xa7c   :  { %9071 = vpow2.f32 %v1393_v39  ;;  %v1392_v42 = vsub.f32 %v1384_v31, %v1390_v41  ;;  %v1723_v39 = vld [vmem:[%s10707_s8] sm:$0xff]  ;;  %v1724_v41 = vld [vmem:[%s10707_s8 + $0x8] sm:$0xff] }
 0xa7e   :  { %v1395_v44 = vmul.f32 1.442695, %v1392_v42  ;;  %v1725_v42 = vld [vmem:[%s10707_s8 + $0x10] sm:$0xff] }
 0xa7f   :  { %v1484_v45 = vpop.permute.xlu1 %1483 }
 0xa80   :  { %9073 = vpow2.f32 %v1395_v44  ;;  %8257 = vmatpush3.msra.mxu1 %v1484_v45  ;;  %v8800_v44 = vpack.c.bf16 %v1724_v41, %v1723_v39  ;;  %v1726_v45 = vld [vmem:[%s10707_s8 + $0x18] sm:$0xff]  ;;  %v7758_v39 = vld [vmem:[%s10710_s11] ss:$0 sm:$0xff] }
 0xa82   :  { %8801 = vmatprep.subr.bf16.mxu1 %v8800_v44 }
 0xa83   :  { %v1562_v3 = vpop.permute.xlu1 %1561 }
 0xa84   :  { %v1583_v8 = vsel %vm235_vm2, %v9568_v9, %v1562_v3  ;;  %v7750_v9 = vld [vmem:[%s10704_s5] ss:$0 sm:$0xff] }
 0xa85   :  { %v1827_v3 = vld [vmem:[#allocation7 + $0x60] sm:$0xff] }
 0xa86   :  { %v9072_v37 = vpop.eup %9071 }
 0xa87   :  { %v1397_v47 = vsel %vm235_vm2, %v9072_v37, 0.0  ;;  %v1564_v5 = vpop.permute.xlu1 %1563 }
 0xa88   :  { %1398 = vadd.xlane.f32.xlu0 %v1397_v47  ;;  %v1584_v15 = vsel %vm235_vm2, %v9570_v11, %v1564_v5  ;;  %v1815_v47 = vld [vmem:[#allocation7] sm:$0xff]  ;;  %v1828_v5 = vld [vmem:[#allocation7 + $0x68] sm:$0xff] }
 0xa8a   :  { %v9074_v46 = vpop.eup %9073 }
 0xa8b   :  { %v1400_v48 = vsel %vm235_vm2, %v9074_v46, 0.0  ;;  %v1572_v10 = vpop.permute.xlu1 %1571 }
 0xa8c   :  { %1401 = vadd.xlane.f32.xlu0 %v1400_v48  ;;  %v1587_v17 = vsel %vm1585_vm4, %v1584_v15, %v1572_v10  ;;  %v1817_v48 = vld [vmem:[#allocation7 + $0x10] sm:$0xff] }
 0xaa2   :  { %1407 = vrot.lane.b32.xlu0 %v9512_v38, %s10729_s10  ;;  %v1591_v38 = vld [vmem:[#allocation5] sm:$0xff]  ;;  %s10769_s10 = smov 48  }
 0xaa3   :  { %v8792_v57 = vpack.c.bf16 %v1592_v56, %v1591_v38  ;;  %v1821_v56 = vld [vmem:[#allocation7 + $0x30] sm:$0xff] }
 0xaa6   :  { %1569 = vrot.lane.b32.xlu0 %v1147_v22, %s10725_s27  ;;  %s10770_s27 = smov 72  }
 0xb15   :  { %v1399_v49 = vpop.xlane.xlu0 %1398 }
 0xb16   :  { %9075 = vrcp.f32 %v1399_v49 }
 0xb19   :  { %v1402_v50 = vpop.xlane.xlu0 %1401 }
 0xb1a   :  { %9077 = vrcp.f32 %v1402_v50  ;;  %v1818_v50 = vld [vmem:[#allocation7 + $0x18] sm:$0xff] }
 0xb1d   :  { %v1408_v51 = vpop.permute.xlu0 %1407 }
 0xb1e   :  { %8252 = vmatpush3.msra.mxu0 %v1408_v51  ;;  %v8812_v51 = vpack.c.bf16 %v1818_v50, %v1817_v48 }
 0xb1f   :  { %8793 = vmatprep.subr.bf16.mxu0 %v8792_v57 }
 0xb20   :  { %v9076_v52 = vpop.eup %9075 }
 0xb21   :  { %v9670_v53 = vmul.f32 %v9076_v52, %v9072_v37  ;;  %v1570_v7 = vpop.permute.xlu0 %1569  ;;  %v8804_v37 = vpack.c.bf16 %v1726_v45, %v1725_v42  ;;  %v1819_v52 = vld [vmem:[#allocation7 + $0x20] sm:$0xff] }
 0xb22   :  { %v1586_v12 = vsel %vm1585_vm4, %v1583_v8, %v1570_v7  ;;  %v8832_v7 = vpack.c.bf16 %v1828_v5, %v1827_v3 }
 0xb23   :  { %8254 = vmatmul.mubr.msk.f32.vlgmr.msra.gmra.mrb[12].mxu0 %vm235_vm2, %v9670_v53 }
 0xb24   :  { %v9078_v54 = vpop.eup %9077  ;;  %8795 = vmatpush3.bf16.msra.mxu0 %v8792_v57  ;;  %v1822_v57 = vld [vmem:[#allocation7 + $0x38] sm:$0xff] }
 0xb25   :  { %v9674_v55 = vmul.f32 %v9078_v54, %v9074_v46  ;;  %8797 = vmatprep.subr.bf16.mxu0 %v8796_v60  ;;  %v1816_v46 = vld [vmem:[#allocation7 + $0x8] sm:$0xff]  ;;  %v8820_v58 = vpack.c.bf16 %v1822_v57, %v1821_v56 }
 0xb26   :  { %v8808_v49 = vpack.c.bf16 %v1816_v46, %v1815_v47  ;;  %v1820_v54 = vld [vmem:[#allocation7 + $0x28] sm:$0xff] }
 0xb27   :  { %8259 = vmatmul.mubr.msk.f32.vlgmr.msra.gmra.mrb[18].mxu1 %vm235_vm2, %v9674_v55  ;;  %v8816_v38 = vpack.c.bf16 %v1820_v54, %v1819_v52 }
 0xb28   :  { %8799 = vmatpush3.bf16.msra.mxu0 %v8796_v60  ;;  %8803 = vmatpush3.bf16.msra.mxu1 %v8800_v44  ;;  %v1824_v60 = vld [vmem:[#allocation7 + $0x48] sm:$0xff] }
 0xb29   :  { %8805 = vmatprep.subr.bf16.mxu1 %v8804_v37  ;;  %8809 = vmatprep.subr.bf16.mxu0 %v8808_v49 }
 0xb2c   :  { %8807 = vmatpush3.bf16.msra.mxu1 %v8804_v37 }
 0xbf6   :  { %v1479_v61 = vpop.f32.mrb[12].mxu0 }
 0xbf7   :  { %1577 = vrot.lane.b32.xlu0 %v1479_v61, %s10723_s2  ;;  %v8255_v62 = vpop.f32.mrb[13].mxu0  ;;  %v8824_v61 = vpack.c.bf16 %v1824_v60, %v1823_v59  ;;  %v1955_v59 = vld [vmem:[#allocation2 + $0x28] sm:$0xff]  ;;  %v1956_v60 = vld [vmem:[#allocation2 + $0x30] sm:$0xff] }
 0xbf8   :  { %v1825_v62 = vld [vmem:[#allocation7 + $0x50] sm:$0xff] }
 0xbfa   :  { %v1555_v63 = vpop.f32.mrb[18].mxu1 }
 0xbfb   :  { %1579 = vrot.lane.b32.xlu1 %v1555_v63, %s10723_s2  ;;  %v8260_v2 = vpop.f32.mrb[19].mxu1  ;;  %v1826_v63 = vld [vmem:[#allocation7 + $0x58] sm:$0xff]  ;;  %s10771_s2 = smov 104  }
 0xbfc   :  { %v8828_v2 = vpack.c.bf16 %v1826_v63, %v1825_v62  ;;  %v1957_v62 = vld [vmem:[#allocation2 + $0x38] sm:$0xff] }
 0xbfd   :  { %v8844_v63 = vpack.c.bf16 %v1957_v62, %v1956_v60 }
 0xc69   :  { %v1578_v13 = vpop.permute.xlu0 %1577 }
 0xc6a   :  { %v1589_v14 = vsel %vm1588_vm3, %v1586_v12, %v1578_v13 }
 0xc6b   :  { %8269 = vmatprep.mubr.msk.f32.mxu0 %vm107_vm0, %v1589_v14 }
 0xc6d   :  { %v1580_v18 = vpop.permute.xlu1 %1579 }
 0xc6e   :  { %v1590_v20 = vsel %vm1588_vm3, %v1587_v17, %v1580_v18  ;;  %v7753_v18 = vld [vmem:[%s10705_s6] ss:$0 sm:$0xff] }
 0xc6f   :  { %8270 = vmatmul.mubr.msk.f32.vlgmr.msra.gmra.mrb[14].mxu0 %vm107_vm0, %v1590_v20 }
 0xc70   :  { %8811 = vmatpush3.bf16.msra.mxu0 %v8808_v49 }
 0xc71   :  { %8813 = vmatprep.subr.bf16.mxu0 %v8812_v51 }
 0xc74   :  { %8815 = vmatpush3.bf16.msra.mxu0 %v8812_v51 }
 0xc75   :  { %8817 = vmatprep.subr.bf16.mxu0 %v8816_v38 }
 0xc78   :  { %8819 = vmatpush3.bf16.msra.mxu0 %v8816_v38 }
 0xc79   :  { %8821 = vmatprep.subr.bf16.mxu0 %v8820_v58 }
 0xc7c   :  { %8823 = vmatpush3.bf16.msra.mxu0 %v8820_v58  ;;  %v1954_v58 = vld [vmem:[#allocation2 + $0x20] sm:$0xff] }
 0xc7d   :  { %8825 = vmatprep.subr.bf16.mxu0 %v8824_v61 }
 0xc80   :  { %8827 = vmatpush3.bf16.msra.mxu0 %v8824_v61  ;;  %v8840_v61 = vpack.c.bf16 %v1955_v59, %v1954_v58 }
 0xc81   :  { %8829 = vmatprep.subr.bf16.mxu0 %v8828_v2 }
 0xc82   :  { %8841 = vmatprep.subr.bf16.mxu1 %v8840_v61 }
 0xc84   :  { %8831 = vmatpush3.bf16.msra.mxu0 %v8828_v2 }
 0xc85   :  { %8833 = vmatprep.subr.bf16.mxu0 %v8832_v7 }
 0xc88   :  { %8835 = vmatpush3.bf16.msra.mxu0 %v8832_v7 }
 0xd42   :  { %v8271_v21 = vpop.f32.mrb[14].mxu0 }
 0xd43   :  { %v1678_v22 = vadd.f32 %v8271_v21, %v7750_v9  ;;  %v1672_v23 = vpop.f32.mrb[15].mxu0 }
 0xd44   :  { %v1673_v24 = vadd.f32 %v7750_v9, %v1672_v23  ;;  %v7754_v9 = vld [vmem:[%s10706_s7] ss:$0 sm:$0xff] }
 0xd45   :  { %v9694_v25 = vadd.f32 %v1678_v22, %v9484_v1 }
 0xd46   :  { %v9697_v11 = vadd.f32 %v1673_v24, %v9479_v0 }
 0xd47   :  { %v1688_v26 = vsel %vm107_vm0, %v9694_v25, 0.0 }
 0xd48   :  { %1689 = vadd.xlane.f32.xlu1 %v1688_v26  ;;  %v1685_v27 = vsel %vm107_vm0, %v9697_v11, 0.0 }
 0xd49   :  { %1686 = vadd.xlane.f32.xlu0 %v1685_v27 }
 0xdd5   :  { %v1690_v28 = vpop.xlane.xlu1 %1689 }
 0xdd6   :  { %v1692_v29 = vmul.f32 0.03125, %v1690_v28  ;;  %v1687_v30 = vpop.xlane.xlu0 %1686  ;;  %v1829_v28 = vld [vmem:[#allocation7 + $0x70] sm:$0xff] }
 0xdd7   :  { %v1691_v31 = vmul.f32 0.03125, %v1687_v30 }
 0xdd8   :  { %v9704_v32 = vsub.f32 %v9694_v25, %v1692_v29  ;;  %v1830_v29 = vld [vmem:[#allocation7 + $0x78] sm:$0xff] }
 0xdd9   :  { %v1693_v1 = vsub.f32 %v9697_v11, %v1691_v31  ;;  %v8836_v30 = vpack.c.bf16 %v1830_v29, %v1829_v28  ;;  %v7755_v31 = vld [vmem:[%s10708_s9] ss:$0 sm:$0xff] }
 0xdda   :  { %v1696_v34 = vmul.f32 %v9704_v32, %v9704_v32 }
 0xddb   :  { %v1695_v33 = vmul.f32 %v1693_v1, %v1693_v1  ;;  %8837 = vmatprep.subr.bf16.mxu0 %v8836_v30 }
 0xddc   :  { %v1700_v35 = vsel %vm107_vm0, %v1696_v34, 0.0  ;;  %8839 = vmatpush3.bf16.msra.mxu0 %v8836_v30 }
 0xddd   :  { %v1697_v0 = vsel %vm107_vm0, %v1695_v33, 0.0  ;;  %8359 = vmatprep.subr.mxu0 %v9306_v36 }
 0xdde   :  { %1698 = vadd.xlane.f32.xlu0 %v1697_v0 }
 0xde2   :  { %1701 = vadd.xlane.f32.xlu0 %v1700_v35 }
 0xe6b   :  { %v1699_v8 = vpop.xlane.xlu0 %1698 }
 0xe6c   :  { %v1703_v10 = vmul.f32 0.03125, %v1699_v8 }
 0xe6e   :  { %v1705_v12 = vadd.f32 1e-05, %v1703_v10 }
 0xe6f   :  { %v1702_v13 = vpop.xlane.xlu0 %1701 }
 0xe70   :  { %9079 = vrsqrt.f32 %v1705_v12  ;;  %v1704_v14 = vmul.f32 0.03125, %v1702_v13  ;;  %v7759_v13 = vld [vmem:[%s10767_s0 + $0x1] ss:$0 sm:$0xff] }
 0xe72   :  { %v1706_v15 = vadd.f32 1e-05, %v1704_v14 }
 0xe74   :  { %9081 = vrsqrt.f32 %v1706_v15 }
 0xe7a   :  { %v9080_v17 = vpop.eup %9079 }
 0xe7b   :  { %v1709_v20 = vmul.f32 %v9080_v17, %v1693_v1 }
 0xe7d   :  { %v1715_v21 = vmul.f32 %v7753_v18, %v1709_v20 }
 0xe7e   :  { %v9082_v22 = vpop.eup %9081 }
 0xe7f   :  { %v1710_v23 = vmul.f32 %v9082_v22, %v9704_v32  ;;  %v1721_v24 = vadd.f32 %v7754_v9, %v1715_v21 }
 0xe81   :  { %v1716_v26 = vmul.f32 %v7753_v18, %v1710_v23  ;;  %8280 = vmatprep.mubr.msk.f32.mxu1 %vm107_vm0, %v1721_v24  ;;  %v7760_v18 = vld [vmem:[%s10768_s24 + $0x1] ss:$0 sm:$0xff] }
 0xe83   :  { %v1722_v27 = vadd.f32 %v7754_v9, %v1716_v26 }
 0xe85   :  { %8281 = vmatmul.mubr.msk.f32.vlgmr.msra.gmra.mrb[20].mxu1 %vm107_vm0, %v1722_v27 }
 0xe86   :  { %8843 = vmatpush3.bf16.msra.mxu1 %v8840_v61 }
 0xe87   :  { %8845 = vmatprep.subr.bf16.mxu1 %v8844_v63 }
 0xe8a   :  { %8847 = vmatpush3.bf16.msra.mxu1 %v8844_v63 }
 0xe8b   :  { %8329 = vmatprep.subr.mxu1 %v9306_v36 }
 0xf58   :  { %v8282_v1 = vpop.f32.mrb[20].mxu1 }
 0xf59   :  { %v1810_v32 = vadd.f32 %v8282_v1, %v7755_v31  ;;  %v1804_v33 = vpop.f32.mrb[21].mxu1 }
 0xf5a   :  { %v1805_v0 = vadd.f32 %v7755_v31, %v1804_v33 }
 0xf5b   :  { %v1814_v35 = vmax.f32 %v1810_v32, 0.0 }
 0xf5c   :  { %v1813_v34 = vmax.f32 %v1805_v0, 0.0 }
 0xf5e   :  { %8315 = vmatprep.mubr.f32.mxu0 %v1813_v34 }
 0xf5f   :  { %8316 = vmatmul.mubr.f32.vlgmr.msra.gmra.mrb[16].mxu0 %v1814_v35 }
 0xf60   :  { %8361 = vmatprep.mubr.msk.f32.mxu0 %vm9307_vm1, %v9306_v36 }
0x1032   :  { %v8317_v41 = vpop.f32.mrb[16].mxu0 }
0x1033   :  { %v1908_v42 = vadd.f32 %v8317_v41, %v7758_v39  ;;  %v1902_v44 = vpop.f32.mrb[17].mxu0 }
0x1034   :  { %v1903_v45 = vadd.f32 %v7758_v39, %v1902_v44 }
0x1035   :  { %v9742_v37 = vadd.f32 %v1908_v42, %v9694_v25 }
0x1036   :  { %v9745_v47 = vadd.f32 %v1903_v45, %v9697_v11 }
0x1037   :  { %v1918_v46 = vsel %vm107_vm0, %v9742_v37, 0.0 }
0x1038   :  { %1919 = vadd.xlane.f32.xlu1 %v1918_v46  ;;  %v1915_v48 = vsel %vm107_vm0, %v9745_v47, 0.0 }
0x1039   :  { %1916 = vadd.xlane.f32.xlu0 %v1915_v48 }
0x10c5   :  { %v1920_v49 = vpop.xlane.xlu1 %1919 }
0x10c6   :  { %v1922_v50 = vmul.f32 0.03125, %v1920_v49  ;;  %v1917_v51 = vpop.xlane.xlu0 %1916 }
0x10c7   :  { %v1921_v52 = vmul.f32 0.03125, %v1917_v51 }
0x10c8   :  { %v1924_v54 = vsub.f32 %v9742_v37, %v1922_v50 }
0x10c9   :  { %v1923_v25 = vsub.f32 %v9745_v47, %v1921_v52 }
0x10ca   :  { %v1926_v38 = vmul.f32 %v1924_v54, %v1924_v54 }
0x10cb   :  { %v1925_v56 = vmul.f32 %v1923_v25, %v1923_v25 }
0x10cc   :  { %v1930_v11 = vsel %vm107_vm0, %v1926_v38, 0.0 }
0x10cd   :  { %1931 = vadd.xlane.f32.xlu1 %v1930_v11  ;;  %v1927_v57 = vsel %vm107_vm0, %v1925_v56, 0.0 }
0x10ce   :  { %1928 = vadd.xlane.f32.xlu0 %v1927_v57 }
0x115a   :  { %v1932_v2 = vpop.xlane.xlu1 %1931 }
0x115b   :  { %v1934_v3 = vmul.f32 0.03125, %v1932_v2  ;;  %v1929_v5 = vpop.xlane.xlu0 %1928 }
0x115c   :  { %v1933_v7 = vmul.f32 0.03125, %v1929_v5 }
0x115d   :  { %v1936_v8 = vadd.f32 1e-05, %v1934_v3 }
0x115e   :  { %v1935_v10 = vadd.f32 1e-05, %v1933_v7 }
0x115f   :  { %9083 = vrsqrt.f32 %v1936_v8 }
0x1160   :  { %9085 = vrsqrt.f32 %v1935_v10 }
0x1169   :  { %v9084_v12 = vpop.eup %9083 }
0x116a   :  { %v9086_v14 = vpop.eup %9085  ;;  %v1940_v15 = vmul.f32 %v9084_v12, %v1924_v54 }
0x116b   :  { %v1939_v17 = vmul.f32 %v9086_v14, %v1923_v25 }
0x116c   :  { %v1946_v20 = vmul.f32 %v7759_v13, %v1940_v15 }
0x116d   :  { %v1945_v9 = vmul.f32 %v7759_v13, %v1939_v17 }
0x116e   :  { %v1952_v22 = vadd.f32 %v7760_v18, %v1946_v20 }
0x116f   :  { %v1951_v21 = vadd.f32 %v7760_v18, %v1945_v9 }
0x1171   :  { %8326 = vmatprep.mubr.msk.f32.mxu1 %vm107_vm0, %v1951_v21 }
0x1172   :  { %8327 = vmatmul.mubr.msk.f32.vlgmr.msra.gmra.mrb[22].mxu1 %vm107_vm0, %v1952_v22 }
0x1173   :  { %8331 = vmatprep.mubr.msk.f32.mxu1 %vm9307_vm1, %v9306_v36 }
0x1245   :  { %v9766_v23 = vpop.f32.mrb[22].mxu1 }
0x1246   :  { %2117 = vrot.lane.b32.xlu1 %v9766_v23, %s10749_s25  ;;  %v9770_v24 = vpop.f32.mrb[23].mxu1 }
0x1247   :  { %2040 = vrot.lane.b32.xlu0 %v9770_v24, %s10749_s25  ;;  %s10780_s25 = smov 56  }
0x12b8   :  { %v2118_v27 = vpop.permute.xlu1 %2117 }
0x12b9   :  { %v2041_v26 = vpop.permute.xlu0 %2040 }
0x12ba   :  { %8330 = vmatpush3.xpose.msk.msra.mxu1 %vm235_vm2, %v2041_v26 }
0x12bb   :  { %8334 = vmatprep.subr.mxu1 %v9306_v36 }
0x12bd   :  { %8332 = vmatmul.mubr.msk.f32.vlgmr.msra.gmra.mrb[24].mxu1 %vm235_vm2, %v9770_v24 }
0x12be   :  { %8335 = vmatpush3.xpose.msk.msra.mxu1 %vm235_vm2, %v2118_v27  ;;  %8336 = vmatprep.mubr.msk.f32.mxu1 %vm9307_vm1, %v9306_v36 }
0x12bf   :  { %8339 = vmatprep.subr.mxu1 %v9306_v36 }
0x12c1   :  { %8337 = vmatmul.mubr.msk.f32.vlgmr.msra.gmra.mrb[26].mxu1 %vm235_vm2, %v9766_v23 }
0x12c2   :  { %8341 = vmatprep.mubr.msk.f32.mxu1 %vm9307_vm1, %v9306_v36 }
0x1390   :  { %v2112_v28 = vpop.f32.mrb[24].mxu1 }
0x1391   :  { %v2193_v29 = vmul.f32 0.35355338, %v2112_v28  ;;  %v8333_v30 = vpop.f32.mrb[25].mxu1 }
0x1393   :  { %v2195_v31 = vsel %vm235_vm2, %v2193_v29, -inf }
0x1394   :  { %2196 = vmax.xlane.f32.xlu1 %v2195_v31  ;;  %v2189_v1 = vpop.f32.mrb[26].mxu1 }
0x1395   :  { %v2194_v32 = vmul.f32 0.35355338, %v2189_v1  ;;  %v8338_v33 = vpop.f32.mrb[27].mxu1 }
0x1397   :  { %v2198_v0 = vsel %vm235_vm2, %v2194_v32, -inf }
0x1398   :  { %2199 = vmax.xlane.f32.xlu0 %v2198_v0 }
0x13a5   :  { %2293 = vrot.lane.b32.xlu1 %v9766_v23, %s10747_s3 }
0x13a9   :  { %2371 = vrot.lane.b32.xlu1 %v9770_v24, %s10745_s26 }
0x13ad   :  { %2369 = vrot.lane.b32.xlu1 %v9770_v24, %s10743_s21 }
0x1421   :  { %v2197_v34 = vpop.xlane.xlu1 %2196 }
0x1422   :  { %v2201_v35 = vsub.f32 %v2193_v29, %v2197_v34 }
0x1424   :  { %v2203_v39 = vmul.f32 1.442695, %v2201_v35 }
0x1425   :  { %v2200_v41 = vpop.xlane.xlu0 %2199  ;;  %v2294_v50 = vpop.permute.xlu1 %2293 }
0x1426   :  { %9087 = vpow2.f32 %v2203_v39  ;;  %v2202_v42 = vsub.f32 %v2194_v32, %v2200_v41 }
0x1428   :  { %v2205_v44 = vmul.f32 1.442695, %v2202_v42 }
0x1429   :  { %v2372_v51 = vpop.permute.xlu1 %2371 }
0x142a   :  { %9089 = vpow2.f32 %v2205_v44 }
0x142d   :  { %v2370_v52 = vpop.permute.xlu1 %2369 }
0x1430   :  { %v9088_v45 = vpop.eup %9087 }
0x1431   :  { %v2207_v46 = vsel %vm235_vm2, %v9088_v45, 0.0 }
0x1432   :  { %2208 = vadd.xlane.f32.xlu0 %v2207_v46 }
0x1434   :  { %v9090_v48 = vpop.eup %9089 }
0x1435   :  { %v2210_v49 = vsel %vm235_vm2, %v9090_v48, 0.0 }
0x1436   :  { %2211 = vadd.xlane.f32.xlu1 %v2210_v49 }
0x1447   :  { %2447 = vrot.lane.b32.xlu1 %v9766_v23, %s10743_s21 }
0x1448   :  { %2217 = vrot.lane.b32.xlu0 %v9770_v24, %s10747_s3  ;;  %s10781_s3 = smov 80  }
0x144c   :  { %2449 = vrot.lane.b32.xlu0 %v9766_v23, %s10745_s26  ;;  %s10782_s26 = smov 112  }
0x14bf   :  { %v2209_v54 = vpop.xlane.xlu0 %2208 }
0x14c0   :  { %9091 = vrcp.f32 %v2209_v54 }
0x14c3   :  { %v2212_v25 = vpop.xlane.xlu1 %2211  ;;  %v2218_v38 = vpop.permute.xlu0 %2217 }
0x14c4   :  { %9093 = vrcp.f32 %v2212_v25  ;;  %8340 = vmatpush3.msra.mxu1 %v2218_v38 }
0x14c5   :  { %8344 = vmatprep.subr.mxu1 %v9306_v36 }
0x14c7   :  { %v2450_v59 = vpop.permute.xlu0 %2449  ;;  %v2448_v60 = vpop.permute.xlu1 %2447 }
0x14ca   :  { %v9092_v56 = vpop.eup %9091 }
0x14cb   :  { %v9803_v11 = vmul.f32 %v9092_v56, %v9088_v45 }
0x14cd   :  { %8342 = vmatmul.mubr.msk.f32.vlgmr.msra.gmra.mrb[28].mxu1 %vm235_vm2, %v9803_v11 }
0x14ce   :  { %v9094_v57 = vpop.eup %9093  ;;  %8345 = vmatpush3.msra.mxu1 %v2294_v50  ;;  %8346 = vmatprep.mubr.msk.f32.mxu1 %vm9307_vm1, %v9306_v36 }
0x14cf   :  { %v9809_v58 = vmul.f32 %v9094_v57, %v9090_v48  ;;  %8349 = vmatprep.subr.mxu1 %v9306_v36 }
0x14d1   :  { %8347 = vmatmul.mubr.msk.f32.vlgmr.msra.gmra.mrb[30].mxu1 %vm235_vm2, %v9809_v58 }
0x14d2   :  { %8351 = vmatprep.mubr.msk.f32.mxu1 %vm9307_vm1, %v9306_v36 }
0x14d5   :  { %8350 = vmatpush3.xpose.msk.msra.mxu1 %vm235_vm2, %v2372_v51 }
0x14d6   :  { %8354 = vmatprep.subr.mxu1 %v9306_v36 }
0x14d8   :  { %8352 = vmatmul.mubr.msk.f32.vlgmr.msra.gmra.mrb[32].mxu1 %vm235_vm2, %v2370_v52 }
0x14d9   :  { %8355 = vmatpush3.xpose.msk.msra.mxu1 %vm235_vm2, %v2450_v59  ;;  %8356 = vmatprep.mubr.msk.f32.mxu1 %vm9307_vm1, %v9306_v36 }
0x14da   :  { %8364 = vmatprep.subr.mxu1 %v9306_v36 }
0x14dc   :  { %8357 = vmatmul.mubr.msk.f32.vlgmr.msra.gmra.mrb[34].mxu1 %vm235_vm2, %v2448_v60 }
0x14dd   :  { %8366 = vmatprep.mubr.msk.f32.mxu1 %vm9307_vm1, %v9306_v36 }
0x15a0   :  { %v9826_v61 = vpop.f32.mrb[28].mxu1 }
0x15a1   :  { %v8343_v62 = vpop.f32.mrb[29].mxu1 }
0x15a4   :  { %v9828_v63 = vpop.f32.mrb[30].mxu1 }
0x15a5   :  { %v8348_v2 = vpop.f32.mrb[31].mxu1 }
0x15ab   :  { %v2443_v3 = vpop.f32.mrb[32].mxu1 }
0x15ac   :  { %v2525_v5 = vmul.f32 0.35355338, %v2443_v3  ;;  %v8353_v7 = vpop.f32.mrb[33].mxu1 }
0x15ae   :  { %v2527_v8 = vsel %vm235_vm2, %v2525_v5, -inf }
0x15af   :  { %2528 = vmax.xlane.f32.xlu0 %v2527_v8  ;;  %v2521_v10 = vpop.f32.mrb[34].mxu1 }
0x15b0   :  { %v2526_v12 = vmul.f32 0.35355338, %v2521_v10  ;;  %v8358_v13 = vpop.f32.mrb[35].mxu1 }
0x15b2   :  { %v2530_v14 = vsel %vm235_vm2, %v2526_v12, -inf }
0x15b3   :  { %2531 = vmax.xlane.f32.xlu1 %v2530_v14 }
0x15c4   :  { %2625 = vrot.lane.b32.xlu1 %v9766_v23, %s10741_s22 }
0x15c5   :  { %2549 = vrot.lane.b32.xlu0 %v9770_v24, %s10741_s22  ;;  %s10776_s22 = smov 96  }
0x15c8   :  { %2703 = vrot.lane.b32.xlu1 %v9770_v24, %s10739_s4 }
0x15cc   :  { %2781 = vrot.lane.b32.xlu1 %v9766_v23, %s10739_s4  ;;  %s10777_s4 = smov 64  }
0x15d0   :  { %2779 = vrot.lane.b32.xlu1 %v9766_v23, %s10737_s30 }
0x163c   :  { %v2529_v15 = vpop.xlane.xlu0 %2528 }
0x163d   :  { %v2533_v17 = vsub.f32 %v2525_v5, %v2529_v15 }
0x163f   :  { %v2535_v18 = vmul.f32 1.442695, %v2533_v17 }
0x1640   :  { %v2550_v20 = vpop.permute.xlu0 %2549  ;;  %v2532_v9 = vpop.xlane.xlu1 %2531 }
0x1641   :  { %9095 = vpow2.f32 %v2535_v18  ;;  %v2534_v21 = vsub.f32 %v2526_v12, %v2532_v9  ;;  %8360 = vmatpush3.msra.mxu0 %v2550_v20 }
0x1642   :  { %8369 = vmatprep.subr.mxu0 %v9306_v36 }
0x1643   :  { %v2537_v22 = vmul.f32 1.442695, %v2534_v21 }
0x1644   :  { %v2626_v26 = vpop.permute.xlu1 %2625 }
0x1645   :  { %9097 = vpow2.f32 %v2537_v22  ;;  %8365 = vmatpush3.msra.mxu1 %v2626_v26 }
0x1646   :  { %8374 = vmatprep.subr.mxu1 %v9306_v36 }
0x1648   :  { %v2704_v32 = vpop.permute.xlu1 %2703 }
0x164b   :  { %v9096_v27 = vpop.eup %9095 }
0x164c   :  { %v2539_v28 = vsel %vm235_vm2, %v9096_v27, 0.0  ;;  %v2782_v35 = vpop.permute.xlu1 %2781 }
0x164d   :  { %2540 = vadd.xlane.f32.xlu0 %v2539_v28 }
0x164f   :  { %v9098_v29 = vpop.eup %9097 }
0x1650   :  { %v2542_v30 = vsel %vm235_vm2, %v9098_v29, 0.0  ;;  %v2780_v42 = vpop.permute.xlu1 %2779 }
0x1651   :  { %2543 = vadd.xlane.f32.xlu0 %v2542_v30 }
0x1667   :  { %2701 = vrot.lane.b32.xlu0 %v9770_v24, %s10737_s30  ;;  %s10778_s30 = smov 88  }
0x16da   :  { %v2541_v31 = vpop.xlane.xlu0 %2540 }
0x16db   :  { %9099 = vrcp.f32 %v2541_v31 }
0x16de   :  { %v2544_v1 = vpop.xlane.xlu0 %2543 }
0x16df   :  { %9101 = vrcp.f32 %v2544_v1 }
0x16e2   :  { %v2702_v41 = vpop.permute.xlu0 %2701 }
0x16e5   :  { %v9100_v33 = vpop.eup %9099 }
0x16e6   :  { %v9848_v0 = vmul.f32 %v9100_v33, %v9096_v27 }
0x16e8   :  { %8362 = vmatmul.mubr.msk.f32.vlgmr.msra.gmra.mrb[18].mxu0 %vm235_vm2, %v9848_v0 }
0x16e9   :  { %v9102_v34 = vpop.eup %9101  ;;  %8370 = vmatpush3.xpose.msk.msra.mxu0 %vm235_vm2, %v2704_v32  ;;  %8371 = vmatprep.mubr.msk.f32.mxu0 %vm9307_vm1, %v9306_v36 }
0x16ea   :  { %v9855_v39 = vmul.f32 %v9102_v34, %v9098_v29  ;;  %8379 = vmatprep.subr.mxu0 %v9306_v36 }
0x16ec   :  { %8367 = vmatmul.mubr.msk.f32.vlgmr.msra.gmra.mrb[36].mxu1 %vm235_vm2, %v9855_v39  ;;  %8372 = vmatmul.mubr.msk.f32.vlgmr.msra.gmra.mrb[20].mxu0 %vm235_vm2, %v2702_v41 }
0x16ed   :  { %8375 = vmatpush3.xpose.msk.msra.mxu1 %vm235_vm2, %v2782_v35  ;;  %8376 = vmatprep.mubr.msk.f32.mxu1 %vm9307_vm1, %v9306_v36 }
0x16ee   :  { %8384 = vmatprep.subr.mxu1 %v9306_v36  ;;  %8381 = vmatprep.mubr.msk.f32.mxu0 %vm9307_vm1, %v9306_v36 }
0x16f0   :  { %8377 = vmatmul.mubr.msk.f32.vlgmr.msra.gmra.mrb[38].mxu1 %vm235_vm2, %v2780_v42 }
0x16f1   :  { %8386 = vmatprep.mubr.msk.f32.mxu1 %vm9307_vm1, %v9306_v36 }
0x17bb   :  { %v9870_v44 = vpop.f32.mrb[18].mxu0 }
0x17bc   :  { %v8363_v45 = vpop.f32.mrb[19].mxu0 }
0x17bf   :  { %v9872_v46 = vpop.f32.mrb[36].mxu1  ;;  %v2775_v48 = vpop.f32.mrb[20].mxu0 }
0x17c0   :  { %v2857_v49 = vmul.f32 0.35355338, %v2775_v48  ;;  %v8368_v50 = vpop.f32.mrb[37].mxu1  ;;  %v8373_v51 = vpop.f32.mrb[21].mxu0 }
0x17c2   :  { %v2859_v52 = vsel %vm235_vm2, %v2857_v49, -inf }
0x17c3   :  { %2860 = vmax.xlane.f32.xlu0 %v2859_v52  ;;  %v2853_v54 = vpop.f32.mrb[38].mxu1 }
0x17c4   :  { %v2858_v25 = vmul.f32 0.35355338, %v2853_v54  ;;  %v8378_v38 = vpop.f32.mrb[39].mxu1 }
0x17c6   :  { %v2862_v56 = vsel %vm235_vm2, %v2858_v25, -inf }
0x17c7   :  { %2863 = vmax.xlane.f32.xlu1 %v2862_v56 }
0x17d8   :  { %2957 = vrot.lane.b32.xlu1 %v9766_v23, %s10769_s10 }
0x17d9   :  { %2881 = vrot.lane.b32.xlu0 %v9770_v24, %s10769_s10 }
0x17dc   :  { %3035 = vrot.lane.b32.xlu1 %v9770_v24, %s10770_s27 }
0x17e0   :  { %3113 = vrot.lane.b32.xlu1 %v9766_v23, %s10770_s27 }
0x17e4   :  { %3111 = vrot.lane.b32.xlu1 %v9766_v23, %s10771_s2 }
0x1850   :  { %v2861_v57 = vpop.xlane.xlu0 %2860 }
0x1851   :  { %v2865_v59 = vsub.f32 %v2857_v49, %v2861_v57 }
0x1853   :  { %v2867_v60 = vmul.f32 1.442695, %v2865_v59 }
0x1854   :  { %v2882_v62 = vpop.permute.xlu0 %2881  ;;  %v2864_v2 = vpop.xlane.xlu1 %2863 }
0x1855   :  { %9103 = vpow2.f32 %v2867_v60  ;;  %v2866_v3 = vsub.f32 %v2858_v25, %v2864_v2  ;;  %8380 = vmatpush3.msra.mxu0 %v2882_v62 }
0x1856   :  { %8389 = vmatprep.subr.mxu0 %v9306_v36 }
0x1857   :  { %v2869_v5 = vmul.f32 1.442695, %v2866_v3 }
0x1858   :  { %v2958_v7 = vpop.permute.xlu1 %2957 }
0x1859   :  { %9105 = vpow2.f32 %v2869_v5  ;;  %8385 = vmatpush3.msra.mxu1 %v2958_v7  ;;  %v3397_v5 = vld [vmem:[#allocation5 + $0x28] sm:$0xff] }
0x185a   :  { %8394 = vmatprep.subr.mxu1 %v9306_v36 }
0x185c   :  { %v3036_v17 = vpop.permute.xlu1 %3035 }
0x185f   :  { %v9104_v8 = vpop.eup %9103 }
0x1860   :  { %v2871_v10 = vsel %vm235_vm2, %v9104_v8, 0.0  ;;  %v3114_v21 = vpop.permute.xlu1 %3113 }
0x1861   :  { %2872 = vadd.xlane.f32.xlu0 %v2871_v10  ;;  %v3399_v10 = vld [vmem:[#allocation5 + $0x38] sm:$0xff] }
0x1863   :  { %v9106_v12 = vpop.eup %9105 }
0x1864   :  { %v2874_v13 = vsel %vm235_vm2, %v9106_v12, 0.0  ;;  %v3112_v27 = vpop.permute.xlu1 %3111 }
0x1865   :  { %2875 = vadd.xlane.f32.xlu0 %v2874_v13 }
0x187b   :  { %3033 = vrot.lane.b32.xlu0 %v9770_v24, %s10771_s2 }
0x18ee   :  { %v2873_v14 = vpop.xlane.xlu0 %2872 }
0x18ef   :  { %9107 = vrcp.f32 %v2873_v14 }
0x18f2   :  { %v2876_v15 = vpop.xlane.xlu0 %2875 }
0x18f3   :  { %9109 = vrcp.f32 %v2876_v15 }
0x18f6   :  { %v3034_v26 = vpop.permute.xlu0 %3033 }
0x18f9   :  { %v9108_v18 = vpop.eup %9107 }
0x18fa   :  { %v9892_v20 = vmul.f32 %v9108_v18, %v9104_v8  ;;  %v3398_v8 = vld [vmem:[#allocation5 + $0x30] sm:$0xff] }
0x18fc   :  { %8382 = vmatmul.mubr.msk.f32.vlgmr.msra.gmra.mrb[22].mxu0 %vm235_vm2, %v9892_v20 }
0x18fd   :  { %v9110_v9 = vpop.eup %9109  ;;  %8390 = vmatpush3.xpose.msk.msra.mxu0 %vm235_vm2, %v3036_v17  ;;  %8391 = vmatprep.mubr.msk.f32.mxu0 %vm9307_vm1, %v9306_v36 }
0x18fe   :  { %v9899_v22 = vmul.f32 %v9110_v9, %v9106_v12  ;;  %8399 = vmatprep.subr.mxu0 %v9306_v36  ;;  %v8852_v12 = vpack.c.bf16 %v3399_v10, %v3398_v8  ;;  %v3625_v10 = vld [vmem:[#allocation7 + $0x98] sm:$0xff] }
0x1900   :  { %8387 = vmatmul.mubr.msk.f32.vlgmr.msra.gmra.mrb[40].mxu1 %vm235_vm2, %v9899_v22  ;;  %8392 = vmatmul.mubr.msk.f32.vlgmr.msra.gmra.mrb[24].mxu0 %vm235_vm2, %v3034_v26 }
0x1901   :  { %8395 = vmatpush3.xpose.msk.msra.mxu1 %vm235_vm2, %v3114_v21  ;;  %8396 = vmatprep.mubr.msk.f32.mxu1 %vm9307_vm1, %v9306_v36 }
0x1902   :  { %8404 = vmatprep.subr.mxu1 %v9306_v36  ;;  %8401 = vmatprep.mubr.msk.f32.mxu0 %vm9307_vm1, %v9306_v36 }
0x1904   :  { %8397 = vmatmul.mubr.msk.f32.vlgmr.msra.gmra.mrb[42].mxu1 %vm235_vm2, %v3112_v27 }
0x1905   :  { %8406 = vmatprep.mubr.msk.f32.mxu1 %vm9307_vm1, %v9306_v36 }
0x19cf   :  { %v2953_v28 = vpop.f32.mrb[22].mxu0 }
0x19d0   :  { %v8383_v29 = vpop.f32.mrb[23].mxu0 }
0x19d3   :  { %v3029_v30 = vpop.f32.mrb[40].mxu1  ;;  %v3107_v31 = vpop.f32.mrb[24].mxu0 }
0x19d4   :  { %v3189_v1 = vmul.f32 0.35355338, %v3107_v31  ;;  %v8388_v32 = vpop.f32.mrb[41].mxu1  ;;  %v8393_v33 = vpop.f32.mrb[25].mxu0 }
0x19d6   :  { %v3191_v34 = vsel %vm235_vm2, %v3189_v1, -inf }
0x19d7   :  { %3192 = vmax.xlane.f32.xlu0 %v3191_v34  ;;  %v3185_v35 = vpop.f32.mrb[42].mxu1 }
0x19d8   :  { %v3190_v41 = vmul.f32 0.35355338, %v3185_v35  ;;  %v8398_v42 = vpop.f32.mrb[43].mxu1 }
0x19da   :  { %v3194_v45 = vsel %vm235_vm2, %v3190_v41, -inf }
0x19db   :  { %3195 = vmax.xlane.f32.xlu1 %v3194_v45 }
0x19ec   :  { %3289 = vrot.lane.b32.xlu1 %v9766_v23, %s10772_s23 }
0x19f0   :  { %3367 = vrot.lane.b32.xlu1 %v9870_v44, %s10773_s28 }
0x19f4   :  { %3369 = vrot.lane.b32.xlu1 %v9872_v46, %s10773_s28 }
0x19f8   :  { %3377 = vrot.lane.b32.xlu1 %v3029_v30, %s10774_s29 }
0x1a64   :  { %v3193_v48 = vpop.xlane.xlu0 %3192 }
0x1a65   :  { %v3197_v49 = vsub.f32 %v3189_v1, %v3193_v48 }
0x1a67   :  { %v3199_v50 = vmul.f32 1.442695, %v3197_v49 }
0x1a68   :  { %v3196_v51 = vpop.xlane.xlu1 %3195 }
0x1a69   :  { %9111 = vpow2.f32 %v3199_v50  ;;  %v3198_v52 = vsub.f32 %v3190_v41, %v3196_v51 }
0x1a6b   :  { %v3201_v54 = vmul.f32 1.442695, %v3198_v52 }
0x1a6c   :  { %v3290_v25 = vpop.permute.xlu1 %3289 }
0x1a6d   :  { %9113 = vpow2.f32 %v3201_v54  ;;  %8405 = vmatpush3.msra.mxu1 %v3290_v25 }
0x1a70   :  { %v3368_v18 = vpop.permute.xlu1 %3367 }
0x1a71   :  { %v3389_v26 = vsel %vm235_vm2, %v9826_v61, %v3368_v18  ;;  %v7787_v61 = vld [vmem:[%s10704_s5 + $0x1] ss:$0 sm:$0xff]  ;;  %v3629_v18 = vld [vmem:[#allocation7 + $0xb8] sm:$0xff] }
0x1a73   :  { %v9112_v38 = vpop.eup %9111 }
0x1a74   :  { %v3203_v23 = vsel %vm235_vm2, %v9112_v38, 0.0  ;;  %v3370_v9 = vpop.permute.xlu1 %3369 }
0x1a75   :  { %3204 = vadd.xlane.f32.xlu0 %v3203_v23  ;;  %v3390_v31 = vsel %vm235_vm2, %v9828_v63, %v3370_v9 }
0x1a77   :  { %v9114_v44 = vpop.eup %9113 }
0x1a78   :  { %v3206_v56 = vsel %vm235_vm2, %v9114_v44, 0.0  ;;  %v3378_v27 = vpop.permute.xlu1 %3377 }
0x1a79   :  { %3207 = vadd.xlane.f32.xlu0 %v3206_v56  ;;  %v3392_v1 = vsel %vm1585_vm4, %v3390_v31, %v3378_v27  ;;  %v7792_v56 = vld [vmem:[%s10707_s8 + $0x20] sm:$0xff] }
0x1a7a   :  { %v3634_v31 = vld [vmem:[#allocation7 + $0xe0] sm:$0xff] }
0x1a8f   :  { %3213 = vrot.lane.b32.xlu0 %v9770_v24, %s10772_s23  ;;  %v3396_v24 = vld [vmem:[#allocation5 + $0x20] sm:$0xff] }
0x1a90   :  { %v8848_v7 = vpack.c.bf16 %v3397_v5, %v3396_v24  ;;  %v3622_v24 = vld [vmem:[#allocation7 + $0x80] sm:$0xff]  ;;  %v3623_v5 = vld [vmem:[#allocation7 + $0x88] sm:$0xff] }
0x1a91   :  { %v8864_v8 = vpack.c.bf16 %v3623_v5, %v3622_v24 }
0x1a93   :  { %3375 = vrot.lane.b32.xlu0 %v2953_v28, %s10774_s29 }
0x1b02   :  { %v3205_v46 = vpop.xlane.xlu0 %3204 }
0x1b03   :  { %9115 = vrcp.f32 %v3205_v46  ;;  %v7793_v46 = vld [vmem:[%s10707_s8 + $0x28] sm:$0xff] }
0x1b06   :  { %v3208_v57 = vpop.xlane.xlu0 %3207 }
0x1b07   :  { %9117 = vrcp.f32 %v3208_v57  ;;  %v7794_v57 = vld [vmem:[%s10707_s8 + $0x30] sm:$0xff] }
0x1b0a   :  { %v3214_v59 = vpop.permute.xlu0 %3213 }
0x1b0b   :  { %8400 = vmatpush3.msra.mxu0 %v3214_v59  ;;  %v8856_v59 = vpack.c.bf16 %v7793_v46, %v7792_v56  ;;  %v3636_v56 = vld [vmem:[#allocation7 + $0xf0] sm:$0xff]  ;;  %v3637_v46 = vld [vmem:[#allocation7 + $0xf8] sm:$0xff] }
0x1b0c   :  { %8849 = vmatprep.subr.bf16.mxu0 %v8848_v7 }
0x1b0d   :  { %v9116_v60 = vpop.eup %9115  ;;  %8857 = vmatprep.subr.bf16.mxu1 %v8856_v59 }
0x1b0e   :  { %v9928_v62 = vmul.f32 %v9116_v60, %v9112_v38  ;;  %v3376_v21 = vpop.permute.xlu0 %3375  ;;  %v7795_v60 = vld [vmem:[%s10707_s8 + $0x38] sm:$0xff] }
0x1b0f   :  { %v3391_v28 = vsel %vm1585_vm4, %v3389_v26, %v3376_v21  ;;  %v3630_v21 = vld [vmem:[#allocation7 + $0xc0] sm:$0xff]  ;;  %v3631_v26 = vld [vmem:[#allocation7 + $0xc8] sm:$0xff] }
0x1b10   :  { %8402 = vmatmul.mubr.msk.f32.vlgmr.msra.gmra.mrb[26].mxu0 %vm235_vm2, %v9928_v62  ;;  %v8880_v27 = vpack.c.bf16 %v3631_v26, %v3630_v21 }
0x1b11   :  { %v9118_v2 = vpop.eup %9117  ;;  %8851 = vmatpush3.bf16.msra.mxu0 %v8848_v7  ;;  %v3624_v7 = vld [vmem:[#allocation7 + $0x90] sm:$0xff] }
0x1b12   :  { %v9932_v3 = vmul.f32 %v9118_v2, %v9114_v44  ;;  %8853 = vmatprep.subr.bf16.mxu0 %v8852_v12  ;;  %v8860_v2 = vpack.c.bf16 %v7795_v60, %v7794_v57  ;;  %v8892_v57 = vpack.c.bf16 %v3637_v46, %v3636_v56 }
0x1b14   :  { %8407 = vmatmul.mubr.msk.f32.vlgmr.msra.gmra.mrb[44].mxu1 %vm235_vm2, %v9932_v3 }
0x1b15   :  { %8855 = vmatpush3.bf16.msra.mxu0 %v8852_v12  ;;  %8859 = vmatpush3.bf16.msra.mxu1 %v8856_v59  ;;  %v8868_v12 = vpack.c.bf16 %v3625_v10, %v3624_v7  ;;  %v7799_v7 = vld [vmem:[%s10710_s11 + $0x1] ss:$0 sm:$0xff] }
0x1b16   :  { %8861 = vmatprep.subr.bf16.mxu1 %v8860_v2  ;;  %8865 = vmatprep.subr.bf16.mxu0 %v8864_v8 }
0x1b19   :  { %8863 = vmatpush3.bf16.msra.mxu1 %v8860_v2 }
0x1be3   :  { %v3285_v13 = vpop.f32.mrb[26].mxu0 }
0x1be4   :  { %3383 = vrot.lane.b32.xlu0 %v3285_v13, %s10775_s20  ;;  %v8403_v14 = vpop.f32.mrb[27].mxu0  ;;  %v3626_v13 = vld [vmem:[#allocation7 + $0xa0] sm:$0xff] }
0x1be5   :  { %v3627_v14 = vld [vmem:[#allocation7 + $0xa8] sm:$0xff] }
0x1be7   :  { %v3361_v15 = vpop.f32.mrb[44].mxu1 }
0x1be8   :  { %3385 = vrot.lane.b32.xlu1 %v3361_v15, %s10775_s20  ;;  %v8408_v17 = vpop.f32.mrb[45].mxu1  ;;  %v8872_v15 = vpack.c.bf16 %v3627_v14, %v3626_v13 }
0x1be9   :  { %v3628_v17 = vld [vmem:[#allocation7 + $0xb0] sm:$0xff] }
0x1bea   :  { %v8876_v9 = vpack.c.bf16 %v3629_v18, %v3628_v17 }
0x1c56   :  { %v3384_v29 = vpop.permute.xlu0 %3383 }
0x1c57   :  { %v3393_v30 = vsel %vm1588_vm3, %v3391_v28, %v3384_v29  ;;  %v3632_v28 = vld [vmem:[#allocation7 + $0xd0] sm:$0xff]  ;;  %v3633_v29 = vld [vmem:[#allocation7 + $0xd8] sm:$0xff] }
0x1c58   :  { %8417 = vmatprep.mubr.msk.f32.mxu0 %vm107_vm0, %v3393_v30  ;;  %v8884_v30 = vpack.c.bf16 %v3633_v29, %v3632_v28 }
0x1c5a   :  { %v3386_v32 = vpop.permute.xlu1 %3385 }
0x1c5b   :  { %v3394_v33 = vsel %vm1588_vm3, %v3392_v1, %v3386_v32  ;;  %v3635_v1 = vld [vmem:[#allocation7 + $0xe8] sm:$0xff] }
0x1c5c   :  { %8418 = vmatmul.mubr.msk.f32.vlgmr.msra.gmra.mrb[28].mxu0 %vm107_vm0, %v3394_v33  ;;  %v8888_v32 = vpack.c.bf16 %v3635_v1, %v3634_v31  ;;  %v3761_v1 = vld [vmem:[#allocation2 + $0x40] sm:$0xff] }
0x1c5d   :  { %8867 = vmatpush3.bf16.msra.mxu0 %v8864_v8 }
0x1c5e   :  { %8869 = vmatprep.subr.bf16.mxu0 %v8868_v12 }
0x1c61   :  { %8871 = vmatpush3.bf16.msra.mxu0 %v8868_v12 }
0x1c62   :  { %8873 = vmatprep.subr.bf16.mxu0 %v8872_v15 }
0x1c65   :  { %8875 = vmatpush3.bf16.msra.mxu0 %v8872_v15 }
0x1c66   :  { %8877 = vmatprep.subr.bf16.mxu0 %v8876_v9 }
0x1c69   :  { %8879 = vmatpush3.bf16.msra.mxu0 %v8876_v9 }
0x1c6a   :  { %8881 = vmatprep.subr.bf16.mxu0 %v8880_v27 }
0x1c6d   :  { %8883 = vmatpush3.bf16.msra.mxu0 %v8880_v27 }
0x1c6e   :  { %8885 = vmatprep.subr.bf16.mxu0 %v8884_v30 }
0x1c71   :  { %8887 = vmatpush3.bf16.msra.mxu0 %v8884_v30 }
0x1c72   :  { %8889 = vmatprep.subr.bf16.mxu0 %v8888_v32 }
0x1c75   :  { %8891 = vmatpush3.bf16.msra.mxu0 %v8888_v32  ;;  %v3762_v32 = vld [vmem:[#allocation2 + $0x48] sm:$0xff] }
0x1c76   :  { %8893 = vmatprep.subr.bf16.mxu0 %v8892_v57 }
0x1c79   :  { %8895 = vmatpush3.bf16.msra.mxu0 %v8892_v57 }
0x1c7a   :  { %8507 = vmatprep.subr.mxu0 %v9306_v36 }
0x1d2f   :  { %v8419_v34 = vpop.f32.mrb[28].mxu0 }
0x1d30   :  { %v3483_v35 = vadd.f32 %v8419_v34, %v7787_v61  ;;  %v3477_v41 = vpop.f32.mrb[29].mxu0 }
0x1d31   :  { %v3478_v42 = vadd.f32 %v7787_v61, %v3477_v41 }
0x1d32   :  { %v9952_v45 = vadd.f32 %v3483_v35, %v9742_v37 }
0x1d33   :  { %v9955_v63 = vadd.f32 %v3478_v42, %v9745_v47 }
0x1d34   :  { %v3493_v48 = vsel %vm107_vm0, %v9952_v45, 0.0 }
0x1d35   :  { %3494 = vadd.xlane.f32.xlu1 %v3493_v48  ;;  %v3490_v49 = vsel %vm107_vm0, %v9955_v63, 0.0 }
0x1d36   :  { %3491 = vadd.xlane.f32.xlu0 %v3490_v49  ;;  %v7790_v49 = vld [vmem:[%s10705_s6 + $0x1] ss:$0 sm:$0xff] }
0x1dc2   :  { %v3495_v50 = vpop.xlane.xlu1 %3494 }
0x1dc3   :  { %v3497_v51 = vmul.f32 0.03125, %v3495_v50  ;;  %v3492_v52 = vpop.xlane.xlu0 %3491 }
0x1dc4   :  { %v3496_v54 = vmul.f32 0.03125, %v3492_v52 }
0x1dc5   :  { %v9962_v25 = vsub.f32 %v9952_v45, %v3497_v51  ;;  %v7791_v51 = vld [vmem:[%s10706_s7 + $0x1] ss:$0 sm:$0xff] }
0x1dc6   :  { %v3498_v37 = vsub.f32 %v9955_v63, %v3496_v54 }
0x1dc7   :  { %v3501_v23 = vmul.f32 %v9962_v25, %v9962_v25 }
0x1dc8   :  { %v3500_v38 = vmul.f32 %v3498_v37, %v3498_v37 }
0x1dc9   :  { %v3505_v44 = vsel %vm107_vm0, %v3501_v23, 0.0 }
0x1dca   :  { %v3502_v47 = vsel %vm107_vm0, %v3500_v38, 0.0 }
0x1dcb   :  { %3503 = vadd.xlane.f32.xlu0 %v3502_v47 }
0x1dcf   :  { %3506 = vadd.xlane.f32.xlu0 %v3505_v44 }
0x1e58   :  { %v3504_v33 = vpop.xlane.xlu0 %3503 }
0x1e59   :  { %v3508_v61 = vmul.f32 0.03125, %v3504_v33  ;;  %v3763_v33 = vld [vmem:[#allocation2 + $0x50] sm:$0xff] }
0x1e5b   :  { %v3510_v34 = vadd.f32 1e-05, %v3508_v61  ;;  %v8896_v61 = vpack.c.bf16 %v3762_v32, %v3761_v1 }
0x1e5c   :  { %v3507_v35 = vpop.xlane.xlu0 %3506 }
0x1e5d   :  { %9119 = vrsqrt.f32 %v3510_v34  ;;  %v3509_v41 = vmul.f32 0.03125, %v3507_v35  ;;  %v3764_v34 = vld [vmem:[#allocation2 + $0x58] sm:$0xff]  ;;  %8897 = vmatprep.subr.bf16.mxu1 %v8896_v61 }
0x1e5e   :  { %v8900_v35 = vpack.c.bf16 %v3764_v34, %v3763_v33 }
0x1e5f   :  { %v3511_v42 = vadd.f32 1e-05, %v3509_v41 }
0x1e61   :  { %9121 = vrsqrt.f32 %v3511_v42 }
0x1e67   :  { %v9120_v48 = vpop.eup %9119 }
0x1e68   :  { %v3514_v50 = vmul.f32 %v9120_v48, %v3498_v37  ;;  %v7796_v37 = vld [vmem:[%s10708_s9 + $0x1] ss:$0 sm:$0xff] }
0x1e6a   :  { %v3520_v52 = vmul.f32 %v7790_v49, %v3514_v50 }
0x1e6b   :  { %v9122_v54 = vpop.eup %9121 }
0x1e6c   :  { %v3515_v38 = vmul.f32 %v9122_v54, %v9962_v25  ;;  %v3526_v47 = vadd.f32 %v7791_v51, %v3520_v52  ;;  %v7800_v54 = vld [vmem:[%s10767_s0 + $0x2] ss:$0 sm:$0xff] }
0x1e6e   :  { %v3521_v23 = vmul.f32 %v7790_v49, %v3515_v38  ;;  %8428 = vmatprep.mubr.msk.f32.mxu1 %vm107_vm0, %v3526_v47 }
0x1e70   :  { %v3527_v44 = vadd.f32 %v7791_v51, %v3521_v23 }
0x1e72   :  { %8429 = vmatmul.mubr.msk.f32.vlgmr.msra.gmra.mrb[46].mxu1 %vm107_vm0, %v3527_v44  ;;  %v7801_v44 = vld [vmem:[%s10768_s24 + $0x2] ss:$0 sm:$0xff] }
0x1e73   :  { %8899 = vmatpush3.bf16.msra.mxu1 %v8896_v61 }
0x1e74   :  { %8901 = vmatprep.subr.bf16.mxu1 %v8900_v35 }
0x1e77   :  { %8903 = vmatpush3.bf16.msra.mxu1 %v8900_v35 }
0x1e78   :  { %8477 = vmatprep.subr.mxu1 %v9306_v36 }
0x1f45   :  { %v8430_v59 = vpop.f32.mrb[46].mxu1 }
0x1f46   :  { %v3616_v25 = vadd.f32 %v8430_v59, %v7796_v37  ;;  %v3610_v60 = vpop.f32.mrb[47].mxu1 }
0x1f47   :  { %v3611_v2 = vadd.f32 %v7796_v37, %v3610_v60 }
0x1f48   :  { %v3620_v5 = vmax.f32 %v3616_v25, 0.0 }
0x1f49   :  { %v3619_v24 = vmax.f32 %v3611_v2, 0.0 }
0x1f4b   :  { %8463 = vmatprep.mubr.f32.mxu0 %v3619_v24 }
0x1f4c   :  { %8464 = vmatmul.mubr.f32.vlgmr.msra.gmra.mrb[30].mxu0 %v3620_v5 }
0x1f4d   :  { %8509 = vmatprep.mubr.msk.f32.mxu0 %vm9307_vm1, %v9306_v36 }
0x201f   :  { %v8465_v8 = vpop.f32.mrb[30].mxu0 }
0x2020   :  { %v3715_v10 = vadd.f32 %v8465_v8, %v7799_v7  ;;  %v3709_v12 = vpop.f32.mrb[31].mxu0 }
0x2021   :  { %v3710_v13 = vadd.f32 %v7799_v7, %v3709_v12 }
0x2022   :  { %v10000_v14 = vadd.f32 %v3715_v10, %v9952_v45 }
0x2023   :  { %v10003_v15 = vadd.f32 %v3710_v13, %v9955_v63 }
0x2024   :  { %v3725_v17 = vsel %vm107_vm0, %v10000_v14, 0.0 }
0x2025   :  { %3726 = vadd.xlane.f32.xlu1 %v3725_v17  ;;  %v3722_v18 = vsel %vm107_vm0, %v10003_v15, 0.0 }
0x2026   :  { %3723 = vadd.xlane.f32.xlu0 %v3722_v18 }
0x20b2   :  { %v3727_v9 = vpop.xlane.xlu1 %3726 }
0x20b3   :  { %v3729_v21 = vmul.f32 0.03125, %v3727_v9  ;;  %v3724_v26 = vpop.xlane.xlu0 %3723 }
0x20b4   :  { %v3728_v27 = vmul.f32 0.03125, %v3724_v26 }
0x20b5   :  { %v3731_v28 = vsub.f32 %v10000_v14, %v3729_v21 }
0x20b6   :  { %v3730_v45 = vsub.f32 %v10003_v15, %v3728_v27 }
0x20b7   :  { %v3733_v29 = vmul.f32 %v3731_v28, %v3731_v28 }
0x20b8   :  { %v3732_v30 = vmul.f32 %v3730_v45, %v3730_v45 }
0x20b9   :  { %v3737_v63 = vsel %vm107_vm0, %v3733_v29, 0.0 }
0x20ba   :  { %3738 = vadd.xlane.f32.xlu1 %v3737_v63  ;;  %v3734_v31 = vsel %vm107_vm0, %v3732_v30, 0.0 }
0x20bb   :  { %3735 = vadd.xlane.f32.xlu0 %v3734_v31 }
0x2147   :  { %v3739_v41 = vpop.xlane.xlu1 %3738 }
0x2148   :  { %v3741_v42 = vmul.f32 0.03125, %v3739_v41  ;;  %v3736_v48 = vpop.xlane.xlu0 %3735 }
0x2149   :  { %v3740_v49 = vmul.f32 0.03125, %v3736_v48 }
0x214a   :  { %v3743_v50 = vadd.f32 1e-05, %v3741_v42 }
0x214b   :  { %v3742_v51 = vadd.f32 1e-05, %v3740_v49 }
0x214c   :  { %9123 = vrsqrt.f32 %v3743_v50 }
0x214d   :  { %9125 = vrsqrt.f32 %v3742_v51 }
0x2156   :  { %v9124_v52 = vpop.eup %9123 }
0x2157   :  { %v9126_v38 = vpop.eup %9125  ;;  %v3747_v47 = vmul.f32 %v9124_v52, %v3731_v28 }
0x2158   :  { %v3746_v23 = vmul.f32 %v9126_v38, %v3730_v45 }
0x2159   :  { %v3753_v56 = vmul.f32 %v7800_v54, %v3747_v47 }
0x215a   :  { %v3752_v46 = vmul.f32 %v7800_v54, %v3746_v23 }
0x215b   :  { %v3759_v37 = vadd.f32 %v7801_v44, %v3753_v56 }
0x215c   :  { %v3758_v57 = vadd.f32 %v7801_v44, %v3752_v46 }
0x215e   :  { %8474 = vmatprep.mubr.msk.f32.mxu1 %vm107_vm0, %v3758_v57 }
0x215f   :  { %8475 = vmatmul.mubr.msk.f32.vlgmr.msra.gmra.mrb[48].mxu1 %vm107_vm0, %v3759_v37 }
0x2160   :  { %8479 = vmatprep.mubr.msk.f32.mxu1 %vm9307_vm1, %v9306_v36 }
0x2232   :  { %v10024_v59 = vpop.f32.mrb[48].mxu1 }
0x2233   :  { %3924 = vrot.lane.b32.xlu1 %v10024_v59, %s10776_s22  ;;  %v10028_v25 = vpop.f32.mrb[49].mxu1 }
0x2234   :  { %3847 = vrot.lane.b32.xlu0 %v10028_v25, %s10776_s22 }
0x22a5   :  { %v3925_v2 = vpop.permute.xlu1 %3924 }
0x22a6   :  { %v3848_v60 = vpop.permute.xlu0 %3847 }
0x22a7   :  { %8478 = vmatpush3.xpose.msk.msra.mxu1 %vm235_vm2, %v3848_v60 }
0x22a8   :  { %8482 = vmatprep.subr.mxu1 %v9306_v36 }
0x22aa   :  { %8480 = vmatmul.mubr.msk.f32.vlgmr.msra.gmra.mrb[50].mxu1 %vm235_vm2, %v10028_v25 }
0x22ab   :  { %8483 = vmatpush3.xpose.msk.msra.mxu1 %vm235_vm2, %v3925_v2  ;;  %8484 = vmatprep.mubr.msk.f32.mxu1 %vm9307_vm1, %v9306_v36 }
0x22ac   :  { %8487 = vmatprep.subr.mxu1 %v9306_v36 }
0x22ae   :  { %8485 = vmatmul.mubr.msk.f32.vlgmr.msra.gmra.mrb[52].mxu1 %vm235_vm2, %v10024_v59 }
0x22af   :  { %8489 = vmatprep.mubr.msk.f32.mxu1 %vm9307_vm1, %v9306_v36 }
0x237d   :  { %v3919_v24 = vpop.f32.mrb[50].mxu1 }
0x237e   :  { %v4000_v5 = vmul.f32 0.35355338, %v3919_v24  ;;  %v8481_v7 = vpop.f32.mrb[51].mxu1 }
0x2380   :  { %v4002_v8 = vsel %vm235_vm2, %v4000_v5, -inf }
0x2381   :  { %4003 = vmax.xlane.f32.xlu1 %v4002_v8  ;;  %v3996_v10 = vpop.f32.mrb[52].mxu1 }
0x2382   :  { %v4001_v12 = vmul.f32 0.35355338, %v3996_v10  ;;  %v8486_v13 = vpop.f32.mrb[53].mxu1 }
0x2384   :  { %v4005_v17 = vsel %vm235_vm2, %v4001_v12, -inf }
0x2385   :  { %4006 = vmax.xlane.f32.xlu0 %v4005_v17 }
0x2392   :  { %4100 = vrot.lane.b32.xlu1 %v10024_v59, %s10777_s4 }
0x2396   :  { %4178 = vrot.lane.b32.xlu1 %v10028_v25, %s10778_s30 }
0x239a   :  { %4176 = vrot.lane.b32.xlu1 %v10028_v25, %s10779_s1 }
0x240e   :  { %v4004_v18 = vpop.xlane.xlu1 %4003 }
0x240f   :  { %v4008_v9 = vsub.f32 %v4000_v5, %v4004_v18 }
0x2411   :  { %v4010_v21 = vmul.f32 1.442695, %v4008_v9 }
0x2412   :  { %v4007_v26 = vpop.xlane.xlu0 %4006  ;;  %v4101_v31 = vpop.permute.xlu1 %4100 }
0x2413   :  { %9127 = vpow2.f32 %v4010_v21  ;;  %v4009_v27 = vsub.f32 %v4001_v12, %v4007_v26 }
0x2415   :  { %v4012_v28 = vmul.f32 1.442695, %v4009_v27 }
0x2416   :  { %v4179_v1 = vpop.permute.xlu1 %4178 }
0x2417   :  { %9129 = vpow2.f32 %v4012_v28 }
0x241a   :  { %v4177_v32 = vpop.permute.xlu1 %4176 }
0x241d   :  { %v9128_v45 = vpop.eup %9127 }
0x241e   :  { %v4014_v29 = vsel %vm235_vm2, %v9128_v45, 0.0 }
0x241f   :  { %4015 = vadd.xlane.f32.xlu0 %v4014_v29 }
0x2421   :  { %v9130_v30 = vpop.eup %9129 }
0x2422   :  { %v4017_v63 = vsel %vm235_vm2, %v9130_v30, 0.0 }
0x2423   :  { %4018 = vadd.xlane.f32.xlu1 %v4017_v63 }
0x2434   :  { %4254 = vrot.lane.b32.xlu1 %v10024_v59, %s10779_s1 }
0x2435   :  { %4024 = vrot.lane.b32.xlu0 %v10028_v25, %s10777_s4 }
0x2439   :  { %4256 = vrot.lane.b32.xlu0 %v10024_v59, %s10778_s30 }
0x24ac   :  { %v4016_v33 = vpop.xlane.xlu0 %4015 }
0x24ad   :  { %9131 = vrcp.f32 %v4016_v33 }
0x24b0   :  { %v4019_v61 = vpop.xlane.xlu1 %4018  ;;  %v4025_v34 = vpop.permute.xlu0 %4024 }
0x24b1   :  { %9133 = vrcp.f32 %v4019_v61  ;;  %8488 = vmatpush3.msra.mxu1 %v4025_v34 }
0x24b2   :  { %8492 = vmatprep.subr.mxu1 %v9306_v36 }
0x24b4   :  { %v4257_v49 = vpop.permute.xlu0 %4256  ;;  %v4255_v50 = vpop.permute.xlu1 %4254 }
0x24b7   :  { %v9132_v35 = vpop.eup %9131 }
0x24b8   :  { %v10061_v41 = vmul.f32 %v9132_v35, %v9128_v45 }
0x24ba   :  { %8490 = vmatmul.mubr.msk.f32.vlgmr.msra.gmra.mrb[54].mxu1 %vm235_vm2, %v10061_v41 }
0x24bb   :  { %v9134_v42 = vpop.eup %9133  ;;  %8493 = vmatpush3.msra.mxu1 %v4101_v31  ;;  %8494 = vmatprep.mubr.msk.f32.mxu1 %vm9307_vm1, %v9306_v36 }
0x24bc   :  { %v10067_v48 = vmul.f32 %v9134_v42, %v9130_v30  ;;  %8497 = vmatprep.subr.mxu1 %v9306_v36 }
0x24be   :  { %8495 = vmatmul.mubr.msk.f32.vlgmr.msra.gmra.mrb[56].mxu1 %vm235_vm2, %v10067_v48 }
0x24bf   :  { %8499 = vmatprep.mubr.msk.f32.mxu1 %vm9307_vm1, %v9306_v36 }
0x24c2   :  { %8498 = vmatpush3.xpose.msk.msra.mxu1 %vm235_vm2, %v4179_v1 }
0x24c3   :  { %8502 = vmatprep.subr.mxu1 %v9306_v36 }
0x24c5   :  { %8500 = vmatmul.mubr.msk.f32.vlgmr.msra.gmra.mrb[58].mxu1 %vm235_vm2, %v4177_v32 }
0x24c6   :  { %8503 = vmatpush3.xpose.msk.msra.mxu1 %vm235_vm2, %v4257_v49  ;;  %8504 = vmatprep.mubr.msk.f32.mxu1 %vm9307_vm1, %v9306_v36 }
0x24c7   :  { %8512 = vmatprep.subr.mxu1 %v9306_v36 }
0x24c9   :  { %8505 = vmatmul.mubr.msk.f32.vlgmr.msra.gmra.mrb[60].mxu1 %vm235_vm2, %v4255_v50 }
0x24ca   :  { %8514 = vmatprep.mubr.msk.f32.mxu1 %vm9307_vm1, %v9306_v36 }
0x258d   :  { %v10084_v51 = vpop.f32.mrb[54].mxu1 }
0x258e   :  { %v8491_v52 = vpop.f32.mrb[55].mxu1 }
0x2591   :  { %v10086_v54 = vpop.f32.mrb[56].mxu1 }
0x2592   :  { %v8496_v38 = vpop.f32.mrb[57].mxu1 }
0x2598   :  { %v4250_v47 = vpop.f32.mrb[58].mxu1 }
0x2599   :  { %v4332_v23 = vmul.f32 0.35355338, %v4250_v47  ;;  %v8501_v44 = vpop.f32.mrb[59].mxu1 }
0x259b   :  { %v4334_v56 = vsel %vm235_vm2, %v4332_v23, -inf }
0x259c   :  { %4335 = vmax.xlane.f32.xlu0 %v4334_v56  ;;  %v4328_v46 = vpop.f32.mrb[60].mxu1 }
0x259d   :  { %v4333_v57 = vmul.f32 0.35355338, %v4328_v46  ;;  %v8506_v37 = vpop.f32.mrb[61].mxu1 }
0x259f   :  { %v4337_v60 = vsel %vm235_vm2, %v4333_v57, -inf }
0x25a0   :  { %4338 = vmax.xlane.f32.xlu1 %v4337_v60 }
0x25b1   :  { %4432 = vrot.lane.b32.xlu1 %v10024_v59, %s10780_s25 }
0x25b2   :  { %4356 = vrot.lane.b32.xlu0 %v10028_v25, %s10780_s25 }
0x25b5   :  { %4510 = vrot.lane.b32.xlu1 %v10028_v25, %s10781_s3 }
0x25b9   :  { %4588 = vrot.lane.b32.xlu1 %v10024_v59, %s10781_s3 }
0x25bd   :  { %4586 = vrot.lane.b32.xlu1 %v10024_v59, %s10782_s26 }
0x2629   :  { %v4336_v2 = vpop.xlane.xlu0 %4335 }
0x262a   :  { %v4340_v24 = vsub.f32 %v4332_v23, %v4336_v2 }
0x262c   :  { %v4342_v5 = vmul.f32 1.442695, %v4340_v24 }
0x262d   :  { %v4357_v7 = vpop.permute.xlu0 %4356  ;;  %v4339_v8 = vpop.xlane.xlu1 %4338 }
0x262e   :  { %9135 = vpow2.f32 %v4342_v5  ;;  %v4341_v10 = vsub.f32 %v4333_v57, %v4339_v8  ;;  %8508 = vmatpush3.msra.mxu0 %v4357_v7 }
0x262f   :  { %8517 = vmatprep.subr.mxu0 %v9306_v36 }
0x2630   :  { %v4344_v12 = vmul.f32 1.442695, %v4341_v10 }
0x2631   :  { %v4433_v13 = vpop.permute.xlu1 %4432 }
0x2632   :  { %9137 = vpow2.f32 %v4344_v12  ;;  %8513 = vmatpush3.msra.mxu1 %v4433_v13 }
0x2633   :  { %8522 = vmatprep.subr.mxu1 %v9306_v36 }
0x2635   :  { %v4511_v28 = vpop.permute.xlu1 %4510 }
0x2638   :  { %v9136_v17 = vpop.eup %9135 }
0x2639   :  { %v4346_v18 = vsel %vm235_vm2, %v9136_v17, 0.0  ;;  %v4589_v63 = vpop.permute.xlu1 %4588 }
0x263a   :  { %4347 = vadd.xlane.f32.xlu0 %v4346_v18 }
0x263c   :  { %v9138_v9 = vpop.eup %9137 }
0x263d   :  { %v4349_v21 = vsel %vm235_vm2, %v9138_v9, 0.0  ;;  %v4587_v32 = vpop.permute.xlu1 %4586 }
0x263e   :  { %4350 = vadd.xlane.f32.xlu0 %v4349_v21 }
0x2654   :  { %4508 = vrot.lane.b32.xlu0 %v10028_v25, %s10782_s26 }
0x26c7   :  { %v4348_v26 = vpop.xlane.xlu0 %4347 }
0x26c8   :  { %9139 = vrcp.f32 %v4348_v26 }
0x26cb   :  { %v4351_v27 = vpop.xlane.xlu0 %4350 }
0x26cc   :  { %9141 = vrcp.f32 %v4351_v27 }
0x26cf   :  { %v4509_v1 = vpop.permute.xlu0 %4508 }
0x26d2   :  { %v9140_v45 = vpop.eup %9139 }
0x26d3   :  { %v10106_v29 = vmul.f32 %v9140_v45, %v9136_v17 }
0x26d5   :  { %8510 = vmatmul.mubr.msk.f32.vlgmr.msra.gmra.mrb[32].mxu0 %vm235_vm2, %v10106_v29 }
0x26d6   :  { %v9142_v30 = vpop.eup %9141  ;;  %8518 = vmatpush3.xpose.msk.msra.mxu0 %vm235_vm2, %v4511_v28  ;;  %8519 = vmatprep.mubr.msk.f32.mxu0 %vm9307_vm1, %v9306_v36 }
0x26d7   :  { %v10113_v31 = vmul.f32 %v9142_v30, %v9138_v9  ;;  %8527 = vmatprep.subr.mxu0 %v9306_v36 }
0x26d9   :  { %8515 = vmatmul.mubr.msk.f32.vlgmr.msra.gmra.mrb[62].mxu1 %vm235_vm2, %v10113_v31  ;;  %8520 = vmatmul.mubr.msk.f32.vlgmr.msra.gmra.mrb[34].mxu0 %vm235_vm2, %v4509_v1 }
0x26da   :  { %8523 = vmatpush3.xpose.msk.msra.mxu1 %vm235_vm2, %v4589_v63  ;;  %8524 = vmatprep.mubr.msk.f32.mxu1 %vm9307_vm1, %v9306_v36 }
0x26db   :  { %8532 = vmatprep.subr.mxu1 %v9306_v36  ;;  %8529 = vmatprep.mubr.msk.f32.mxu0 %vm9307_vm1, %v9306_v36 }
0x26dd   :  { %8525 = vmatmul.mubr.msk.f32.vlgmr.msra.gmra.mrb[64].mxu1 %vm235_vm2, %v4587_v32 }
0x26de   :  { %8534 = vmatprep.mubr.msk.f32.mxu1 %vm9307_vm1, %v9306_v36 }
0x27a8   :  { %v10128_v33 = vpop.f32.mrb[32].mxu0 }
0x27a9   :  { %v8511_v61 = vpop.f32.mrb[33].mxu0 }
0x27ac   :  { %v10130_v34 = vpop.f32.mrb[62].mxu1  ;;  %v4582_v35 = vpop.f32.mrb[34].mxu0 }
0x27ad   :  { %v4664_v42 = vmul.f32 0.35355338, %v4582_v35  ;;  %v8516_v49 = vpop.f32.mrb[63].mxu1  ;;  %v8521_v50 = vpop.f32.mrb[35].mxu0 }
0x27af   :  { %v4666_v52 = vsel %vm235_vm2, %v4664_v42, -inf }
0x27b0   :  { %4667 = vmax.xlane.f32.xlu0 %v4666_v52  ;;  %v4660_v38 = vpop.f32.mrb[64].mxu1 }
0x27b1   :  { %v4665_v47 = vmul.f32 0.35355338, %v4660_v38  ;;  %v8526_v23 = vpop.f32.mrb[65].mxu1 }
0x27b3   :  { %v4669_v44 = vsel %vm235_vm2, %v4665_v47, -inf }
0x27b4   :  { %4670 = vmax.xlane.f32.xlu1 %v4669_v44 }
0x27c5   :  { %4764 = vrot.lane.b32.xlu1 %v10024_v59, %s10769_s10 }
0x27c6   :  { %4688 = vrot.lane.b32.xlu0 %v10028_v25, %s10769_s10 }
0x27c9   :  { %4842 = vrot.lane.b32.xlu1 %v10028_v25, %s10770_s27 }
0x27cd   :  { %4920 = vrot.lane.b32.xlu1 %v10024_v59, %s10770_s27 }
0x27d1   :  { %4918 = vrot.lane.b32.xlu1 %v10024_v59, %s10771_s2 }
0x283d   :  { %v4668_v56 = vpop.xlane.xlu0 %4667 }
0x283e   :  { %v4672_v46 = vsub.f32 %v4664_v42, %v4668_v56 }
0x2840   :  { %v4674_v57 = vmul.f32 1.442695, %v4672_v46 }
0x2841   :  { %v4689_v37 = vpop.permute.xlu0 %4688  ;;  %v4671_v60 = vpop.xlane.xlu1 %4670 }
0x2842   :  { %9143 = vpow2.f32 %v4674_v57  ;;  %v4673_v2 = vsub.f32 %v4665_v47, %v4671_v60  ;;  %8528 = vmatpush3.msra.mxu0 %v4689_v37 }
0x2843   :  { %8537 = vmatprep.subr.mxu0 %v9306_v36 }
0x2844   :  { %v4676_v24 = vmul.f32 1.442695, %v4673_v2 }
0x2845   :  { %v4765_v5 = vpop.permute.xlu1 %4764 }
0x2846   :  { %9145 = vpow2.f32 %v4676_v24  ;;  %8533 = vmatpush3.msra.mxu1 %v4765_v5 }
0x2847   :  { %8542 = vmatprep.subr.mxu1 %v9306_v36 }
0x2849   :  { %v4843_v18 = vpop.permute.xlu1 %4842 }
0x284c   :  { %v9144_v7 = vpop.eup %9143 }
0x284d   :  { %v4678_v8 = vsel %vm235_vm2, %v9144_v7, 0.0  ;;  %v4921_v27 = vpop.permute.xlu1 %4920 }
0x284e   :  { %4679 = vadd.xlane.f32.xlu0 %v4678_v8 }
0x2850   :  { %v9146_v10 = vpop.eup %9145 }
0x2851   :  { %v4681_v12 = vsel %vm235_vm2, %v9146_v10, 0.0  ;;  %v4919_v30 = vpop.permute.xlu1 %4918 }
0x2852   :  { %4682 = vadd.xlane.f32.xlu0 %v4681_v12 }
0x2868   :  { %4840 = vrot.lane.b32.xlu0 %v10028_v25, %s10771_s2 }
0x28db   :  { %v4680_v13 = vpop.xlane.xlu0 %4679 }
0x28dc   :  { %9147 = vrcp.f32 %v4680_v13 }
0x28df   :  { %v4683_v17 = vpop.xlane.xlu0 %4682 }
0x28e0   :  { %9149 = vrcp.f32 %v4683_v17 }
0x28e3   :  { %v4841_v45 = vpop.permute.xlu0 %4840 }
0x28e6   :  { %v9148_v9 = vpop.eup %9147 }
0x28e7   :  { %v10150_v21 = vmul.f32 %v9148_v9, %v9144_v7 }
0x28e9   :  { %8530 = vmatmul.mubr.msk.f32.vlgmr.msra.gmra.mrb[36].mxu0 %vm235_vm2, %v10150_v21 }
0x28ea   :  { %v9150_v26 = vpop.eup %9149  ;;  %8538 = vmatpush3.xpose.msk.msra.mxu0 %vm235_vm2, %v4843_v18  ;;  %8539 = vmatprep.mubr.msk.f32.mxu0 %vm9307_vm1, %v9306_v36  ;;  %v5204_v18 = vld [vmem:[#allocation5 + $0x48] sm:$0xff] }
0x28eb   :  { %v10157_v28 = vmul.f32 %v9150_v26, %v9146_v10  ;;  %8547 = vmatprep.subr.mxu0 %v9306_v36  ;;  %v5205_v26 = vld [vmem:[#allocation5 + $0x50] sm:$0xff] }
0x28ed   :  { %8535 = vmatmul.mubr.msk.f32.vlgmr.msra.gmra.mrb[66].mxu1 %vm235_vm2, %v10157_v28  ;;  %8540 = vmatmul.mubr.msk.f32.vlgmr.msra.gmra.mrb[38].mxu0 %vm235_vm2, %v4841_v45 }
0x28ee   :  { %8543 = vmatpush3.xpose.msk.msra.mxu1 %vm235_vm2, %v4921_v27  ;;  %8544 = vmatprep.mubr.msk.f32.mxu1 %vm9307_vm1, %v9306_v36  ;;  %v5206_v27 = vld [vmem:[#allocation5 + $0x58] sm:$0xff] }
0x28ef   :  { %8552 = vmatprep.subr.mxu1 %v9306_v36  ;;  %8549 = vmatprep.mubr.msk.f32.mxu0 %vm9307_vm1, %v9306_v36  ;;  %v8908_v45 = vpack.c.bf16 %v5206_v27, %v5205_v26  ;;  %v7834_v26 = vld [vmem:[%s10707_s8 + $0x48] sm:$0xff] }
0x28f1   :  { %8545 = vmatmul.mubr.msk.f32.vlgmr.msra.gmra.mrb[68].mxu1 %vm235_vm2, %v4919_v30 }
0x28f2   :  { %8554 = vmatprep.mubr.msk.f32.mxu1 %vm9307_vm1, %v9306_v36 }
0x29bc   :  { %v4760_v63 = vpop.f32.mrb[36].mxu0 }
0x29bd   :  { %v8531_v1 = vpop.f32.mrb[37].mxu0 }
0x29c0   :  { %v4836_v32 = vpop.f32.mrb[66].mxu1  ;;  %v4914_v61 = vpop.f32.mrb[38].mxu0 }
0x29c1   :  { %v4996_v35 = vmul.f32 0.35355338, %v4914_v61  ;;  %v8536_v42 = vpop.f32.mrb[67].mxu1  ;;  %v8541_v49 = vpop.f32.mrb[39].mxu0 }
0x29c3   :  { %v4998_v50 = vsel %vm235_vm2, %v4996_v35, -inf }
0x29c4   :  { %4999 = vmax.xlane.f32.xlu0 %v4998_v50  ;;  %v4992_v52 = vpop.f32.mrb[68].mxu1 }
0x29c5   :  { %v4997_v38 = vmul.f32 0.35355338, %v4992_v52  ;;  %v8546_v47 = vpop.f32.mrb[69].mxu1 }
0x29c7   :  { %v5001_v23 = vsel %vm235_vm2, %v4997_v38, -inf }
0x29c8   :  { %5002 = vmax.xlane.f32.xlu1 %v5001_v23 }
0x29d9   :  { %5096 = vrot.lane.b32.xlu1 %v10024_v59, %s10772_s23 }
0x29dd   :  { %5174 = vrot.lane.b32.xlu1 %v10128_v33, %s10773_s28 }
0x29e1   :  { %5176 = vrot.lane.b32.xlu1 %v10130_v34, %s10773_s28 }
0x29e5   :  { %5184 = vrot.lane.b32.xlu1 %v4836_v32, %s10774_s29 }
0x2a51   :  { %v5000_v44 = vpop.xlane.xlu0 %4999 }
0x2a52   :  { %v5004_v56 = vsub.f32 %v4996_v35, %v5000_v44 }
0x2a54   :  { %v5006_v46 = vmul.f32 1.442695, %v5004_v56 }
0x2a55   :  { %v5003_v57 = vpop.xlane.xlu1 %5002 }
0x2a56   :  { %9151 = vpow2.f32 %v5006_v46  ;;  %v5005_v37 = vsub.f32 %v4997_v38, %v5003_v57 }
0x2a58   :  { %v5008_v60 = vmul.f32 1.442695, %v5005_v37 }
0x2a59   :  { %v5097_v2 = vpop.permute.xlu1 %5096 }
0x2a5a   :  { %9153 = vpow2.f32 %v5008_v60  ;;  %8553 = vmatpush3.msra.mxu1 %v5097_v2 }
0x2a5d   :  { %v5175_v61 = vpop.permute.xlu1 %5174 }
0x2a5e   :  { %v5196_v49 = vsel %vm235_vm2, %v10084_v51, %v5175_v61  ;;  %v7828_v51 = vld [vmem:[%s10704_s5 + $0x2] ss:$0 sm:$0xff]  ;;  %v5431_v61 = vld [vmem:[#allocation7 + $0x110] sm:$0xff] }
0x2a60   :  { %v9152_v24 = vpop.eup %9151 }
0x2a61   :  { %v5010_v59 = vsel %vm235_vm2, %v9152_v24, 0.0  ;;  %v5177_v35 = vpop.permute.xlu1 %5176 }
0x2a62   :  { %5011 = vadd.xlane.f32.xlu0 %v5010_v59  ;;  %v5197_v23 = vsel %vm235_vm2, %v10086_v54, %v5177_v35 }
0x2a64   :  { %v9154_v33 = vpop.eup %9153 }
0x2a65   :  { %v5013_v5 = vsel %vm235_vm2, %v9154_v33, 0.0  ;;  %v5185_v50 = vpop.permute.xlu1 %5184 }
0x2a66   :  { %5014 = vadd.xlane.f32.xlu0 %v5013_v5  ;;  %v5199_v44 = vsel %vm1585_vm4, %v5197_v23, %v5185_v50  ;;  %v5433_v50 = vld [vmem:[#allocation7 + $0x120] sm:$0xff]  ;;  %v5436_v23 = vld [vmem:[#allocation7 + $0x138] sm:$0xff] }
0x2a7c   :  { %5020 = vrot.lane.b32.xlu0 %v10028_v25, %s10772_s23  ;;  %v5203_v25 = vld [vmem:[#allocation5 + $0x40] sm:$0xff] }
0x2a7d   :  { %v8904_v9 = vpack.c.bf16 %v5204_v18, %v5203_v25 }
0x2a80   :  { %5182 = vrot.lane.b32.xlu0 %v4760_v63, %s10774_s29 }
0x2aef   :  { %v5012_v34 = vpop.xlane.xlu0 %5011 }
0x2af0   :  { %9155 = vrcp.f32 %v5012_v34 }
0x2af3   :  { %v5015_v7 = vpop.xlane.xlu0 %5014 }
0x2af4   :  { %9157 = vrcp.f32 %v5015_v7 }
0x2af7   :  { %v5021_v8 = vpop.permute.xlu0 %5020 }
0x2af8   :  { %8548 = vmatpush3.msra.mxu0 %v5021_v8 }
0x2af9   :  { %8905 = vmatprep.subr.bf16.mxu0 %v8904_v9 }
0x2afa   :  { %v9156_v10 = vpop.eup %9155 }
0x2afb   :  { %v10186_v12 = vmul.f32 %v9156_v10, %v9152_v24  ;;  %v5183_v42 = vpop.permute.xlu0 %5182 }
0x2afc   :  { %v5198_v52 = vsel %vm1585_vm4, %v5196_v49, %v5183_v42  ;;  %v5432_v42 = vld [vmem:[#allocation7 + $0x118] sm:$0xff] }
0x2afd   :  { %8550 = vmatmul.mubr.msk.f32.vlgmr.msra.gmra.mrb[40].mxu0 %vm235_vm2, %v10186_v12  ;;  %v8924_v49 = vpack.c.bf16 %v5432_v42, %v5431_v61  ;;  %v5443_v61 = vld [vmem:[#allocation7 + $0x170] sm:$0xff] }
0x2afe   :  { %v9158_v13 = vpop.eup %9157  ;;  %8907 = vmatpush3.bf16.msra.mxu0 %v8904_v9  ;;  %v7833_v9 = vld [vmem:[%s10707_s8 + $0x40] sm:$0xff] }
0x2aff   :  { %v10190_v17 = vmul.f32 %v9158_v13, %v9154_v33  ;;  %8909 = vmatprep.subr.bf16.mxu0 %v8908_v45  ;;  %v8912_v27 = vpack.c.bf16 %v7834_v26, %v7833_v9  ;;  %v7832_v26 = vld [vmem:[%s10706_s7 + $0x2] ss:$0 sm:$0xff] }
0x2b01   :  { %8555 = vmatmul.mubr.msk.f32.vlgmr.msra.gmra.mrb[70].mxu1 %vm235_vm2, %v10190_v17  ;;  %8913 = vmatprep.subr.bf16.mxu1 %v8912_v27 }
0x2b02   :  { %8911 = vmatpush3.bf16.msra.mxu0 %v8908_v45  ;;  %8915 = vmatpush3.bf16.msra.mxu1 %v8912_v27  ;;  %v7835_v45 = vld [vmem:[%s10707_s8 + $0x50] sm:$0xff] }
0x2bd0   :  { %v5092_v30 = vpop.f32.mrb[40].mxu0 }
0x2bd1   :  { %5190 = vrot.lane.b32.xlu0 %v5092_v30, %s10775_s20  ;;  %v8551_v63 = vpop.f32.mrb[41].mxu0  ;;  %v7836_v30 = vld [vmem:[%s10707_s8 + $0x58] sm:$0xff] }
0x2bd2   :  { %v8916_v63 = vpack.c.bf16 %v7836_v30, %v7835_v45 }
0x2bd4   :  { %v5168_v1 = vpop.f32.mrb[70].mxu1  ;;  %8917 = vmatprep.subr.bf16.mxu1 %v8916_v63 }
0x2bd5   :  { %5192 = vrot.lane.b32.xlu1 %v5168_v1, %s10775_s20  ;;  %v8556_v32 = vpop.f32.mrb[71].mxu1  ;;  %8919 = vmatpush3.bf16.msra.mxu1 %v8916_v63  ;;  %v5429_v1 = vld [vmem:[#allocation7 + $0x100] sm:$0xff] }
0x2bd6   :  { %v5430_v32 = vld [vmem:[#allocation7 + $0x108] sm:$0xff] }
0x2bd7   :  { %v8920_v35 = vpack.c.bf16 %v5430_v32, %v5429_v1 }
0x2bd9   :  { %8921 = vmatprep.subr.bf16.mxu0 %v8920_v35 }
0x2c43   :  { %v5191_v38 = vpop.permute.xlu0 %5190 }
0x2c44   :  { %v5200_v47 = vsel %vm1588_vm3, %v5198_v52, %v5191_v38  ;;  %v5434_v52 = vld [vmem:[#allocation7 + $0x128] sm:$0xff] }
0x2c45   :  { %8565 = vmatprep.mubr.msk.f32.mxu0 %vm107_vm0, %v5200_v47  ;;  %v8928_v38 = vpack.c.bf16 %v5434_v52, %v5433_v50  ;;  %v5435_v47 = vld [vmem:[#allocation7 + $0x130] sm:$0xff] }
0x2c47   :  { %v5193_v56 = vpop.permute.xlu1 %5192 }
0x2c48   :  { %v5201_v46 = vsel %vm1588_vm3, %v5199_v44, %v5193_v56  ;;  %v8932_v44 = vpack.c.bf16 %v5436_v23, %v5435_v47  ;;  %v5437_v56 = vld [vmem:[#allocation7 + $0x140] sm:$0xff] }
0x2c49   :  { %8566 = vmatmul.mubr.msk.f32.vlgmr.msra.gmra.mrb[42].mxu0 %vm107_vm0, %v5201_v46  ;;  %v5438_v46 = vld [vmem:[#allocation7 + $0x148] sm:$0xff]  ;;  %v7840_v23 = vld [vmem:[%s10710_s11 + $0x2] ss:$0 sm:$0xff] }
0x2c4a   :  { %8923 = vmatpush3.bf16.msra.mxu0 %v8920_v35  ;;  %v5444_v35 = vld [vmem:[#allocation7 + $0x178] sm:$0xff] }
0x2c4b   :  { %8925 = vmatprep.subr.bf16.mxu0 %v8924_v49  ;;  %v8948_v42 = vpack.c.bf16 %v5444_v35, %v5443_v61 }
0x2c4e   :  { %8927 = vmatpush3.bf16.msra.mxu0 %v8924_v49 }
0x2c4f   :  { %8929 = vmatprep.subr.bf16.mxu0 %v8928_v38 }
0x2c52   :  { %8931 = vmatpush3.bf16.msra.mxu0 %v8928_v38 }
0x2c53   :  { %8933 = vmatprep.subr.bf16.mxu0 %v8932_v44 }
0x2c56   :  { %8935 = vmatpush3.bf16.msra.mxu0 %v8932_v44 }
0x2d1c   :  { %v8567_v57 = vpop.f32.mrb[42].mxu0 }
0x2d1d   :  { %v5290_v37 = vadd.f32 %v8567_v57, %v7828_v51  ;;  %v5284_v60 = vpop.f32.mrb[43].mxu0  ;;  %v5439_v57 = vld [vmem:[#allocation7 + $0x150] sm:$0xff] }
0x2d1e   :  { %v5285_v2 = vadd.f32 %v7828_v51, %v5284_v60  ;;  %v8936_v51 = vpack.c.bf16 %v5438_v46, %v5437_v56 }
0x2d1f   :  { %v10210_v24 = vadd.f32 %v5290_v37, %v10000_v14  ;;  %v5440_v37 = vld [vmem:[#allocation7 + $0x158] sm:$0xff] }
0x2d20   :  { %v10213_v54 = vadd.f32 %v5285_v2, %v10003_v15  ;;  %8937 = vmatprep.subr.bf16.mxu0 %v8936_v51  ;;  %v8940_v60 = vpack.c.bf16 %v5440_v37, %v5439_v57  ;;  %v5441_v2 = vld [vmem:[#allocation7 + $0x160] sm:$0xff] }
0x2d21   :  { %v5300_v59 = vsel %vm107_vm0, %v10210_v24, 0.0  ;;  %8939 = vmatpush3.bf16.msra.mxu0 %v8936_v51 }
0x2d22   :  { %5301 = vadd.xlane.f32.xlu1 %v5300_v59  ;;  %v5297_v33 = vsel %vm107_vm0, %v10213_v54, 0.0  ;;  %v5442_v59 = vld [vmem:[#allocation7 + $0x168] sm:$0xff]  ;;  %8941 = vmatprep.subr.bf16.mxu0 %v8940_v60 }
0x2d23   :  { %5298 = vadd.xlane.f32.xlu0 %v5297_v33  ;;  %v8944_v33 = vpack.c.bf16 %v5442_v59, %v5441_v2 }
0x2d25   :  { %8943 = vmatpush3.bf16.msra.mxu0 %v8940_v60 }
0x2d26   :  { %8945 = vmatprep.subr.bf16.mxu0 %v8944_v33 }
0x2d29   :  { %8947 = vmatpush3.bf16.msra.mxu0 %v8944_v33 }
0x2d2a   :  { %8949 = vmatprep.subr.bf16.mxu0 %v8948_v42 }
0x2d2d   :  { %8951 = vmatpush3.bf16.msra.mxu0 %v8948_v42 }
0x2d2e   :  { %8655 = vmatprep.subr.mxu0 %v9306_v36 }
0x2daf   :  { %v5302_v5 = vpop.xlane.xlu1 %5301 }
0x2db0   :  { %v5304_v34 = vmul.f32 0.03125, %v5302_v5  ;;  %v5299_v7 = vpop.xlane.xlu0 %5298 }
0x2db1   :  { %v5303_v8 = vmul.f32 0.03125, %v5299_v7 }
0x2db2   :  { %v10220_v10 = vsub.f32 %v10210_v24, %v5304_v34 }
0x2db3   :  { %v5305_v14 = vsub.f32 %v10213_v54, %v5303_v8 }
0x2db4   :  { %v5308_v25 = vmul.f32 %v10220_v10, %v10220_v10 }
0x2db5   :  { %v5307_v13 = vmul.f32 %v5305_v14, %v5305_v14 }
0x2db6   :  { %v5312_v18 = vsel %vm107_vm0, %v5308_v25, 0.0 }
0x2db7   :  { %v5309_v15 = vsel %vm107_vm0, %v5307_v13, 0.0 }
0x2db8   :  { %5310 = vadd.xlane.f32.xlu0 %v5309_v15 }
0x2dbc   :  { %5313 = vadd.xlane.f32.xlu0 %v5312_v18  ;;  %v7831_v18 = vld [vmem:[%s10705_s6 + $0x2] ss:$0 sm:$0xff] }
0x2e45   :  { %v5311_v5 = vpop.xlane.xlu0 %5310 }
0x2e46   :  { %v5315_v34 = vmul.f32 0.03125, %v5311_v5 }
0x2e48   :  { %v5317_v7 = vadd.f32 1e-05, %v5315_v34 }
0x2e49   :  { %v5314_v8 = vpop.xlane.xlu0 %5313 }
0x2e4a   :  { %9159 = vrsqrt.f32 %v5317_v7  ;;  %v5316_v13 = vmul.f32 0.03125, %v5314_v8 }
0x2e4c   :  { %v5318_v15 = vadd.f32 1e-05, %v5316_v13 }
0x2e4e   :  { %9161 = vrsqrt.f32 %v5318_v15 }
0x2e54   :  { %v9160_v25 = vpop.eup %9159 }
0x2e55   :  { %v5321_v9 = vmul.f32 %v9160_v25, %v5305_v14  ;;  %v7837_v14 = vld [vmem:[%s10708_s9 + $0x2] ss:$0 sm:$0xff] }
0x2e56   :  { %v5568_v25 = vld [vmem:[#allocation2 + $0x60] sm:$0xff] }
0x2e57   :  { %v5327_v27 = vmul.f32 %v7831_v18, %v5321_v9 }
0x2e58   :  { %v9162_v45 = vpop.eup %9161 }
0x2e59   :  { %v5322_v30 = vmul.f32 %v9162_v45, %v10220_v10  ;;  %v5333_v63 = vadd.f32 %v7832_v26, %v5327_v27  ;;  %v5571_v27 = vld [vmem:[#allocation2 + $0x78] sm:$0xff] }
0x2e5b   :  { %v5328_v1 = vmul.f32 %v7831_v18, %v5322_v30  ;;  %8576 = vmatprep.mubr.msk.f32.mxu1 %vm107_vm0, %v5333_v63  ;;  %v5569_v18 = vld [vmem:[#allocation2 + $0x68] sm:$0xff] }
0x2e5c   :  { %v8952_v9 = vpack.c.bf16 %v5569_v18, %v5568_v25 }
0x2e5d   :  { %v5334_v32 = vadd.f32 %v7832_v26, %v5328_v1  ;;  %v5570_v26 = vld [vmem:[#allocation2 + $0x70] sm:$0xff] }
0x2e5e   :  { %8953 = vmatprep.subr.bf16.mxu1 %v8952_v9  ;;  %v8956_v45 = vpack.c.bf16 %v5571_v27, %v5570_v26 }
0x2e5f   :  { %8577 = vmatmul.mubr.msk.f32.vlgmr.msra.gmra.mrb[72].mxu1 %vm107_vm0, %v5334_v32 }
0x2e60   :  { %8955 = vmatpush3.bf16.msra.mxu1 %v8952_v9 }
0x2e61   :  { %8957 = vmatprep.subr.bf16.mxu1 %v8956_v45 }
0x2e64   :  { %8959 = vmatpush3.bf16.msra.mxu1 %v8956_v45 }
0x2e65   :  { %8625 = vmatprep.subr.mxu1 %v9306_v36 }
0x2f32   :  { %v8578_v49 = vpop.f32.mrb[72].mxu1 }
0x2f33   :  { %v5423_v10 = vadd.f32 %v8578_v49, %v7837_v14  ;;  %v5417_v50 = vpop.f32.mrb[73].mxu1 }
0x2f34   :  { %v5418_v52 = vadd.f32 %v7837_v14, %v5417_v50  ;;  %v7841_v14 = vld [vmem:[%s10767_s0 + $0x3] ss:$0 sm:$0xff] }
0x2f35   :  { %v5427_v47 = vmax.f32 %v5423_v10, 0.0 }
0x2f36   :  { %v5426_v38 = vmax.f32 %v5418_v52, 0.0  ;;  %v7842_v52 = vld [vmem:[%s10768_s24 + $0x3] ss:$0 sm:$0xff] }
0x2f38   :  { %8611 = vmatprep.mubr.f32.mxu0 %v5426_v38 }
0x2f39   :  { %8612 = vmatmul.mubr.f32.vlgmr.msra.gmra.mrb[44].mxu0 %v5427_v47 }
0x2f3a   :  { %8657 = vmatprep.mubr.msk.f32.mxu0 %vm9307_vm1, %v9306_v36 }
0x300c   :  { %v8613_v44 = vpop.f32.mrb[44].mxu0 }
0x300d   :  { %v5522_v56 = vadd.f32 %v8613_v44, %v7840_v23  ;;  %v5516_v46 = vpop.f32.mrb[45].mxu0 }
0x300e   :  { %v5517_v51 = vadd.f32 %v7840_v23, %v5516_v46 }
0x300f   :  { %v10258_v57 = vadd.f32 %v5522_v56, %v10210_v24 }
0x3010   :  { %v10261_v37 = vadd.f32 %v5517_v51, %v10213_v54 }
0x3011   :  { %v5532_v60 = vsel %vm107_vm0, %v10258_v57, 0.0 }
0x3012   :  { %5533 = vadd.xlane.f32.xlu1 %v5532_v60  ;;  %v5529_v2 = vsel %vm107_vm0, %v10261_v37, 0.0 }
0x3013   :  { %5530 = vadd.xlane.f32.xlu0 %v5529_v2 }
0x309f   :  { %v5534_v59 = vpop.xlane.xlu1 %5533 }
0x30a0   :  { %v5536_v33 = vmul.f32 0.03125, %v5534_v59  ;;  %v5531_v5 = vpop.xlane.xlu0 %5530 }
0x30a1   :  { %v5535_v34 = vmul.f32 0.03125, %v5531_v5 }
0x30a2   :  { %v5538_v7 = vsub.f32 %v10258_v57, %v5536_v33 }
0x30a3   :  { %v5537_v24 = vsub.f32 %v10261_v37, %v5535_v34 }
0x30a4   :  { %v5540_v8 = vmul.f32 %v5538_v7, %v5538_v7 }
0x30a5   :  { %v5539_v13 = vmul.f32 %v5537_v24, %v5537_v24 }
0x30a6   :  { %v5544_v54 = vsel %vm107_vm0, %v5540_v8, 0.0 }
0x30a7   :  { %5545 = vadd.xlane.f32.xlu1 %v5544_v54  ;;  %v5541_v15 = vsel %vm107_vm0, %v5539_v13, 0.0 }
0x30a8   :  { %5542 = vadd.xlane.f32.xlu0 %v5541_v15 }
0x3134   :  { %v5546_v30 = vpop.xlane.xlu1 %5545 }
0x3135   :  { %v5548_v63 = vmul.f32 0.03125, %v5546_v30  ;;  %v5543_v1 = vpop.xlane.xlu0 %5542 }
0x3136   :  { %v5547_v32 = vmul.f32 0.03125, %v5543_v1 }
0x3137   :  { %v5550_v61 = vadd.f32 1e-05, %v5548_v63 }
0x3138   :  { %v5549_v35 = vadd.f32 1e-05, %v5547_v32 }
0x3139   :  { %9163 = vrsqrt.f32 %v5550_v61 }
0x313a   :  { %9165 = vrsqrt.f32 %v5549_v35 }
0x3143   :  { %v9164_v42 = vpop.eup %9163 }
0x3144   :  { %v9166_v49 = vpop.eup %9165  ;;  %v5554_v10 = vmul.f32 %v9164_v42, %v5538_v7 }
0x3145   :  { %v5553_v50 = vmul.f32 %v9166_v49, %v5537_v24 }
0x3146   :  { %v5560_v38 = vmul.f32 %v7841_v14, %v5554_v10 }
0x3147   :  { %v5559_v47 = vmul.f32 %v7841_v14, %v5553_v50 }
0x3148   :  { %v5566_v44 = vadd.f32 %v7842_v52, %v5560_v38 }
0x3149   :  { %v5565_v23 = vadd.f32 %v7842_v52, %v5559_v47 }
0x314b   :  { %8622 = vmatprep.mubr.msk.f32.mxu1 %vm107_vm0, %v5565_v23 }
0x314c   :  { %8623 = vmatmul.mubr.msk.f32.vlgmr.msra.gmra.mrb[74].mxu1 %vm107_vm0, %v5566_v44 }
0x314d   :  { %8627 = vmatprep.mubr.msk.f32.mxu1 %vm9307_vm1, %v9306_v36 }
0x321f   :  { %v10282_v56 = vpop.f32.mrb[74].mxu1 }
0x3220   :  { %5731 = vrot.lane.b32.xlu1 %v10282_v56, %s10776_s22  ;;  %v10286_v46 = vpop.f32.mrb[75].mxu1 }
0x3221   :  { %5654 = vrot.lane.b32.xlu0 %v10286_v46, %s10776_s22 }
0x3292   :  { %v5732_v60 = vpop.permute.xlu1 %5731 }
0x3293   :  { %v5655_v51 = vpop.permute.xlu0 %5654 }
0x3294   :  { %8626 = vmatpush3.xpose.msk.msra.mxu1 %vm235_vm2, %v5655_v51 }
0x3295   :  { %8630 = vmatprep.subr.mxu1 %v9306_v36 }
0x3297   :  { %8628 = vmatmul.mubr.msk.f32.vlgmr.msra.gmra.mrb[76].mxu1 %vm235_vm2, %v10286_v46 }
0x3298   :  { %8631 = vmatpush3.xpose.msk.msra.mxu1 %vm235_vm2, %v5732_v60  ;;  %8632 = vmatprep.mubr.msk.f32.mxu1 %vm9307_vm1, %v9306_v36 }
0x3299   :  { %8635 = vmatprep.subr.mxu1 %v9306_v36 }
0x329b   :  { %8633 = vmatmul.mubr.msk.f32.vlgmr.msra.gmra.mrb[78].mxu1 %vm235_vm2, %v10282_v56 }
0x329c   :  { %8637 = vmatprep.mubr.msk.f32.mxu1 %vm9307_vm1, %v9306_v36 }
0x336a   :  { %v5726_v2 = vpop.f32.mrb[76].mxu1 }
0x336b   :  { %v5807_v59 = vmul.f32 0.35355338, %v5726_v2  ;;  %v8629_v33 = vpop.f32.mrb[77].mxu1 }
0x336d   :  { %v5809_v5 = vsel %vm235_vm2, %v5807_v59, -inf }
0x336e   :  { %5810 = vmax.xlane.f32.xlu1 %v5809_v5  ;;  %v5803_v34 = vpop.f32.mrb[78].mxu1 }
0x336f   :  { %v5808_v7 = vmul.f32 0.35355338, %v5803_v34  ;;  %v8634_v24 = vpop.f32.mrb[79].mxu1 }
0x3371   :  { %v5812_v8 = vsel %vm235_vm2, %v5808_v7, -inf }
0x3372   :  { %5813 = vmax.xlane.f32.xlu0 %v5812_v8 }
0x337f   :  { %5907 = vrot.lane.b32.xlu1 %v10282_v56, %s10777_s4 }
0x3383   :  { %5985 = vrot.lane.b32.xlu1 %v10286_v46, %s10778_s30 }
0x3387   :  { %5983 = vrot.lane.b32.xlu1 %v10286_v46, %s10779_s1 }
0x33fb   :  { %v5811_v13 = vpop.xlane.xlu1 %5810 }
0x33fc   :  { %v5815_v54 = vsub.f32 %v5807_v59, %v5811_v13 }
0x33fe   :  { %v5817_v15 = vmul.f32 1.442695, %v5815_v54 }
0x33ff   :  { %v5814_v25 = vpop.xlane.xlu0 %5813  ;;  %v5908_v63 = vpop.permute.xlu1 %5907 }
0x3400   :  { %9167 = vpow2.f32 %v5817_v15  ;;  %v5816_v18 = vsub.f32 %v5808_v7, %v5814_v25 }
0x3402   :  { %v5819_v9 = vmul.f32 1.442695, %v5816_v18 }
0x3403   :  { %v5986_v1 = vpop.permute.xlu1 %5985 }
0x3404   :  { %9169 = vpow2.f32 %v5819_v9 }
0x3407   :  { %v5984_v32 = vpop.permute.xlu1 %5983 }
0x340a   :  { %v9168_v26 = vpop.eup %9167 }
0x340b   :  { %v5821_v27 = vsel %vm235_vm2, %v9168_v26, 0.0 }
0x340c   :  { %5822 = vadd.xlane.f32.xlu0 %v5821_v27 }
0x340e   :  { %v9170_v45 = vpop.eup %9169 }
0x340f   :  { %v5824_v30 = vsel %vm235_vm2, %v9170_v45, 0.0 }
0x3410   :  { %5825 = vadd.xlane.f32.xlu1 %v5824_v30 }
0x3421   :  { %6061 = vrot.lane.b32.xlu1 %v10282_v56, %s10779_s1 }
0x3422   :  { %5831 = vrot.lane.b32.xlu0 %v10286_v46, %s10777_s4 }
0x3426   :  { %6063 = vrot.lane.b32.xlu0 %v10282_v56, %s10778_s30 }
0x3499   :  { %v5823_v61 = vpop.xlane.xlu0 %5822 }
0x349a   :  { %9171 = vrcp.f32 %v5823_v61 }
0x349d   :  { %v5826_v35 = vpop.xlane.xlu1 %5825  ;;  %v5832_v42 = vpop.permute.xlu0 %5831 }
0x349e   :  { %9173 = vrcp.f32 %v5826_v35  ;;  %8636 = vmatpush3.msra.mxu1 %v5832_v42 }
0x349f   :  { %8640 = vmatprep.subr.mxu1 %v9306_v36 }
0x34a1   :  { %v6064_v52 = vpop.permute.xlu0 %6063  ;;  %v6062_v38 = vpop.permute.xlu1 %6061 }
0x34a4   :  { %v9172_v14 = vpop.eup %9171 }
0x34a5   :  { %v10319_v49 = vmul.f32 %v9172_v14, %v9168_v26 }
0x34a7   :  { %8638 = vmatmul.mubr.msk.f32.vlgmr.msra.gmra.mrb[80].mxu1 %vm235_vm2, %v10319_v49 }
0x34a8   :  { %v9174_v10 = vpop.eup %9173  ;;  %8641 = vmatpush3.msra.mxu1 %v5908_v63  ;;  %8642 = vmatprep.mubr.msk.f32.mxu1 %vm9307_vm1, %v9306_v36 }
0x34a9   :  { %v10325_v50 = vmul.f32 %v9174_v10, %v9170_v45  ;;  %8645 = vmatprep.subr.mxu1 %v9306_v36 }
0x34ab   :  { %8643 = vmatmul.mubr.msk.f32.vlgmr.msra.gmra.mrb[82].mxu1 %vm235_vm2, %v10325_v50 }
0x34ac   :  { %8647 = vmatprep.mubr.msk.f32.mxu1 %vm9307_vm1, %v9306_v36 }
0x34af   :  { %8646 = vmatpush3.xpose.msk.msra.mxu1 %vm235_vm2, %v5986_v1 }
0x34b0   :  { %8650 = vmatprep.subr.mxu1 %v9306_v36 }
0x34b2   :  { %8648 = vmatmul.mubr.msk.f32.vlgmr.msra.gmra.mrb[84].mxu1 %vm235_vm2, %v5984_v32 }
0x34b3   :  { %8651 = vmatpush3.xpose.msk.msra.mxu1 %vm235_vm2, %v6064_v52  ;;  %8652 = vmatprep.mubr.msk.f32.mxu1 %vm9307_vm1, %v9306_v36 }
0x34b4   :  { %8660 = vmatprep.subr.mxu1 %v9306_v36 }
0x34b6   :  { %8653 = vmatmul.mubr.msk.f32.vlgmr.msra.gmra.mrb[86].mxu1 %vm235_vm2, %v6062_v38 }
0x34b7   :  { %8662 = vmatprep.mubr.msk.f32.mxu1 %vm9307_vm1, %v9306_v36 }
0x357a   :  { %v10342_v47 = vpop.f32.mrb[80].mxu1 }
0x357b   :  { %v8639_v23 = vpop.f32.mrb[81].mxu1 }
0x357e   :  { %v10344_v44 = vpop.f32.mrb[82].mxu1 }
0x357f   :  { %v8644_v51 = vpop.f32.mrb[83].mxu1 }
0x3585   :  { %v6057_v60 = vpop.f32.mrb[84].mxu1 }
0x3586   :  { %v6139_v2 = vmul.f32 0.35355338, %v6057_v60  ;;  %v8649_v59 = vpop.f32.mrb[85].mxu1 }
0x3588   :  { %v6141_v33 = vsel %vm235_vm2, %v6139_v2, -inf }
0x3589   :  { %6142 = vmax.xlane.f32.xlu0 %v6141_v33  ;;  %v6135_v5 = vpop.f32.mrb[86].mxu1 }
0x358a   :  { %v6140_v34 = vmul.f32 0.35355338, %v6135_v5  ;;  %v8654_v7 = vpop.f32.mrb[87].mxu1 }
0x358c   :  { %v6144_v24 = vsel %vm235_vm2, %v6140_v34, -inf }
0x358d   :  { %6145 = vmax.xlane.f32.xlu1 %v6144_v24 }
0x359e   :  { %6239 = vrot.lane.b32.xlu1 %v10282_v56, %s10780_s25 }
0x359f   :  { %6163 = vrot.lane.b32.xlu0 %v10286_v46, %s10780_s25 }
0x35a2   :  { %6317 = vrot.lane.b32.xlu1 %v10286_v46, %s10781_s3 }
0x35a6   :  { %6395 = vrot.lane.b32.xlu1 %v10282_v56, %s10781_s3 }
0x35aa   :  { %6393 = vrot.lane.b32.xlu1 %v10282_v56, %s10782_s26 }
0x3616   :  { %v6143_v8 = vpop.xlane.xlu0 %6142 }
0x3617   :  { %v6147_v13 = vsub.f32 %v6139_v2, %v6143_v8 }
0x3619   :  { %v6149_v54 = vmul.f32 1.442695, %v6147_v13 }
0x361a   :  { %v6164_v15 = vpop.permute.xlu0 %6163  ;;  %v6146_v25 = vpop.xlane.xlu1 %6145 }
0x361b   :  { %9175 = vpow2.f32 %v6149_v54  ;;  %v6148_v18 = vsub.f32 %v6140_v34, %v6146_v25  ;;  %8656 = vmatpush3.msra.mxu0 %v6164_v15 }
0x361c   :  { %8665 = vmatprep.subr.mxu0 %v9306_v36 }
0x361d   :  { %v6151_v9 = vmul.f32 1.442695, %v6148_v18 }
0x361e   :  { %v6240_v26 = vpop.permute.xlu1 %6239 }
0x361f   :  { %9177 = vpow2.f32 %v6151_v9  ;;  %8661 = vmatpush3.msra.mxu1 %v6240_v26 }
0x3620   :  { %8670 = vmatprep.subr.mxu1 %v9306_v36 }
0x3622   :  { %v6318_v61 = vpop.permute.xlu1 %6317 }
0x3625   :  { %v9176_v27 = vpop.eup %9175 }
0x3626   :  { %v6153_v45 = vsel %vm235_vm2, %v9176_v27, 0.0  ;;  %v6396_v10 = vpop.permute.xlu1 %6395 }
0x3627   :  { %6154 = vadd.xlane.f32.xlu0 %v6153_v45 }
0x3629   :  { %v9178_v30 = vpop.eup %9177 }
0x362a   :  { %v6156_v63 = vsel %vm235_vm2, %v9178_v30, 0.0  ;;  %v6394_v23 = vpop.permute.xlu1 %6393 }
0x362b   :  { %6157 = vadd.xlane.f32.xlu0 %v6156_v63 }
0x3641   :  { %6315 = vrot.lane.b32.xlu0 %v10286_v46, %s10782_s26 }
0x36b4   :  { %v6155_v1 = vpop.xlane.xlu0 %6154 }
0x36b5   :  { %9179 = vrcp.f32 %v6155_v1 }
0x36b8   :  { %v6158_v32 = vpop.xlane.xlu0 %6157 }
0x36b9   :  { %9181 = vrcp.f32 %v6158_v32 }
0x36bc   :  { %v6316_v38 = vpop.permute.xlu0 %6315 }
0x36bf   :  { %v9180_v35 = vpop.eup %9179 }
0x36c0   :  { %v10364_v42 = vmul.f32 %v9180_v35, %v9176_v27 }
0x36c2   :  { %8658 = vmatmul.mubr.msk.f32.vlgmr.msra.gmra.mrb[46].mxu0 %vm235_vm2, %v10364_v42 }
0x36c3   :  { %v9182_v14 = vpop.eup %9181  ;;  %8666 = vmatpush3.xpose.msk.msra.mxu0 %vm235_vm2, %v6318_v61  ;;  %8667 = vmatprep.mubr.msk.f32.mxu0 %vm9307_vm1, %v9306_v36 }
0x36c4   :  { %v10371_v52 = vmul.f32 %v9182_v14, %v9178_v30  ;;  %8675 = vmatprep.subr.mxu0 %v9306_v36 }
0x36c6   :  { %8663 = vmatmul.mubr.msk.f32.vlgmr.msra.gmra.mrb[88].mxu1 %vm235_vm2, %v10371_v52  ;;  %8668 = vmatmul.mubr.msk.f32.vlgmr.msra.gmra.mrb[48].mxu0 %vm235_vm2, %v6316_v38 }
0x36c7   :  { %8671 = vmatpush3.xpose.msk.msra.mxu1 %vm235_vm2, %v6396_v10  ;;  %8672 = vmatprep.mubr.msk.f32.mxu1 %vm9307_vm1, %v9306_v36 }
0x36c8   :  { %8680 = vmatprep.subr.mxu1 %v9306_v36  ;;  %8677 = vmatprep.mubr.msk.f32.mxu0 %vm9307_vm1, %v9306_v36 }
0x36ca   :  { %8673 = vmatmul.mubr.msk.f32.vlgmr.msra.gmra.mrb[90].mxu1 %vm235_vm2, %v6394_v23 }
0x36cb   :  { %8682 = vmatprep.mubr.msk.f32.mxu1 %vm9307_vm1, %v9306_v36 }
0x3795   :  { %v10386_v51 = vpop.f32.mrb[46].mxu0 }
0x3796   :  { %v8659_v60 = vpop.f32.mrb[47].mxu0 }
0x3799   :  { %v10388_v2 = vpop.f32.mrb[88].mxu1  ;;  %v6389_v59 = vpop.f32.mrb[48].mxu0 }
0x379a   :  { %v6471_v33 = vmul.f32 0.35355338, %v6389_v59  ;;  %v8664_v5 = vpop.f32.mrb[89].mxu1  ;;  %v8669_v34 = vpop.f32.mrb[49].mxu0 }
0x379c   :  { %v6473_v7 = vsel %vm235_vm2, %v6471_v33, -inf }
0x379d   :  { %6474 = vmax.xlane.f32.xlu0 %v6473_v7  ;;  %v6467_v24 = vpop.f32.mrb[90].mxu1 }
0x379e   :  { %v6472_v8 = vmul.f32 0.35355338, %v6467_v24  ;;  %v8674_v13 = vpop.f32.mrb[91].mxu1 }
0x37a0   :  { %v6476_v54 = vsel %vm235_vm2, %v6472_v8, -inf }
0x37a1   :  { %6477 = vmax.xlane.f32.xlu1 %v6476_v54 }
0x37b2   :  { %6571 = vrot.lane.b32.xlu1 %v10282_v56, %s10769_s10 }
0x37b3   :  { %6495 = vrot.lane.b32.xlu0 %v10286_v46, %s10769_s10 }
0x37b6   :  { %6649 = vrot.lane.b32.xlu1 %v10286_v46, %s10770_s27 }
0x37ba   :  { %6727 = vrot.lane.b32.xlu1 %v10282_v56, %s10770_s27 }
0x37be   :  { %6725 = vrot.lane.b32.xlu1 %v10282_v56, %s10771_s2 }
0x382a   :  { %v6475_v15 = vpop.xlane.xlu0 %6474 }
0x382b   :  { %v6479_v25 = vsub.f32 %v6471_v33, %v6475_v15 }
0x382d   :  { %v6481_v18 = vmul.f32 1.442695, %v6479_v25 }
0x382e   :  { %v6496_v9 = vpop.permute.xlu0 %6495  ;;  %v6478_v26 = vpop.xlane.xlu1 %6477 }
0x382f   :  { %9183 = vpow2.f32 %v6481_v18  ;;  %v6480_v27 = vsub.f32 %v6472_v8, %v6478_v26  ;;  %8676 = vmatpush3.msra.mxu0 %v6496_v9 }
0x3830   :  { %8685 = vmatprep.subr.mxu0 %v9306_v36 }
0x3831   :  { %v6483_v45 = vmul.f32 1.442695, %v6480_v27 }
0x3832   :  { %v6572_v30 = vpop.permute.xlu1 %6571 }
0x3833   :  { %9185 = vpow2.f32 %v6483_v45  ;;  %8681 = vmatpush3.msra.mxu1 %v6572_v30 }
0x3834   :  { %8690 = vmatprep.subr.mxu1 %v9306_v36 }
0x3836   :  { %v6650_v10 = vpop.permute.xlu1 %6649 }
0x3839   :  { %v9184_v63 = vpop.eup %9183 }
0x383a   :  { %v6485_v1 = vsel %vm235_vm2, %v9184_v63, 0.0  ;;  %v6728_v59 = vpop.permute.xlu1 %6727 }
0x383b   :  { %6486 = vadd.xlane.f32.xlu0 %v6485_v1 }
0x383d   :  { %v9186_v32 = vpop.eup %9185 }
0x383e   :  { %v6488_v61 = vsel %vm235_vm2, %v9186_v32, 0.0  ;;  %v6726_v34 = vpop.permute.xlu1 %6725 }
0x383f   :  { %6489 = vadd.xlane.f32.xlu0 %v6488_v61 }
0x3855   :  { %6647 = vrot.lane.b32.xlu0 %v10286_v46, %s10771_s2 }
0x38c8   :  { %v6487_v35 = vpop.xlane.xlu0 %6486 }
0x38c9   :  { %9187 = vrcp.f32 %v6487_v35 }
0x38cc   :  { %v6490_v14 = vpop.xlane.xlu0 %6489 }
0x38cd   :  { %9189 = vrcp.f32 %v6490_v14 }
0x38d0   :  { %v6648_v5 = vpop.permute.xlu0 %6647 }
0x38d3   :  { %v9188_v38 = vpop.eup %9187 }
0x38d4   :  { %v10408_v23 = vmul.f32 %v9188_v38, %v9184_v63 }
0x38d6   :  { %8678 = vmatmul.mubr.msk.f32.vlgmr.msra.gmra.mrb[50].mxu0 %vm235_vm2, %v10408_v23 }
0x38d7   :  { %v9190_v60 = vpop.eup %9189  ;;  %8686 = vmatpush3.xpose.msk.msra.mxu0 %vm235_vm2, %v6650_v10  ;;  %8687 = vmatprep.mubr.msk.f32.mxu0 %vm9307_vm1, %v9306_v36 }
0x38d8   :  { %v10415_v33 = vmul.f32 %v9190_v60, %v9186_v32  ;;  %8695 = vmatprep.subr.mxu0 %v9306_v36 }
0x38da   :  { %8683 = vmatmul.mubr.msk.f32.vlgmr.msra.gmra.mrb[92].mxu1 %vm235_vm2, %v10415_v33  ;;  %8688 = vmatmul.mubr.msk.f32.vlgmr.msra.gmra.mrb[52].mxu0 %vm235_vm2, %v6648_v5 }
0x38db   :  { %8691 = vmatpush3.xpose.msk.msra.mxu1 %vm235_vm2, %v6728_v59  ;;  %8692 = vmatprep.mubr.msk.f32.mxu1 %vm9307_vm1, %v9306_v36 }
0x38dc   :  { %8700 = vmatprep.subr.mxu1 %v9306_v36  ;;  %8697 = vmatprep.mubr.msk.f32.mxu0 %vm9307_vm1, %v9306_v36 }
0x38de   :  { %8693 = vmatmul.mubr.msk.f32.vlgmr.msra.gmra.mrb[94].mxu1 %vm235_vm2, %v6726_v34 }
0x38df   :  { %8702 = vmatprep.mubr.msk.f32.mxu1 %vm9307_vm1, %v9306_v36 }
0x39a9   :  { %v6567_v7 = vpop.f32.mrb[50].mxu0 }
0x39aa   :  { %v8679_v24 = vpop.f32.mrb[51].mxu0 }
0x39ad   :  { %v6643_v8 = vpop.f32.mrb[92].mxu1  ;;  %v6721_v13 = vpop.f32.mrb[52].mxu0 }
0x39ae   :  { %v6803_v54 = vmul.f32 0.35355338, %v6721_v13  ;;  %v8684_v15 = vpop.f32.mrb[93].mxu1  ;;  %v8689_v25 = vpop.f32.mrb[53].mxu0 }
0x39af   :  { %v7013_v15 = vld [vmem:[#allocation5 + $0x78] sm:$0xff] }
0x39b0   :  { %v6805_v18 = vsel %vm235_vm2, %v6803_v54, -inf }
0x39b1   :  { %6806 = vmax.xlane.f32.xlu0 %v6805_v18  ;;  %v6799_v9 = vpop.f32.mrb[94].mxu1 }
0x39b2   :  { %v6804_v26 = vmul.f32 0.35355338, %v6799_v9  ;;  %v8694_v27 = vpop.f32.mrb[95].mxu1 }
0x39b4   :  { %v6808_v45 = vsel %vm235_vm2, %v6804_v26, -inf }
0x39b5   :  { %6809 = vmax.xlane.f32.xlu1 %v6808_v45 }
0x39c6   :  { %6903 = vrot.lane.b32.xlu1 %v10282_v56, %s10772_s23 }
0x39ca   :  { %6981 = vrot.lane.b32.xlu1 %v10386_v51, %s10773_s28 }
0x39ce   :  { %6983 = vrot.lane.b32.xlu1 %v10388_v2, %s10773_s28 }
0x39d2   :  { %6991 = vrot.lane.b32.xlu1 %v6643_v8, %s10774_s29 }
0x3a3e   :  { %v6807_v30 = vpop.xlane.xlu0 %6806 }
0x3a3f   :  { %v6811_v63 = vsub.f32 %v6803_v54, %v6807_v30  ;;  %v7012_v54 = vld [vmem:[#allocation5 + $0x70] sm:$0xff] }
0x3a40   :  { %v8964_v25 = vpack.c.bf16 %v7013_v15, %v7012_v54 }
0x3a41   :  { %v6813_v1 = vmul.f32 1.442695, %v6811_v63 }
0x3a42   :  { %v6810_v32 = vpop.xlane.xlu1 %6809 }
0x3a43   :  { %9191 = vpow2.f32 %v6813_v1  ;;  %v6812_v61 = vsub.f32 %v6804_v26, %v6810_v32 }
0x3a45   :  { %v6815_v35 = vmul.f32 1.442695, %v6812_v61 }
0x3a46   :  { %v6904_v14 = vpop.permute.xlu1 %6903 }
0x3a47   :  { %9193 = vpow2.f32 %v6815_v35  ;;  %8701 = vmatpush3.msra.mxu1 %v6904_v14 }
0x3a4a   :  { %v6982_v45 = vpop.permute.xlu1 %6981 }
0x3a4b   :  { %v7003_v1 = vsel %vm235_vm2, %v10342_v47, %v6982_v45  ;;  %v7869_v47 = vld [vmem:[%s10704_s5 + $0x3] ss:$0 sm:$0xff] }
0x3a4c   :  { %v7874_v45 = vld [vmem:[%s10707_s8 + $0x60] sm:$0xff] }
0x3a4d   :  { %v9192_v10 = vpop.eup %9191 }
0x3a4e   :  { %v6817_v56 = vsel %vm235_vm2, %v9192_v10, 0.0  ;;  %v6984_v30 = vpop.permute.xlu1 %6983 }
0x3a4f   :  { %6818 = vadd.xlane.f32.xlu0 %v6817_v56 }
0x3a51   :  { %v9194_v51 = vpop.eup %9193 }
0x3a52   :  { %v6820_v38 = vsel %vm235_vm2, %v9194_v51, 0.0  ;;  %v6992_v32 = vpop.permute.xlu1 %6991 }
0x3a53   :  { %6821 = vadd.xlane.f32.xlu0 %v6820_v38 }
0x3a69   :  { %6827 = vrot.lane.b32.xlu0 %v10286_v46, %s10772_s23  ;;  %v7010_v46 = vld [vmem:[#allocation5 + $0x60] sm:$0xff] }
0x3a6d   :  { %6989 = vrot.lane.b32.xlu0 %v6567_v7, %s10774_s29  ;;  %v7011_v7 = vld [vmem:[#allocation5 + $0x68] sm:$0xff] }
0x3a6e   :  { %v8960_v13 = vpack.c.bf16 %v7011_v7, %v7010_v46 }
0x3adc   :  { %v6819_v2 = vpop.xlane.xlu0 %6818 }
0x3add   :  { %9195 = vrcp.f32 %v6819_v2 }
0x3ae0   :  { %v6822_v60 = vpop.xlane.xlu0 %6821 }
0x3ae1   :  { %9197 = vrcp.f32 %v6822_v60 }
0x3ae4   :  { %v6828_v59 = vpop.permute.xlu0 %6827 }
0x3ae5   :  { %8696 = vmatpush3.msra.mxu0 %v6828_v59 }
0x3ae6   :  { %8961 = vmatprep.subr.bf16.mxu0 %v8960_v13 }
0x3ae7   :  { %v9196_v5 = vpop.eup %9195 }
0x3ae8   :  { %v10444_v34 = vmul.f32 %v9196_v5, %v9192_v10  ;;  %v6990_v63 = vpop.permute.xlu0 %6989  ;;  %v7004_v10 = vsel %vm235_vm2, %v10344_v44, %v6984_v30  ;;  %v7875_v30 = vld [vmem:[%s10707_s8 + $0x68] sm:$0xff] }
0x3ae9   :  { %v7005_v61 = vsel %vm1585_vm4, %v7003_v1, %v6990_v63  ;;  %v7006_v56 = vsel %vm1585_vm4, %v7004_v10, %v6992_v32  ;;  %v8968_v63 = vpack.c.bf16 %v7875_v30, %v7874_v45  ;;  %v7876_v1 = vld [vmem:[%s10707_s8 + $0x70] sm:$0xff]  ;;  %v7877_v32 = vld [vmem:[%s10707_s8 + $0x78] sm:$0xff] }
0x3aea   :  { %8698 = vmatmul.mubr.msk.f32.vlgmr.msra.gmra.mrb[54].mxu0 %vm235_vm2, %v10444_v34  ;;  %v7238_v10 = vld [vmem:[#allocation7 + $0x190] sm:$0xff] }
0x3aeb   :  { %v9198_v24 = vpop.eup %9197  ;;  %8963 = vmatpush3.bf16.msra.mxu0 %v8960_v13  ;;  %8969 = vmatprep.subr.bf16.mxu1 %v8968_v63 }
0x3aec   :  { %v10448_v8 = vmul.f32 %v9198_v24, %v9194_v51  ;;  %8965 = vmatprep.subr.bf16.mxu0 %v8964_v25 }
0x3aee   :  { %8703 = vmatmul.mubr.msk.f32.vlgmr.msra.gmra.mrb[96].mxu1 %vm235_vm2, %v10448_v8 }
0x3aef   :  { %8967 = vmatpush3.bf16.msra.mxu0 %v8964_v25  ;;  %8971 = vmatpush3.bf16.msra.mxu1 %v8968_v63 }
0x3bbd   :  { %v6899_v18 = vpop.f32.mrb[54].mxu0 }
0x3bbe   :  { %6997 = vrot.lane.b32.xlu0 %v6899_v18, %s10775_s20  ;;  %v8699_v9 = vpop.f32.mrb[55].mxu0 }
0x3bc1   :  { %v6975_v26 = vpop.f32.mrb[96].mxu1 }
0x3bc2   :  { %6999 = vrot.lane.b32.xlu1 %v6975_v26, %s10775_s20  ;;  %v8704_v27 = vpop.f32.mrb[97].mxu1 }
0x3c30   :  { %v6998_v35 = vpop.permute.xlu0 %6997 }
0x3c31   :  { %v7007_v14 = vsel %vm1588_vm3, %v7005_v61, %v6998_v35  ;;  %v8972_v61 = vpack.c.bf16 %v7877_v32, %v7876_v1  ;;  %v7236_v35 = vld [vmem:[#allocation7 + $0x180] sm:$0xff] }
0x3c32   :  { %8713 = vmatprep.mubr.msk.f32.mxu0 %vm107_vm0, %v7007_v14  ;;  %v7237_v14 = vld [vmem:[#allocation7 + $0x188] sm:$0xff] }
0x3c33   :  { %8973 = vmatprep.subr.bf16.mxu1 %v8972_v61 }
0x3c34   :  { %v7000_v51 = vpop.permute.xlu1 %6999  ;;  %8975 = vmatpush3.bf16.msra.mxu1 %v8972_v61 }
0x3c35   :  { %v7008_v38 = vsel %vm1588_vm3, %v7006_v56, %v7000_v51  ;;  %v8976_v56 = vpack.c.bf16 %v7237_v14, %v7236_v35  ;;  %v7239_v51 = vld [vmem:[#allocation7 + $0x198] sm:$0xff]  ;;  %v7872_v14 = vld [vmem:[%s10705_s6 + $0x3] ss:$0 sm:$0xff] }
0x3c36   :  { %8714 = vmatmul.mubr.msk.f32.vlgmr.msra.gmra.mrb[56].mxu0 %vm107_vm0, %v7008_v38  ;;  %v8980_v38 = vpack.c.bf16 %v7239_v51, %v7238_v10 }
0x3c37   :  { %8977 = vmatprep.subr.bf16.mxu0 %v8976_v56 }
0x3c38   :  { %8979 = vmatpush3.bf16.msra.mxu0 %v8976_v56  ;;  %v7873_v56 = vld [vmem:[%s10706_s7 + $0x3] ss:$0 sm:$0xff] }
0x3c39   :  { %8981 = vmatprep.subr.bf16.mxu0 %v8980_v38 }
0x3c3c   :  { %8983 = vmatpush3.bf16.msra.mxu0 %v8980_v38 }
0x3d09   :  { %v8715_v2 = vpop.f32.mrb[56].mxu0 }
0x3d0a   :  { %v7097_v60 = vadd.f32 %v8715_v2, %v7869_v47  ;;  %v7091_v59 = vpop.f32.mrb[57].mxu0  ;;  %v7241_v2 = vld [vmem:[#allocation7 + $0x1a8] sm:$0xff] }
0x3d0b   :  { %v7092_v5 = vadd.f32 %v7869_v47, %v7091_v59  ;;  %v7240_v47 = vld [vmem:[#allocation7 + $0x1a0] sm:$0xff]  ;;  %v7242_v59 = vld [vmem:[#allocation7 + $0x1b0] sm:$0xff] }
0x3d0c   :  { %v10468_v24 = vadd.f32 %v7097_v60, %v10258_v57  ;;  %v8984_v60 = vpack.c.bf16 %v7241_v2, %v7240_v47 }
0x3d0d   :  { %v10471_v44 = vadd.f32 %v7092_v5, %v10261_v37  ;;  %v7243_v5 = vld [vmem:[#allocation7 + $0x1b8] sm:$0xff] }
0x3d0e   :  { %v7107_v46 = vsel %vm107_vm0, %v10468_v24, 0.0  ;;  %8985 = vmatprep.subr.bf16.mxu0 %v8984_v60 }
0x3d0f   :  { %7108 = vadd.xlane.f32.xlu1 %v7107_v46  ;;  %v7104_v7 = vsel %vm107_vm0, %v10471_v44, 0.0  ;;  %v8988_v46 = vpack.c.bf16 %v7243_v5, %v7242_v59  ;;  %8987 = vmatpush3.bf16.msra.mxu0 %v8984_v60  ;;  %v7250_v5 = vld [vmem:[#allocation7 + $0x1f0] sm:$0xff] }
0x3d10   :  { %7105 = vadd.xlane.f32.xlu0 %v7104_v7  ;;  %v7244_v7 = vld [vmem:[#allocation7 + $0x1c0] sm:$0xff] }
0x3d11   :  { %8989 = vmatprep.subr.bf16.mxu0 %v8988_v46 }
0x3d13   :  { %8991 = vmatpush3.bf16.msra.mxu0 %v8988_v46 }
0x3d9c   :  { %v7109_v13 = vpop.xlane.xlu1 %7108 }
0x3d9d   :  { %v7111_v54 = vmul.f32 0.03125, %v7109_v13  ;;  %v7106_v15 = vpop.xlane.xlu0 %7105  ;;  %v7245_v13 = vld [vmem:[#allocation7 + $0x1c8] sm:$0xff] }
0x3d9e   :  { %v7110_v25 = vmul.f32 0.03125, %v7106_v15  ;;  %v7246_v15 = vld [vmem:[#allocation7 + $0x1d0] sm:$0xff] }
0x3d9f   :  { %v10478_v18 = vsub.f32 %v10468_v24, %v7111_v54  ;;  %v8992_v54 = vpack.c.bf16 %v7245_v13, %v7244_v7  ;;  %v7878_v7 = vld [vmem:[%s10708_s9 + $0x3] ss:$0 sm:$0xff]  ;;  %s9321_s9 = smov 32  }
0x3da0   :  { %v7112_v57 = vsub.f32 %v10471_v44, %v7110_v25  ;;  %v7247_v25 = vld [vmem:[#allocation7 + $0x1d8] sm:$0xff] }
0x3da1   :  { %v7115_v26 = vmul.f32 %v10478_v18, %v10478_v18  ;;  %8993 = vmatprep.subr.bf16.mxu0 %v8992_v54 }
0x3da2   :  { %v7114_v9 = vmul.f32 %v7112_v57, %v7112_v57  ;;  %8995 = vmatpush3.bf16.msra.mxu0 %v8992_v54 }
0x3da3   :  { %v7119_v27 = vsel %vm107_vm0, %v7115_v26, 0.0  ;;  %v7249_v26 = vld [vmem:[#allocation7 + $0x1e8] sm:$0xff] }
0x3da4   :  { %v7116_v37 = vsel %vm107_vm0, %v7114_v9, 0.0  ;;  %v8996_v9 = vpack.c.bf16 %v7247_v25, %v7246_v15 }
0x3da5   :  { %7117 = vadd.xlane.f32.xlu0 %v7116_v37  ;;  %v7248_v37 = vld [vmem:[#allocation7 + $0x1e0] sm:$0xff] }
0x3da6   :  { %8997 = vmatprep.subr.bf16.mxu0 %v8996_v9 }
0x3da7   :  { %8999 = vmatpush3.bf16.msra.mxu0 %v8996_v9 }
0x3da9   :  { %7120 = vadd.xlane.f32.xlu0 %v7119_v27  ;;  %v9000_v27 = vpack.c.bf16 %v7249_v26, %v7248_v37  ;;  %v7881_v37 = vld [vmem:[%s10710_s11 + $0x3] ss:$0 sm:$0xff] }
0x3dab   :  { %9001 = vmatprep.subr.bf16.mxu0 %v9000_v27 }
0x3dac   :  { %9003 = vmatpush3.bf16.msra.mxu0 %v9000_v27 }
0x3e32   :  { %v7118_v45 = vpop.xlane.xlu0 %7117 }
0x3e33   :  { %v7122_v30 = vmul.f32 0.03125, %v7118_v45 }
0x3e35   :  { %v7124_v63 = vadd.f32 1e-05, %v7122_v30 }
0x3e36   :  { %v7121_v1 = vpop.xlane.xlu0 %7120 }
0x3e37   :  { %9199 = vrsqrt.f32 %v7124_v63  ;;  %v7123_v32 = vmul.f32 0.03125, %v7121_v1 }
0x3e39   :  { %v7125_v61 = vadd.f32 1e-05, %v7123_v32 }
0x3e3b   :  { %9201 = vrsqrt.f32 %v7125_v61 }
0x3e41   :  { %v9200_v35 = vpop.eup %9199 }
0x3e42   :  { %v7128_v10 = vmul.f32 %v9200_v35, %v7112_v57  ;;  %v7251_v57 = vld [vmem:[#allocation7 + $0x1f8] sm:$0xff] }
0x3e43   :  { %v9004_v46 = vpack.c.bf16 %v7251_v57, %v7250_v5 }
0x3e44   :  { %v7134_v51 = vmul.f32 %v7872_v14, %v7128_v10 }
0x3e45   :  { %v9202_v38 = vpop.eup %9201  ;;  %9005 = vmatprep.subr.bf16.mxu0 %v9004_v46 }
0x3e46   :  { %v7129_v47 = vmul.f32 %v9202_v38, %v10478_v18  ;;  %v7140_v2 = vadd.f32 %v7873_v56, %v7134_v51  ;;  %9007 = vmatpush3.bf16.msra.mxu0 %v9004_v46 }
0x3e48   :  { %v7135_v60 = vmul.f32 %v7872_v14, %v7129_v47  ;;  %8724 = vmatprep.mubr.msk.f32.mxu1 %vm107_vm0, %v7140_v2 }
0x3e4a   :  { %v7141_v59 = vadd.f32 %v7873_v56, %v7135_v60 }
0x3e4c   :  { %8725 = vmatmul.mubr.msk.f32.vlgmr.msra.gmra.mrb[98].mxu1 %vm107_vm0, %v7141_v59 }
0x3e4d   :  { %8770 = vmatprep.mubr.msk.f32.mxu1 %vm9307_vm1, %v9306_v36 }
0x3f1f   :  { %v8726_v18 = vpop.f32.mrb[98].mxu1 }
0x3f20   :  { %v7230_v13 = vadd.f32 %v8726_v18, %v7878_v7  ;;  %v7224_v54 = vpop.f32.mrb[99].mxu1 }
0x3f21   :  { %v7225_v15 = vadd.f32 %v7878_v7, %v7224_v54 }
0x3f22   :  { %v7234_v9 = vmax.f32 %v7230_v13, 0.0 }
0x3f23   :  { %v7233_v25 = vmax.f32 %v7225_v15, 0.0 }
0x3f25   :  { %8759 = vmatprep.mubr.f32.mxu0 %v7233_v25 }
0x3f26   :  { %8760 = vmatmul.mubr.f32.vlgmr.msra.gmra.mrb[58].mxu0 %v7234_v9 }
0x3ff9   :  { %v8761_v26 = vpop.f32.mrb[58].mxu0 }
0x3ffa   :  { %v7329_v27 = vadd.f32 %v8761_v26, %v7881_v37  ;;  %v7323_v45 = vpop.f32.mrb[59].mxu0 }
0x3ffb   :  { %v7324_v30 = vadd.f32 %v7881_v37, %v7323_v45 }
0x3ffc   :  { %v7333_v63 = vadd.f32 %v7329_v27, %v10468_v24 }
0x3ffd   :  { %v7332_v1 = vadd.f32 %v7324_v30, %v10471_v44 }
0x3ffe   :  { %v7472_v32 = vsel %vm107_vm0, %v7333_v63, 0.0 }
0x3fff   :  { %7473 = vadd.xlane.f32.xlu1 %v7472_v32  ;;  %v7469_v61 = vsel %vm107_vm0, %v7332_v1, 0.0 }
0x4000   :  { %7470 = vadd.xlane.f32.xlu0 %v7469_v61 }
0x408c   :  { %v7474_v35 = vpop.xlane.xlu1 %7473 }
0x408d   :  { %v7476_v14 = vmul.f32 0.03125, %v7474_v35  ;;  %v7471_v10 = vpop.xlane.xlu0 %7470 }
0x408e   :  { %v7475_v56 = vmul.f32 0.03125, %v7471_v10 }
0x408f   :  { %v10518_v51 = vsub.f32 %v7333_v63, %v7476_v14 }
0x4090   :  { %v10520_v38 = vsub.f32 %v7332_v1, %v7475_v56 }
0x4091   :  { %v7480_v47 = vmul.f32 %v10518_v51, %v10518_v51 }
0x4092   :  { %v7479_v24 = vmul.f32 %v10520_v38, %v10520_v38 }
0x4093   :  { %v7484_v44 = vsel %vm107_vm0, %v7480_v47, 0.0 }
0x4094   :  { %7485 = vadd.xlane.f32.xlu1 %v7484_v44  ;;  %v7481_v2 = vsel %vm107_vm0, %v7479_v24, 0.0 }
0x4095   :  { %7482 = vadd.xlane.f32.xlu0 %v7481_v2 }
0x40a5   :  { %7336 = vrot.lane.b32.xlu1 %v9597_v43, %s10773_s28  ;;  %v7529_v43 = vld [vmem:[%s10713_s14 + $0x8] sm:$0xff] }
0x40a9   :  { %7340 = vrot.lane.b32.xlu1 %v9634_v16, %s10774_s29  ;;  %v9322_v16 = vmov 0.0|0.0  }
0x40aa   :  { %9008 = vmatprep.subr.bf16.mxu1 %v9322_v16 }
0x40ab   :  { %7334 = vrot.lane.b32.xlu0 %v9590_v40, %s10773_s28  ;;  %v7528_v40 = vld [vmem:[%s10713_s14] sm:$0xff] }
0x40ad   :  { %7342 = vrot.lane.b32.xlu1 %v9641_v19, %s10774_s29  ;;  %v9009_v19 = vpack.c.bf16 %v7529_v43, %v7528_v40  ;;  %s10788_s29 = sld [smem:[#allocation20_spill]] }
0x40af   :  { %7346 = vrot.lane.b32.xlu0 %v9670_v53, %s10775_s20  ;;  %9010 = vmatpush3.bf16.msra.mxu1 %v9009_v19  ;;  %v7530_v53 = vld [vmem:[%s10713_s14 + $0x10] sm:$0xff] }
0x40b0   :  { %9011 = vmatprep.subr.bf16.mxu1 %v9322_v16 }
0x40b1   :  { %7348 = vrot.lane.b32.xlu1 %v9674_v55, %s10775_s20  ;;  %v7531_v55 = vld [vmem:[%s10713_s14 + $0x18] sm:$0xff]  ;;  %s9323_s20 = smov [#allocation8]  }
0x40b3   :  { %7352 = vrot.lane.b32.xlu0 %v9803_v11, %s9321_s9  ;;  %v9012_v11 = vpack.c.bf16 %v7531_v55, %v7530_v53 }
0x40b5   :  { %7354 = vrot.lane.b32.xlu1 %v9809_v58, %s9321_s9  ;;  %9013 = vmatpush3.bf16.msra.mxu1 %v9012_v11  ;;  %s10787_s9 = sld [smem:[#allocation18_spill]] }
0x40b6   :  { %9014 = vmatprep.subr.bf16.mxu1 %v9322_v16 }
0x40b7   :  { %7358 = vrot.lane.b32.xlu0 %v9848_v0, %s10772_s23 }
0x40b9   :  { %7360 = vrot.lane.b32.xlu1 %v9855_v39, %s10772_s23 }
0x40bb   :  { %7364 = vrot.lane.b32.xlu0 %v9892_v20, %s10769_s10 }
0x40bd   :  { %7366 = vrot.lane.b32.xlu1 %v9899_v22, %s10769_s10  ;;  %s7708_s10 = sshll.u32 %s9323_s20, 4  ;;  %s7709_s10 = int_to_ptr.vmem [resolvable:$true] %s7708_s10 }
0x40be   :  { %s9273_s23 = scalar_lea.vmem %s7709_s10, 32  ;;  %p9278_p11 = scmp.lt.s32.totalorder %s7709_s10, %s7709_s10 }
0x40bf   :  { %7370 = vrot.lane.b32.xlu0 %v9928_v62, %s10780_s25  ;;  %p9274_p10 = scmp.ne.s32.totalorder %s7709_s10, %s9273_s23  ;;  %p9279_p12 = scmp.lt.s32.totalorder %s9273_s23, %s9273_s23 }
0x40c1   :  { %7372 = vrot.lane.b32.xlu1 %v9932_v3, %s10780_s25  ;;  %p9280_p13 = por %p9279_p12, %p9278_p11 }
0x40c3   :  { %7376 = vrot.lane.b32.xlu0 %v10061_v41, %s10777_s4  ;;  %p9281_p0 = pnand %p9280_p13, %p9274_p10 }
0x40c5   :  { %7378 = vrot.lane.b32.xlu1 %v10067_v48, %s10777_s4 }
0x40c7   :  { %7382 = vrot.lane.b32.xlu0 %v10106_v29, %s10770_s27 }
0x40c9   :  { %7384 = vrot.lane.b32.xlu1 %v10113_v31, %s10770_s27 }
0x40cb   :  { %7388 = vrot.lane.b32.xlu0 %v10150_v21, %s10781_s3 }
0x40cd   :  { %7390 = vrot.lane.b32.xlu1 %v10157_v28, %s10781_s3  ;;  %s10785_s3 = sld [smem:[#allocation19_spill]] }
0x40cf   :  { %7394 = vrot.lane.b32.xlu0 %v10186_v12, %s10778_s30 }
0x40d1   :  { %7396 = vrot.lane.b32.xlu1 %v10190_v17, %s10778_s30  ;;  %s10784_s30 = sld [smem:[#allocation17_spill]] }
0x40d3   :  { %7400 = vrot.lane.b32.xlu0 %v10319_v49, %s10776_s22  ;;  %v7616_v14 = vld [vmem:[%s10785_s3] sm:$0xff]  ;;  %v7617_v10 = vld [vmem:[%s10785_s3 + $0x8] sm:$0xff] }
0x40d4   :  { %v9015_v24 = vpack.c.bf16 %v7617_v10, %v7616_v14 }
0x40d5   :  { %7402 = vrot.lane.b32.xlu1 %v10325_v50, %s10776_s22 }
0x40d7   :  { %7406 = vrot.lane.b32.xlu0 %v10364_v42, %s10771_s2  ;;  %v7883_v42 = vld [vmem:[%s10784_s30] ss:$0 sm:$0xff] }
0x40d9   :  { %7408 = vrot.lane.b32.xlu1 %v10371_v52, %s10771_s2  ;;  %s10783_s2 = sld [smem:[#allocation16_spill]] }
0x40db   :  { %7412 = vrot.lane.b32.xlu0 %v10408_v23, %s10782_s26 }
0x40dd   :  { %7414 = vrot.lane.b32.xlu1 %v10415_v33, %s10782_s26 }
0x40df   :  { %7418 = vrot.lane.b32.xlu0 %v10444_v34, %s10779_s1  ;;  %v7882_v12 = vld [vmem:[%s10783_s2] ss:$0 sm:$0xff] }
0x40e1   :  { %7420 = vrot.lane.b32.xlu1 %v10448_v8, %s10779_s1 }
0x4121   :  { %v7486_v58 = vpop.xlane.xlu1 %7485 }
0x4122   :  { %v7488_v0 = vmul.f32 0.03125, %v7486_v58  ;;  %v7483_v39 = vpop.xlane.xlu0 %7482 }
0x4123   :  { %v7487_v20 = vmul.f32 0.03125, %v7483_v39 }
0x4124   :  { %v7490_v22 = vadd.f32 1e-05, %v7488_v0 }
0x4125   :  { %v7489_v62 = vadd.f32 1e-05, %v7487_v20  ;;  %v10601_v3 = vpop.permute.xlu1 %7336 }
0x4126   :  { %9203 = vrsqrt.f32 %v7490_v22  ;;  %v7335_v41 = vpop.permute.xlu0 %7334  ;;  %v7425_v22 = vsel %vm235_vm2, %v9553_v6, %v10601_v3 }
0x4127   :  { %9205 = vrsqrt.f32 %v7489_v62  ;;  %v7424_v19 = vsel %vm235_vm2, %v9546_v4, %v7335_v41  ;;  %vm7700_vm2 = vcmask 25600  }
0x4129   :  { %v7341_v48 = vpop.permute.xlu1 %7340 }
0x412a   :  { %v7347_v29 = vpop.permute.xlu0 %7346  ;;  %v7426_v53 = vsel %vm1585_vm4, %v7424_v19, %v7341_v48 }
0x412b   :  { %v7428_v58 = vsel %vm1588_vm3, %v7426_v53, %v7347_v29 }
0x412d   :  { %v10603_v31 = vpop.permute.xlu1 %7342 }
0x412e   :  { %v7353_v21 = vpop.permute.xlu0 %7352  ;;  %v7427_v41 = vsel %vm1585_vm4, %v7425_v22, %v10603_v31 }
0x412f   :  { %v7430_v0 = vsel %vm107_vm0, %v7428_v58, %v7353_v21 }
0x4130   :  { %v9204_v28 = vpop.eup %9203 }
0x4131   :  { %v9206_v17 = vpop.eup %9205  ;;  %v7494_v49 = vmul.f32 %v9204_v28, %v10518_v51  ;;  %v10609_v50 = vpop.permute.xlu1 %7348 }
0x4132   :  { %v7493_v52 = vmul.f32 %v9206_v17, %v10520_v38  ;;  %v7359_v23 = vpop.permute.xlu0 %7358  ;;  %v7429_v21 = vsel %vm1588_vm3, %v7427_v41, %v10609_v50 }
0x4133   :  { %v7502_v33 = vmul.f32 %v7882_v12, %v7494_v49  ;;  %v7433_v39 = vsel %vm7432_vm6, %v7430_v0, %v7359_v23 }
0x4134   :  { %v7501_v34 = vmul.f32 %v7882_v12, %v7493_v52 }
0x4135   :  { %v7510_v8 = vadd.f32 %v7883_v42, %v7502_v33  ;;  %v10615_v60 = vpop.permute.xlu1 %7354 }
0x4136   :  { %v7509_v59 = vadd.f32 %v7883_v42, %v7501_v34  ;;  %v7365_v5 = vpop.permute.xlu0 %7364  ;;  %v7431_v6 = vsel %vm107_vm0, %v7429_v21, %v10615_v60 }
0x4137   :  { %v7518_v57 = vsel %vm107_vm0, %v7510_v8, 0.0 }
0x4138   :  { %v7511_v46 = vsel %vm107_vm0, %v7509_v59, 0.0  ;;  %v7519_v7 = vrot.slane %v7518_v57, 4 }
0x4139   :  { %v10619_v18 = vpop.permute.xlu1 %7360  ;;  %v7512_v13 = vrot.slane %v7511_v46, 4 }
0x413a   :  { %v7371_v54 = vpop.permute.xlu0 %7370  ;;  %v7520_v15 = vadd.f32 %v7519_v7, %v7518_v57  ;;  %v7434_v31 = vsel %vm7432_vm6, %v7431_v6, %v10619_v18 }
0x413b   :  { %v7513_v25 = vadd.f32 %v7512_v13, %v7511_v46 }
0x413c   :  { %v7521_v9 = vrot.slane %v7520_v15, 2 }
0x413d   :  { %v7367_v37 = vpop.permute.xlu1 %7366  ;;  %v7514_v26 = vrot.slane %v7513_v25, 2 }
0x413e   :  { %v7377_v27 = vpop.permute.xlu0 %7376  ;;  %v7522_v45 = vadd.f32 %v7521_v9, %v7520_v15  ;;  %v7437_v49 = vsel %vm7435_vm7, %v7434_v31, %v7367_v37  ;;  %v7618_v15 = vld [vmem:[%s10785_s3 + $0x10] sm:$0xff]  ;;  %v7884_v37 = vld [vmem:[%s10787_s9] ss:$0 sm:$0xff] }
0x413f   :  { %v7515_v30 = vadd.f32 %v7514_v26, %v7513_v25  ;;  %v7619_v25 = vld [vmem:[%s10785_s3 + $0x18] sm:$0xff] }
0x4140   :  { %v7523_v63 = vrot.slane %v7522_v45, 1  ;;  %v9018_v9 = vpack.c.bf16 %v7619_v25, %v7618_v15 }
0x4141   :  { %v7373_v1 = vpop.permute.xlu1 %7372  ;;  %v7516_v32 = vrot.slane %v7515_v30, 1 }
0x4142   :  { %v7383_v61 = vpop.permute.xlu0 %7382  ;;  %v7524_v35 = vadd.f32 %v7523_v63, %v7522_v45  ;;  %v7440_v52 = vsel %vm7438_vm8, %v7437_v49, %v7373_v1  ;;  %v7886_v63 = vld [vmem:[%s10788_s29] ss:$0 sm:$0xff] }
0x4143   :  { %v7517_v56 = vadd.f32 %v7516_v32, %v7515_v30 }
0x4144   :  { %v7527_v51 = vmul.f32 0.125, %v7524_v35 }
0x4145   :  { %v7379_v38 = vpop.permute.xlu1 %7378  ;;  %v7526_v47 = vmul.f32 0.125, %v7517_v56 }
0x4146   :  { %v7389_v44 = vpop.permute.xlu0 %7388  ;;  %v7443_v34 = vsel %vm7441_vm9, %v7440_v52, %v7379_v38 }
0x4147   :  { %v7542_v2 = vsel %vm7541_vm5, %v7527_v51, %v7526_v47 }
0x4148   :  { %8771 = vmatmul.mubr.msk.f32.vlgmr.msra.gmra.mrb[100].mxu1 %vm107_vm0, %v7542_v2 }
0x4149   :  { %v7385_v40 = vpop.permute.xlu1 %7384  ;;  %9016 = vmatpush3.bf16.msra.mxu1 %v9015_v24  ;;  %8781 = vmatprep.mubr.msk.f32.mxu1 %vm9307_vm1, %v9306_v36  ;;  %vm7462_vm1 = vcmask 982016  }
0x414a   :  { %v7395_v43 = vpop.permute.xlu0 %7394  ;;  %9017 = vmatprep.subr.bf16.mxu1 %v9322_v16  ;;  %v7436_v16 = vsel %vm7435_vm7, %v7433_v39, %v7365_v5  ;;  %v7446_v60 = vsel %vm7444_vm10, %v7443_v34, %v7385_v40 }
0x414b   :  { %v7439_v4 = vsel %vm7438_vm8, %v7436_v16, %v7371_v54 }
0x414c   :  { %v7442_v62 = vsel %vm7441_vm9, %v7439_v4, %v7377_v27 }
0x414d   :  { %v7391_v55 = vpop.permute.xlu1 %7390  ;;  %v7445_v48 = vsel %vm7444_vm10, %v7442_v62, %v7383_v61  ;;  %9019 = vmatpush3.bf16.msra.mxu1 %v9018_v9 }
0x414e   :  { %v7401_v11 = vpop.permute.xlu0 %7400  ;;  %v7448_v28 = vsel %vm7447_vm11, %v7445_v48, %v7389_v44  ;;  %v7449_v59 = vsel %vm7447_vm11, %v7446_v60, %v7391_v55 }
0x414f   :  { %v7451_v3 = vsel %vm7450_vm12, %v7448_v28, %v7395_v43 }
0x4150   :  { %v7454_v17 = vsel %vm7453_vm13, %v7451_v3, %v7401_v11 }
0x4151   :  { %v7397_v36 = vpop.permute.xlu1 %7396 }
0x4152   :  { %v7407_v20 = vpop.permute.xlu0 %7406  ;;  %v7452_v57 = vsel %vm7450_vm12, %v7449_v59, %v7397_v36 }
0x4153   :  { %v7457_v50 = vsel %vm7456_vm14, %v7454_v17, %v7407_v20 }
0x4155   :  { %v7403_v29 = vpop.permute.xlu1 %7402 }
0x4156   :  { %v7413_v12 = vpop.permute.xlu0 %7412  ;;  %v7455_v46 = vsel %vm7453_vm13, %v7452_v57, %v7403_v29 }
0x4157   :  { %v7460_v23 = vsel %vm7459_vm15, %v7457_v50, %v7413_v12 }
0x4159   :  { %v7409_v42 = vpop.permute.xlu1 %7408 }
0x415a   :  { %v7419_v33 = vpop.permute.xlu0 %7418  ;;  %v7458_v7 = vsel %vm7456_vm14, %v7455_v46, %v7409_v42 }
0x415b   :  { %v7463_v8 = vsel %vm7462_vm1, %v7460_v23, %v7419_v33 }
0x415c   :  { %7465 = vst [vmem:[%s10786_s15] sm:$0xff] %v7463_v8 }
0x415d   :  { %v7415_v5 = vpop.permute.xlu1 %7414 }
0x415e   :  { %v7461_v18 = vsel %vm7459_vm15, %v7458_v7, %v7415_v5 }
0x4161   :  { %v7421_v13 = vpop.permute.xlu1 %7420 }
0x4162   :  { %v7464_v54 = vsel %vm7462_vm1, %v7461_v18, %v7421_v13 }
0x4163   :  { %7466 = vst [vmem:[%s10786_s15 + $0x8] sm:$0xff] %v7464_v54 }
0x421b   :  { %v7611_v26 = vpop.f32.mrb[100].mxu1 }
0x421c   :  { %v7612_v27 = vadd.f32 %v7884_v37, %v7611_v26  ;;  %v8772_v45 = vpop.f32.mrb[101].mxu1 }
0x421e   :  { %v7615_v30 = vmax.f32 %v7612_v27, 0.0 }
0x4220   :  { %8782 = vmatmul.mubr.msk.f32.vlgmr.msra.gmra.mrb[102].mxu1 %vm107_vm0, %v7615_v30 }
0x42f3   :  { %v7696_v1 = vpop.f32.mrb[102].mxu1 }
0x42f4   :  { %v7697_v32 = vadd.f32 %v7886_v63, %v7696_v1  ;;  %v8783_v61 = vpop.f32.mrb[103].mxu1 }
0x42f6   :  { %7701 = vst.msk [vmem:[#allocation8] sm:$0x3] %vm7700_vm2, %v7697_v32 }
0x42f7   :  { %9284 = shalt.err (!%p9281_p0)
}
0x42f8   :  { %s10789_s14 = sld [smem:[#allocation21_spill]] }
0x42fe   :  { %s9285_s27 = scalar_lea.hbm %s10789_s14, 32 }
0x42ff   :  { %p9286_p1 = scmp.ne.s32.totalorder %s10789_s14, %s9285_s27  ;;  %p9289_p2 = scmp.lt.u32.totalorder %s9285_s27, %s10789_s14 }
0x4301   :  { %p9291_p3 = pnand %p9289_p2, %p9286_p1 }
0x4303   :  { %9294 = shalt.err (!%p9291_p3)
}
0x4304   :  { %7711 = dma.vmem_to_hbm [thread:$0]  %s7709_s10, 32, %s10789_s14, [#allocation4]  }
0x4305   :  { %9299 = dma.done.wait [#allocation4], 32  }
0x4306   :  { %9300 = vsyncadd [#allocation4], 4294967264 }
0x4307   :  { %7719 = vsyncpa [#allocation3], 1 }
0x4308   :  { %7720 = vsyncpa [#allocation6], 1 }
0x4309   :  { %7721 = vsyncpa [#allocation4], 1 }

</bundles_post_ra>
